<compile_context>
chip_gen: v7x
topology: tpu7x:2x2x1
jax: 0.10.0
libtpu: 0.0.40
codegen_flags: <defaults>
</compile_context>

<pallas_src>
import numpy as np
import jax
import jax.numpy as jnp
from jax.experimental import pallas as pl
from jax.experimental.pallas import tpu as pltpu

# ----------------------------------------------------------------------------
# Model constants
# ----------------------------------------------------------------------------
E = 80            # listener input feature size
LH = 256          # listener LSTM hidden size
KEY_SIZE = 256
VALUE_SIZE = 256
SH = 512          # speller LSTM hidden size
CTX = 256         # attention context size
N_CLASSES = 33
NCP = 128         # class dim padded to a full lane group
BP = 8            # batch padded to one sublane group


def _step_spec(shape):
    nd = len(shape)
    blk = (1,) + tuple(shape[1:])
    return pl.BlockSpec(blk, lambda i, _nd=nd: (i,) + (0,) * (_nd - 1))


def _resident_spec(shape):
    """Constant-index (VMEM-resident) operand; single-buffered when supported."""
    nd = len(shape)
    idx = lambda *_a, _nd=nd: (0,) * _nd
    try:
        return pl.BlockSpec(tuple(shape), idx, pipeline_mode=pl.Buffered(1))
    except (TypeError, AttributeError):   # older pallas without pipeline_mode
        return pl.BlockSpec(tuple(shape), idx)


# ----------------------------------------------------------------------------
# Listener: fused bidirectional LSTM layer (one pallas_call per layer)
# ----------------------------------------------------------------------------

def _bilstm_seq_kernel(xf_ref, xb_ref, lens_ref,
                       wihf_ref, whhf_ref, bf_ref,
                       wihb_ref, whhb_ref, bb_ref,
                       outf_ref, outb_ref,
                       hf_s, cf_s, hb_s, cb_s):
    """Both BiLSTM directions fused over the full sequence (grid=(T,)).

    xf_ref/xb_ref: (1, Bp, Dp) blocks at time t and T-1-t respectively.
    lens_ref:      (Bp, 1) int32 valid lengths (resident).
    w*/b*:         bf16 W_ih (Dp,4H), bf16 W_hh (H,4H), f32 bias (1,4H), resident.
    outf/outb:     (1, Bp, H) output blocks at t and T-1-t.
    h*/c*:         (Bp, H) recurrent state carried across grid steps.
    """
    t = pl.program_id(0)
    T = pl.num_programs(0)

    @pl.when(t == 0)
    def _():
        hf_s[...] = jnp.zeros_like(hf_s)
        cf_s[...] = jnp.zeros_like(cf_s)
        hb_s[...] = jnp.zeros_like(hb_s)
        cb_s[...] = jnp.zeros_like(cb_s)

    H = hf_s.shape[1]
    lens = lens_ref[...]                                  # (Bp, 1) int32
    valid_f = (lens > t).astype(jnp.float32)              # forward time = t
    valid_b = (lens > (T - 1 - t)).astype(jnp.float32)    # backward time = T-1-t

    def direction(x, h, c, wih_ref, whh_ref, b_ref, valid):
        # split matmul x@W_ih + h@W_hh: no per-step concat copy, bf16 MXU.
        gates = (jnp.dot(x.astype(jnp.bfloat16), wih_ref[...],
                         preferred_element_type=jnp.float32)
                 + jnp.dot(h.astype(jnp.bfloat16), whh_ref[...],
                           preferred_element_type=jnp.float32)
                 + b_ref[...])
        gi = jax.nn.sigmoid(gates[:, 0 * H:1 * H])
        gf = jax.nn.sigmoid(gates[:, 1 * H:2 * H])
        gg = jnp.tanh(gates[:, 2 * H:3 * H])
        go = jax.nn.sigmoid(gates[:, 3 * H:4 * H])
        c_new = gf * c + gi * gg
        h_new = go * jnp.tanh(c_new)
        h_keep = valid * h_new + (1.0 - valid) * h
        c_keep = valid * c_new + (1.0 - valid) * c
        return h_keep, c_keep, valid * h_new              # packed-seq outputs 0-padded

    hf, cf, of = direction(xf_ref[0], hf_s[...], cf_s[...],
                           wihf_ref, whhf_ref, bf_ref, valid_f)
    hb, cb, ob = direction(xb_ref[0], hb_s[...], cb_s[...],
                           wihb_ref, whhb_ref, bb_ref, valid_b)
    hf_s[...], cf_s[...] = hf, cf
    hb_s[...], cb_s[...] = hb, cb
    outf_ref[0] = of
    outb_ref[0] = ob


def bilstm_layer(x, lens, p):
    """x: (T, Bp, Dp) f32, lens: (Bp,) int32 -> (T, Bp, 2H)."""
    T, Bp, Dp = x.shape
    H = LH
    lens2d = lens.reshape(Bp, 1).astype(jnp.int32)
    fwd_map = lambda t: (t, 0, 0)
    bwd_map = lambda t: (T - 1 - t, 0, 0)
    # Resident VMEM budget (bf16, Buffered(1)): W_ih 2x(Dp*4H*2B) + W_hh
    # 2x(H*4H*2B) ~ 5 MB for Dp=1024; streamed blocks < 0.2 MB.
    out_f, out_b = pl.pallas_call(
        _bilstm_seq_kernel,
        out_shape=(jax.ShapeDtypeStruct((T, Bp, H), jnp.float32),
                   jax.ShapeDtypeStruct((T, Bp, H), jnp.float32)),
        grid=(T,),
        in_specs=[pl.BlockSpec((1, Bp, Dp), fwd_map),
                  pl.BlockSpec((1, Bp, Dp), bwd_map),
                  _resident_spec((Bp, 1)),
                  _resident_spec((Dp, 4 * H)),
                  _resident_spec((H, 4 * H)),
                  _resident_spec((1, 4 * H)),
                  _resident_spec((Dp, 4 * H)),
                  _resident_spec((H, 4 * H)),
                  _resident_spec((1, 4 * H))],
        out_specs=(pl.BlockSpec((1, Bp, H), fwd_map),
                   pl.BlockSpec((1, Bp, H), bwd_map)),
        scratch_shapes=[pltpu.VMEM((Bp, H), jnp.float32) for _ in range(4)],
        compiler_params=pltpu.CompilerParams(
            dimension_semantics=("arbitrary",),
            vmem_limit_bytes=32 * 1024 * 1024),
    )(x, x, lens2d, p['wih_f'], p['whh_f'], p['bf'],
      p['wih_b'], p['whh_b'], p['bb'])
    return jnp.concatenate([out_f, out_b], axis=-1)


def _linear_kernel(x_ref, w_ref, b_ref, o_ref):
    o_ref[...] = (jnp.dot(x_ref[...], w_ref[...],
                          preferred_element_type=jnp.float32) + b_ref[...])


def linear(x, w, b2d):
    """x: (M, K), w: (K, N), b2d: (1, N) -> (M, N)."""
    M, K = x.shape
    N = w.shape[1]
    return pl.pallas_call(
        _linear_kernel,
        out_shape=jax.ShapeDtypeStruct((M, N), jnp.float32),
        grid=(1,),
        in_specs=[pl.BlockSpec((M, K), lambda i: (0, 0)),
                  pl.BlockSpec((K, N), lambda i: (0, 0)),
                  pl.BlockSpec((1, N), lambda i: (0, 0))],
        out_specs=pl.BlockSpec((M, N), lambda i: (0, 0)),
        compiler_params=pltpu.CompilerParams(
            dimension_semantics=("arbitrary",)),
    )(x, w, b2d)


# ----------------------------------------------------------------------------
# Fused speller kernel (whole decode loop, grid=(num_steps,))
# ----------------------------------------------------------------------------

def _speller_kernel(tgt_ref, tf_ref, key_ref, val_ref, mask_ref,
                    wemb_ref, bemb_ref, bc_ref, wq_ref, bq_ref,
                    wfch_ref, wfcc_ref, bfc_ref, wout_ref, bout_ref,
                    hinit_ref, cinit_ref,
                    w1e_ref, w1c_ref, w1h_ref,
                    w2x_ref, w2h_ref, w3x_ref, w3h_ref,
                    logits_ref, attn_ref,
                    h1s, c1s, h2s, c2s, h3s, c3s, ctx_s, prev_s):
    step = pl.program_id(0)

    @pl.when(step == 0)
    def _():
        h1s[...] = hinit_ref[0]
        h2s[...] = hinit_ref[1]
        h3s[...] = hinit_ref[2]
        c1s[...] = cinit_ref[0]
        c2s[...] = cinit_ref[1]
        c3s[...] = cinit_ref[2]
        ctx_s[...] = jnp.zeros_like(ctx_s)
        prev_s[...] = jnp.zeros_like(prev_s)

    # teacher-forcing blend: 1.0 -> one-hot target, 0.0 -> previous raw logits
    # (matches the PyTorch reference which feeds raw logits back).
    tf = tf_ref[0]                                              # (1, 1)
    input_char = tf * tgt_ref[0] + (1.0 - tf) * prev_s[...]     # (Bp, NCP)

    char_embed = (jnp.dot(input_char, wemb_ref[...],
                          preferred_element_type=jnp.float32) + bemb_ref[...])

    def bdot(a, w_ref):
        return jnp.dot(a.astype(jnp.bfloat16), w_ref[...],
                       preferred_element_type=jnp.float32)

    def gates_to_hc(gates, c):
        gi = jax.nn.sigmoid(gates[:, 0 * SH:1 * SH])
        gf = jax.nn.sigmoid(gates[:, 1 * SH:2 * SH])
        gg = jnp.tanh(gates[:, 2 * SH:3 * SH])
        go = jax.nn.sigmoid(gates[:, 3 * SH:4 * SH])
        c_new = gf * c + gi * gg
        return go * jnp.tanh(c_new), c_new

    # Split-input LSTM cells: no per-step concatenate copies, bf16 weights.
    g1 = (bdot(char_embed, w1e_ref) + bdot(ctx_s[...], w1c_ref)
          + bdot(h1s[...], w1h_ref) + bc_ref[0])
    h1, c1 = gates_to_hc(g1, c1s[...])
    g2 = bdot(h1, w2x_ref) + bdot(h2s[...], w2h_ref) + bc_ref[1]
    h2, c2 = gates_to_hc(g2, c2s[...])
    g3 = bdot(h2, w3x_ref) + bdot(h3s[...], w3h_ref) + bc_ref[2]
    h3, c3 = gates_to_hc(g3, c3s[...])
    h1s[...], c1s[...] = h1, c1
    h2s[...], c2s[...] = h2, c2
    h3s[...], c3s[...] = h3, c3

    query = (jnp.dot(h3, wq_ref[...], preferred_element_type=jnp.float32)
             + bq_ref[...])                                     # (Bp, K)

    # Attention on the VPU/XLU (the MXU-degenerate einsums were N=1 / M=1).
    key = key_ref[...]                                          # (Bp, T3p, K)
    value = val_ref[...]                                        # (Bp, T3p, V)
    mask = mask_ref[...]                                        # (Bp, T3p)
    energy = jnp.sum(key * query[:, None, :], axis=-1)          # (Bp, T3p)
    energy = jnp.where(mask > 0.0, energy, -1e30)               # pads -> 0 prob
    probs = jax.nn.softmax(energy, axis=1)
    masked = probs * mask
    inv = pl.reciprocal(
        jnp.maximum(jnp.sum(masked, axis=1, keepdims=True), 1e-30), approx=True)
    attn = masked * inv                                         # (Bp, T3p)
    ctx = jnp.sum(attn[:, :, None] * value, axis=1)             # (Bp, V)
    ctx_s[...] = ctx

    # fc split over [h3, ctx] -> no concat copy.
    act = jnp.maximum(
        jnp.dot(h3, wfch_ref[...], preferred_element_type=jnp.float32)
        + jnp.dot(ctx, wfcc_ref[...], preferred_element_type=jnp.float32)
        + bfc_ref[...], 0.0)
    logits = (jnp.dot(act, wout_ref[...], preferred_element_type=jnp.float32)
              + bout_ref[...])                                  # (Bp, NCP)

    prev_s[...] = logits
    logits_ref[0] = logits
    attn_ref[0] = attn


def speller_forward(params, key_btk, value_btv, mask, targets_padded):
    Bp, T3, K = key_btk.shape
    S = int(targets_padded.shape[0]) - 1

    # Pad the attention time axis to a multiple of 128 lanes (unmasked stores,
    # aligned VPU tiles).  mask=0 on the pads keeps the renormalized attention
    # mathematically identical; slice back before returning.
    T3p = ((T3 + 127) // 128) * 128
    if T3p > T3:
        key_btk = jnp.pad(key_btk, ((0, 0), (0, T3p - T3), (0, 0)))
        value_btv = jnp.pad(value_btv, ((0, 0), (0, T3p - T3), (0, 0)))
        mask = jnp.pad(mask, ((0, 0), (0, T3p - T3)))

    # Deterministic teacher-forcing schedule (stand-in for torch's np.random).
    rng = np.random.RandomState(0)
    draws = rng.random_sample(S)
    use_teacher = np.ones((S,), np.float32)
    if S > 1:
        use_teacher[1:] = (draws[:S - 1] < 0.9).astype(np.float32)
    tf_sched = jnp.asarray(use_teacher).reshape(S, 1, 1)

    tgt_onehot = jax.nn.one_hot(targets_padded[:S], NCP, dtype=jnp.float32)

    p = params
    in_specs = [
        _step_spec((S, Bp, NCP)),                    # per-step one-hot target
        _step_spec((S, 1, 1)),                       # teacher-forcing flag
        _resident_spec((Bp, T3p, KEY_SIZE)),         # key
        _resident_spec((Bp, T3p, VALUE_SIZE)),       # value
        _resident_spec((Bp, T3p)),                   # mask
        _resident_spec((NCP, SH)),                   # embedding
        _resident_spec((1, SH)),
        _resident_spec((3, 1, 4 * SH)),              # LSTM biases
        _resident_spec((SH, KEY_SIZE)),              # query projection
        _resident_spec((1, KEY_SIZE)),
        _resident_spec((SH, SH)),                    # fc (h part)
        _resident_spec((CTX, SH)),                   # fc (ctx part)
        _resident_spec((1, SH)),
        _resident_spec((SH, NCP)),                   # output layer (lane-padded)
        _resident_spec((1, NCP)),
        _resident_spec(tuple(p['h_init'].shape)),    # h init
        _resident_spec(tuple(p['c_init'].shape)),    # c init
        _resident_spec((SH, 4 * SH)),                # cell1 embed-part (bf16)
        _resident_spec((CTX, 4 * SH)),               # cell1 ctx-part (bf16)
        _resident_spec((SH, 4 * SH)),                # cell1 hh (bf16)
        _resident_spec((SH, 4 * SH)),                # cell2 ih (bf16)
        _resident_spec((SH, 4 * SH)),                # cell2 hh (bf16)
        _resident_spec((SH, 4 * SH)),                # cell3 ih (bf16)
        _resident_spec((SH, 4 * SH)),                # cell3 hh (bf16)
    ]
    out_specs = (_step_spec((S, Bp, NCP)), _step_spec((S, Bp, T3p)))
    out_shape = (jax.ShapeDtypeStruct((S, Bp, NCP), jnp.float32),
                 jax.ShapeDtypeStruct((S, Bp, T3p), jnp.float32))
    scratch = ([pltpu.VMEM((Bp, SH), jnp.float32) for _ in range(6)]
               + [pltpu.VMEM((Bp, CTX), jnp.float32),
                  pltpu.VMEM((Bp, NCP), jnp.float32)])

    # Resident VMEM budget (bf16 cells + Buffered(1)): ~13 MB LSTM weights,
    # ~3.5 MB misc weights, 2*T3p*8 KB key/value -> ~18 MB at T3p=128.
    logits_seq, attn_seq = pl.pallas_call(
        _speller_kernel,
        out_shape=out_shape,
        grid=(S,),
        in_specs=in_specs,
        out_specs=out_specs,
        scratch_shapes=scratch,
        compiler_params=pltpu.CompilerParams(
            dimension_semantics=("arbitrary",),
            vmem_limit_bytes=40 * 1024 * 1024),
    )(tgt_onehot, tf_sched, key_btk, value_btv, mask,
      p['wemb'], p['bemb'], p['bc'], p['wq'], p['bq'],
      p['wfc_h'], p['wfc_c'], p['bfc'], p['wout'], p['bout'],
      p['h_init'], p['c_init'],
      p['w1e'], p['w1c'], p['w1h'], p['w2x'], p['w2h'], p['w3x'], p['w3h'])
    return logits_seq, attn_seq[:, :, :T3]


# ----------------------------------------------------------------------------
# Parameter init (deterministic, PyTorch-default-like uniform)
# ----------------------------------------------------------------------------

def _uniform(key, shape, bound):
    return jax.random.uniform(key, shape, jnp.float32, -bound, bound)


def _init_lstm_dir(key, in_dim, in_pad, hidden):
    """Separate bf16 W_ih (in_pad,4H) / W_hh (H,4H) plus f32 bias (1,4H)."""
    k1, k2, k3, k4 = jax.random.split(key, 4)
    bound = 1.0 / float(np.sqrt(hidden))
    wih = _uniform(k1, (in_dim, 4 * hidden), bound)
    whh = _uniform(k2, (hidden, 4 * hidden), bound)
    b = _uniform(k3, (4 * hidden,), bound) + _uniform(k4, (4 * hidden,), bound)
    if in_pad > in_dim:
        wih = jnp.concatenate(
            [wih, jnp.zeros((in_pad - in_dim, 4 * hidden), jnp.float32)], axis=0)
    return (wih.astype(jnp.bfloat16), whh.astype(jnp.bfloat16),
            b.reshape(1, 4 * hidden))


def _init_bilstm(key, in_dim, in_pad, hidden):
    kf, kb = jax.random.split(key)
    wih_f, whh_f, bf = _init_lstm_dir(kf, in_dim, in_pad, hidden)
    wih_b, whh_b, bb = _init_lstm_dir(kb, in_dim, in_pad, hidden)
    return {'wih_f': wih_f, 'whh_f': whh_f, 'bf': bf,
            'wih_b': wih_b, 'whh_b': whh_b, 'bb': bb}


def _init_speller_cell(key, in_dim, hidden):
    k1, k2, k3, k4 = jax.random.split(key, 4)
    bound = 1.0 / float(np.sqrt(hidden))
    wih = _uniform(k1, (in_dim, 4 * hidden), bound).astype(jnp.bfloat16)
    whh = _uniform(k2, (hidden, 4 * hidden), bound).astype(jnp.bfloat16)
    b = _uniform(k3, (4 * hidden,), bound) + _uniform(k4, (4 * hidden,), bound)
    return wih, whh, b


def _init_linear(key, in_dim, out_dim, in_pad=None, out_pad=None):
    k1, k2 = jax.random.split(key)
    bound = 1.0 / float(np.sqrt(in_dim))
    w = _uniform(k1, (in_dim, out_dim), bound)
    b = _uniform(k2, (out_dim,), bound)
    if in_pad is not None and in_pad > in_dim:
        w = jnp.concatenate(
            [w, jnp.zeros((in_pad - in_dim, out_dim), jnp.float32)], axis=0)
    if out_pad is not None and out_pad > out_dim:
        w = jnp.concatenate(
            [w, jnp.zeros((w.shape[0], out_pad - out_dim), jnp.float32)], axis=1)
        b = jnp.concatenate([b, jnp.zeros((out_pad - out_dim,), jnp.float32)])
    return w, b.reshape(1, -1)


def init_las_params(key):
    ks = jax.random.split(key, 14)
    params = {}
    # Listener
    params['rnn1'] = _init_bilstm(ks[0], 2 * E, 256, LH)          # 160 -> pad 256
    params['rnn2'] = _init_bilstm(ks[1], 4 * LH, 4 * LH, LH)
    params['rnn3'] = _init_bilstm(ks[2], 4 * LH, 4 * LH, LH)
    wk, bk = _init_linear(ks[3], 2 * LH, KEY_SIZE)
    wv, bv = _init_linear(ks[4], 2 * LH, VALUE_SIZE)
    params['kv_w'] = jnp.concatenate([wk, wv], axis=1)            # (512, 512)
    params['kv_b'] = jnp.concatenate([bk, bv], axis=1)            # (1, 512)
    # Speller
    params['wemb'], params['bemb'] = _init_linear(ks[5], N_CLASSES, SH, in_pad=NCP)
    w1ih, w1hh, b1 = _init_speller_cell(ks[6], SH + CTX, SH)
    w2ih, w2hh, b2 = _init_speller_cell(ks[7], SH, SH)
    w3ih, w3hh, b3 = _init_speller_cell(ks[8], SH, SH)
    params['w1e'] = w1ih[:SH]                                     # embed part
    params['w1c'] = w1ih[SH:]                                     # context part
    params['w1h'] = w1hh
    params['w2x'], params['w2h'] = w2ih, w2hh
    params['w3x'], params['w3h'] = w3ih, w3hh
    params['bc'] = jnp.stack([b1, b2, b3], axis=0).reshape(3, 1, 4 * SH)
    params['wq'], params['bq'] = _init_linear(ks[9], SH, KEY_SIZE)
    wfc, bfc = _init_linear(ks[10], SH + CTX, SH)
    params['wfc_h'] = wfc[:SH]
    params['wfc_c'] = wfc[SH:]
    params['bfc'] = bfc
    params['wout'], params['bout'] = _init_linear(ks[11], SH, N_CLASSES, out_pad=NCP)
    params['h_init'] = jax.random.uniform(ks[12], (3, BP, SH), jnp.float32)
    params['c_init'] = jax.random.uniform(ks[13], (3, BP, SH), jnp.float32)
    return params


# ----------------------------------------------------------------------------
# Listener
# ----------------------------------------------------------------------------

def pyramid_reshape(x, lens):
    # (T, Bp, D) -> (T//2, Bp, 2D): pairs consecutive timesteps (even T assumed)
    # TODO(synk): replicate torch's cross-batch flat-view slicing for odd T.
    # TODO(synk): keep batch-major (Bp, T, D) end-to-end to make this a pure
    #             reshape (no HBM transposes) once mid-axis-1 blocks are used.
    T, Bp, D = x.shape
    half = T // 2
    xb = jnp.transpose(x, (1, 0, 2))[:, :half * 2, :].reshape(Bp, half, 2 * D)
    return jnp.transpose(xb, (1, 0, 2)), lens // 2


def _pad_features(x, target):
    D = x.shape[-1]
    if D == target:
        return x
    pad = jnp.zeros(x.shape[:-1] + (target - D,), x.dtype)
    return jnp.concatenate([x, pad], axis=-1)


def listener_forward(params, seq_batch, training=False):
    del training  # locked dropout is identity in eval mode
    B = len(seq_batch)
    lens_np = np.array([int(s.shape[0]) for s in seq_batch], np.int32)
    L = int(lens_np.max())
    Bp = max(BP, B)

    padded = jnp.zeros((L, Bp, E), jnp.float32)
    for i, s in enumerate(seq_batch):
        padded = padded.at[:s.shape[0], i, :].set(s)
    lens = jnp.asarray(np.concatenate([lens_np, np.zeros(Bp - B, np.int32)]))

    x1, lens1 = pyramid_reshape(padded, lens)                     # (L/2, Bp, 160)
    out1 = bilstm_layer(_pad_features(x1, 256), lens1, params['rnn1'])
    x2, lens2 = pyramid_reshape(out1, lens1)                      # (L/4, Bp, 1024)
    out2 = bilstm_layer(x2, lens2, params['rnn2'])
    x3, lens3 = pyramid_reshape(out2, lens2)                      # (L/8, Bp, 1024)
    out3 = bilstm_layer(x3, lens3, params['rnn3'])                # (T3, Bp, 512)

    T3 = out3.shape[0]
    flat = out3.reshape(T3 * Bp, 2 * LH)
    kv = linear(flat, params['kv_w'], params['kv_b']).reshape(T3, Bp, 2 * KEY_SIZE)
    key_btk = jnp.transpose(kv[:, :, :KEY_SIZE], (1, 0, 2))       # (Bp, T3, K)
    value_btv = jnp.transpose(kv[:, :, KEY_SIZE:], (1, 0, 2))     # (Bp, T3, V)
    mask = (jnp.arange(T3)[None, :] < lens3[:, None]).astype(jnp.float32)
    return key_btk, value_btv, mask


# ----------------------------------------------------------------------------
# LAS
# ----------------------------------------------------------------------------

def pad_targets(targets, Bp):
    max_len = max(int(t.shape[0]) for t in targets)
    out = np.zeros((max_len, Bp), np.int32)
    for i, t in enumerate(targets):
        out[:int(t.shape[0]), i] = np.asarray(t)
    return jnp.asarray(out)


def las_forward(params, seq_batch, targets, training=False):
    key_btk, value_btv, mask = listener_forward(params, seq_batch, training)
    Bp = key_btk.shape[0]
    targets_padded = pad_targets(targets, Bp)
    logits_seq, attn_seq = speller_forward(params, key_btk, value_btv, mask,
                                           targets_padded)
    B = len(seq_batch)
    S = logits_seq.shape[0]
    logits = jnp.transpose(logits_seq[:, :B, :N_CLASSES], (1, 0, 2))  # (B, S, NC)
    attentions = [attn_seq[i, :B, :] for i in range(S)]
    return logits, attentions


if __name__ == "__main__":
    root = jax.random.PRNGKey(0)
    k_data, k_tgt, k_param = jax.random.split(root, 3)

    B, L = 2, 16
    x = jax.random.normal(k_data, (B, L, E), jnp.float32)
    seq_batch = [x[i] for i in range(B)]
    tgt_len = 6
    targets = [jax.random.randint(jax.random.fold_in(k_tgt, i),
                                  (tgt_len,), 0, N_CLASSES, dtype=jnp.int32)
               for i in range(B)]

    params = init_las_params(k_param)
    logits, attentions = las_forward(params, seq_batch, targets, training=False)
    logits = jax.block_until_ready(logits)

    assert logits.shape == (B, tgt_len - 1, N_CLASSES), logits.shape
    assert len(attentions) == tgt_len - 1
    assert attentions[0].shape == (B, L // 8), attentions[0].shape
    assert bool(jnp.all(jnp.isfinite(logits)))
    print("KERNEL_OK")
</pallas_src>

<mosaic_0001>
module attributes {stable_mosaic.version = 11 : i64} {
  func.func @_bilstm_seq_kernel(%arg0: i32, %arg1: memref<1x8x256xf32, #tpu.memory_space<vmem>>, %arg2: memref<1x8x256xf32, #tpu.memory_space<vmem>>, %arg3: memref<8x1xi32, #tpu.memory_space<vmem>>, %arg4: memref<256x1024xbf16, #tpu.memory_space<vmem>>, %arg5: memref<256x1024xbf16, #tpu.memory_space<vmem>>, %arg6: memref<1x1024xf32, #tpu.memory_space<vmem>>, %arg7: memref<256x1024xbf16, #tpu.memory_space<vmem>>, %arg8: memref<256x1024xbf16, #tpu.memory_space<vmem>>, %arg9: memref<1x1024xf32, #tpu.memory_space<vmem>>, %arg10: memref<1x8x256xf32, #tpu.memory_space<vmem>>, %arg11: memref<1x8x256xf32, #tpu.memory_space<vmem>>, %arg12: memref<8x256xf32, #tpu.memory_space<vmem>>, %arg13: memref<8x256xf32, #tpu.memory_space<vmem>>, %arg14: memref<8x256xf32, #tpu.memory_space<vmem>>, %arg15: memref<8x256xf32, #tpu.memory_space<vmem>>) attributes {dimension_semantics = [#tpu.dimension_semantics<arbitrary>], iteration_bounds = array<i64: 8>, scalar_prefetch = 0 : i64, scratch_operands = 4 : i64, tpu.core_type = #tpu.core_type<tc>, window_params = [{transform_indices = @transform_0, window_bounds = array<i64: 1, 8, 256>}, {transform_indices = @transform_1, window_bounds = array<i64: 1, 8, 256>}, {pipeline_mode = #tpu.pipeline_mode<synchronous>, transform_indices = @transform_2, window_bounds = array<i64: 8, 1>}, {pipeline_mode = #tpu.pipeline_mode<synchronous>, transform_indices = @transform_3, window_bounds = array<i64: 256, 1024>}, {pipeline_mode = #tpu.pipeline_mode<synchronous>, transform_indices = @transform_4, window_bounds = array<i64: 256, 1024>}, {pipeline_mode = #tpu.pipeline_mode<synchronous>, transform_indices = @transform_5, window_bounds = array<i64: 1, 1024>}, {pipeline_mode = #tpu.pipeline_mode<synchronous>, transform_indices = @transform_6, window_bounds = array<i64: 256, 1024>}, {pipeline_mode = #tpu.pipeline_mode<synchronous>, transform_indices = @transform_7, window_bounds = array<i64: 256, 1024>}, {pipeline_mode = #tpu.pipeline_mode<synchronous>, transform_indices = @transform_8, window_bounds = array<i64: 1, 1024>}, {transform_indices = @transform_9, window_bounds = array<i64: 1, 8, 256>}, {transform_indices = @transform_10, window_bounds = array<i64: 1, 8, 256>}]} {
    %c0_i32 = arith.constant 0 : i32
    %0 = arith.cmpi eq, %arg0, %c0_i32 : i32
    %1 = arith.extui %0 : i1 to i32
    %c0_i32_0 = arith.constant 0 : i32
    %2 = arith.cmpi ne, %1, %c0_i32_0 : i32
    scf.if %2 {
      %cst_55 = arith.constant 0.000000e+00 : f32
      %133 = vector.broadcast %cst_55 : f32 to vector<8x256xf32>
      %c0_56 = arith.constant 0 : index
      %c0_57 = arith.constant 0 : index
      %134 = vector.load %arg12[%c0_56, %c0_57] : memref<8x256xf32, #tpu.memory_space<vmem>>, vector<8x256xf32>
      tpu.vector_store %arg12[%c0_56, %c0_57], %133 {strides = array<i32>} : memref<8x256xf32, #tpu.memory_space<vmem>>, vector<8x256xf32>,
      %cst_58 = arith.constant 0.000000e+00 : f32
      %135 = vector.broadcast %cst_58 : f32 to vector<8x256xf32>
      %c0_59 = arith.constant 0 : index
      %c0_60 = arith.constant 0 : index
      %136 = vector.load %arg13[%c0_59, %c0_60] : memref<8x256xf32, #tpu.memory_space<vmem>>, vector<8x256xf32>
      tpu.vector_store %arg13[%c0_59, %c0_60], %135 {strides = array<i32>} : memref<8x256xf32, #tpu.memory_space<vmem>>, vector<8x256xf32>,
      %cst_61 = arith.constant 0.000000e+00 : f32
      %137 = vector.broadcast %cst_61 : f32 to vector<8x256xf32>
      %c0_62 = arith.constant 0 : index
      %c0_63 = arith.constant 0 : index
      %138 = vector.load %arg14[%c0_62, %c0_63] : memref<8x256xf32, #tpu.memory_space<vmem>>, vector<8x256xf32>
      tpu.vector_store %arg14[%c0_62, %c0_63], %137 {strides = array<i32>} : memref<8x256xf32, #tpu.memory_space<vmem>>, vector<8x256xf32>,
      %cst_64 = arith.constant 0.000000e+00 : f32
      %139 = vector.broadcast %cst_64 : f32 to vector<8x256xf32>
      %c0_65 = arith.constant 0 : index
      %c0_66 = arith.constant 0 : index
      %140 = vector.load %arg15[%c0_65, %c0_66] : memref<8x256xf32, #tpu.memory_space<vmem>>, vector<8x256xf32>
      tpu.vector_store %arg15[%c0_65, %c0_66], %139 {strides = array<i32>} : memref<8x256xf32, #tpu.memory_space<vmem>>, vector<8x256xf32>,
    } else {
    }
    %c0 = arith.constant 0 : index
    %c0_1 = arith.constant 0 : index
    %3 = vector.load %arg3[%c0, %c0_1] : memref<8x1xi32, #tpu.memory_space<vmem>>, vector<8x1xi32>
    %4 = vector.broadcast %arg0 : i32 to vector<8x1xi32>
    %5 = arith.cmpi sgt, %3, %4 : vector<8x1xi32>
    %6 = arith.extui %5 : vector<8x1xi1> to vector<8x1xi32>
    %7 = arith.sitofp %6 : vector<8x1xi32> to vector<8x1xf32>
    %c7_i32 = arith.constant 7 : i32
    %8 = arith.subi %c7_i32, %arg0 : i32
    %9 = vector.broadcast %8 : i32 to vector<8x1xi32>
    %10 = arith.cmpi sgt, %3, %9 : vector<8x1xi32>
    %11 = arith.extui %10 : vector<8x1xi1> to vector<8x1xi32>
    %12 = arith.sitofp %11 : vector<8x1xi32> to vector<8x1xf32>
    %c0_2 = arith.constant 0 : index
    %c0_3 = arith.constant 0 : index
    %c0_4 = arith.constant 0 : index
    %13 = vector.load %arg1[%c0_2, %c0_3, %c0_4] : memref<1x8x256xf32, #tpu.memory_space<vmem>>, vector<1x8x256xf32>
    %14 = vector.shape_cast %13 : vector<1x8x256xf32> to vector<8x256xf32>
    %c0_5 = arith.constant 0 : index
    %c0_6 = arith.constant 0 : index
    %15 = vector.load %arg12[%c0_5, %c0_6] : memref<8x256xf32, #tpu.memory_space<vmem>>, vector<8x256xf32>
    %c0_7 = arith.constant 0 : index
    %c0_8 = arith.constant 0 : index
    %16 = vector.load %arg13[%c0_7, %c0_8] : memref<8x256xf32, #tpu.memory_space<vmem>>, vector<8x256xf32>
    %17 = arith.truncf %14 : vector<8x256xf32> to vector<8x256xbf16>
    %c0_9 = arith.constant 0 : index
    %c0_10 = arith.constant 0 : index
    %18 = vector.load %arg4[%c0_9, %c0_10] : memref<256x1024xbf16, #tpu.memory_space<vmem>>, vector<256x1024xbf16>
    %cst = arith.constant dense<0.000000e+00> : vector<8x1024xf32>
    %19 = tpu.matmul %17, %18, %cst {dimension_numbers = #tpu.dot_dimension_numbers<[1], [0], [0], [1], [0, 0, 1, 1], [], []>} : vector<8x256xbf16>, vector<256x1024xbf16>, vector<8x1024xf32> -> vector<8x1024xf32>
    %20 = arith.truncf %15 : vector<8x256xf32> to vector<8x256xbf16>
    %c0_11 = arith.constant 0 : index
    %c0_12 = arith.constant 0 : index
    %21 = vector.load %arg5[%c0_11, %c0_12] : memref<256x1024xbf16, #tpu.memory_space<vmem>>, vector<256x1024xbf16>
    %cst_13 = arith.constant dense<0.000000e+00> : vector<8x1024xf32>
    %22 = tpu.matmul %20, %21, %cst_13 {dimension_numbers = #tpu.dot_dimension_numbers<[1], [0], [0], [1], [0, 0, 1, 1], [], []>} : vector<8x256xbf16>, vector<256x1024xbf16>, vector<8x1024xf32> -> vector<8x1024xf32>
    %23 = arith.addf %19, %22 : vector<8x1024xf32>
    %c0_14 = arith.constant 0 : index
    %c0_15 = arith.constant 0 : index
    %24 = vector.load %arg6[%c0_14, %c0_15] : memref<1x1024xf32, #tpu.memory_space<vmem>>, vector<1x1024xf32>
    %25 = vector.broadcast %24 : vector<1x1024xf32> to vector<8x1024xf32>
    %26 = arith.addf %23, %25 : vector<8x1024xf32>
    %27 = vector.extract_strided_slice %26 {offsets = [0, 0], sizes = [8, 256], strides = [1, 1]} : vector<8x1024xf32> to vector<8x256xf32>
    %28 = arith.negf %27 : vector<8x256xf32>
    %29 = math.exp %28 : vector<8x256xf32>
    %cst_16 = arith.constant 1.000000e+00 : f32
    %30 = vector.broadcast %cst_16 : f32 to vector<8x256xf32>
    %31 = arith.addf %30, %29 : vector<8x256xf32>
    %32 = arith.divf %30, %31 : vector<8x256xf32>
    %33 = vector.extract_strided_slice %26 {offsets = [0, 256], sizes = [8, 256], strides = [1, 1]} : vector<8x1024xf32> to vector<8x256xf32>
    %34 = arith.negf %33 : vector<8x256xf32>
    %35 = math.exp %34 : vector<8x256xf32>
    %cst_17 = arith.constant 1.000000e+00 : f32
    %36 = vector.broadcast %cst_17 : f32 to vector<8x256xf32>
    %37 = arith.addf %36, %35 : vector<8x256xf32>
    %38 = arith.divf %36, %37 : vector<8x256xf32>
    %39 = vector.extract_strided_slice %26 {offsets = [0, 512], sizes = [8, 256], strides = [1, 1]} : vector<8x1024xf32> to vector<8x256xf32>
    %40 = math.tanh %39 : vector<8x256xf32>
    %41 = vector.extract_strided_slice %26 {offsets = [0, 768], sizes = [8, 256], strides = [1, 1]} : vector<8x1024xf32> to vector<8x256xf32>
    %42 = arith.negf %41 : vector<8x256xf32>
    %43 = math.exp %42 : vector<8x256xf32>
    %cst_18 = arith.constant 1.000000e+00 : f32
    %44 = vector.broadcast %cst_18 : f32 to vector<8x256xf32>
    %45 = arith.addf %44, %43 : vector<8x256xf32>
    %46 = arith.divf %44, %45 : vector<8x256xf32>
    %47 = arith.mulf %38, %16 : vector<8x256xf32>
    %48 = arith.mulf %32, %40 : vector<8x256xf32>
    %49 = arith.addf %47, %48 : vector<8x256xf32>
    %50 = math.tanh %49 : vector<8x256xf32>
    %51 = arith.mulf %46, %50 : vector<8x256xf32>
    %52 = vector.broadcast %7 : vector<8x1xf32> to vector<8x256xf32>
    %53 = arith.mulf %52, %51 : vector<8x256xf32>
    %cst_19 = arith.constant 1.000000e+00 : f32
    %54 = vector.broadcast %cst_19 : f32 to vector<8x1xf32>
    %55 = arith.subf %54, %7 : vector<8x1xf32>
    %56 = vector.broadcast %55 : vector<8x1xf32> to vector<8x256xf32>
    %57 = arith.mulf %56, %15 : vector<8x256xf32>
    %58 = arith.addf %53, %57 : vector<8x256xf32>
    %59 = vector.broadcast %7 : vector<8x1xf32> to vector<8x256xf32>
    %60 = arith.mulf %59, %49 : vector<8x256xf32>
    %cst_20 = arith.constant 1.000000e+00 : f32
    %61 = vector.broadcast %cst_20 : f32 to vector<8x1xf32>
    %62 = arith.subf %61, %7 : vector<8x1xf32>
    %63 = vector.broadcast %62 : vector<8x1xf32> to vector<8x256xf32>
    %64 = arith.mulf %63, %16 : vector<8x256xf32>
    %65 = arith.addf %60, %64 : vector<8x256xf32>
    %66 = vector.broadcast %7 : vector<8x1xf32> to vector<8x256xf32>
    %67 = arith.mulf %66, %51 : vector<8x256xf32>
    %c0_21 = arith.constant 0 : index
    %c0_22 = arith.constant 0 : index
    %c0_23 = arith.constant 0 : index
    %68 = vector.load %arg2[%c0_21, %c0_22, %c0_23] : memref<1x8x256xf32, #tpu.memory_space<vmem>>, vector<1x8x256xf32>
    %69 = vector.shape_cast %68 : vector<1x8x256xf32> to vector<8x256xf32>
    %c0_24 = arith.constant 0 : index
    %c0_25 = arith.constant 0 : index
    %70 = vector.load %arg14[%c0_24, %c0_25] : memref<8x256xf32, #tpu.memory_space<vmem>>, vector<8x256xf32>
    %c0_26 = arith.constant 0 : index
    %c0_27 = arith.constant 0 : index
    %71 = vector.load %arg15[%c0_26, %c0_27] : memref<8x256xf32, #tpu.memory_space<vmem>>, vector<8x256xf32>
    %72 = arith.truncf %69 : vector<8x256xf32> to vector<8x256xbf16>
    %c0_28 = arith.constant 0 : index
    %c0_29 = arith.constant 0 : index
    %73 = vector.load %arg7[%c0_28, %c0_29] : memref<256x1024xbf16, #tpu.memory_space<vmem>>, vector<256x1024xbf16>
    %cst_30 = arith.constant dense<0.000000e+00> : vector<8x1024xf32>
    %74 = tpu.matmul %72, %73, %cst_30 {dimension_numbers = #tpu.dot_dimension_numbers<[1], [0], [0], [1], [0, 0, 1, 1], [], []>} : vector<8x256xbf16>, vector<256x1024xbf16>, vector<8x1024xf32> -> vector<8x1024xf32>
    %75 = arith.truncf %70 : vector<8x256xf32> to vector<8x256xbf16>
    %c0_31 = arith.constant 0 : index
    %c0_32 = arith.constant 0 : index
    %76 = vector.load %arg8[%c0_31, %c0_32] : memref<256x1024xbf16, #tpu.memory_space<vmem>>, vector<256x1024xbf16>
    %cst_33 = arith.constant dense<0.000000e+00> : vector<8x1024xf32>
    %77 = tpu.matmul %75, %76, %cst_33 {dimension_numbers = #tpu.dot_dimension_numbers<[1], [0], [0], [1], [0, 0, 1, 1], [], []>} : vector<8x256xbf16>, vector<256x1024xbf16>, vector<8x1024xf32> -> vector<8x1024xf32>
    %78 = arith.addf %74, %77 : vector<8x1024xf32>
    %c0_34 = arith.constant 0 : index
    %c0_35 = arith.constant 0 : index
    %79 = vector.load %arg9[%c0_34, %c0_35] : memref<1x1024xf32, #tpu.memory_space<vmem>>, vector<1x1024xf32>
    %80 = vector.broadcast %79 : vector<1x1024xf32> to vector<8x1024xf32>
    %81 = arith.addf %78, %80 : vector<8x1024xf32>
    %82 = vector.extract_strided_slice %81 {offsets = [0, 0], sizes = [8, 256], strides = [1, 1]} : vector<8x1024xf32> to vector<8x256xf32>
    %83 = arith.negf %82 : vector<8x256xf32>
    %84 = math.exp %83 : vector<8x256xf32>
    %cst_36 = arith.constant 1.000000e+00 : f32
    %85 = vector.broadcast %cst_36 : f32 to vector<8x256xf32>
    %86 = arith.addf %85, %84 : vector<8x256xf32>
    %87 = arith.divf %85, %86 : vector<8x256xf32>
    %88 = vector.extract_strided_slice %81 {offsets = [0, 256], sizes = [8, 256], strides = [1, 1]} : vector<8x1024xf32> to vector<8x256xf32>
    %89 = arith.negf %88 : vector<8x256xf32>
    %90 = math.exp %89 : vector<8x256xf32>
    %cst_37 = arith.constant 1.000000e+00 : f32
    %91 = vector.broadcast %cst_37 : f32 to vector<8x256xf32>
    %92 = arith.addf %91, %90 : vector<8x256xf32>
    %93 = arith.divf %91, %92 : vector<8x256xf32>
    %94 = vector.extract_strided_slice %81 {offsets = [0, 512], sizes = [8, 256], strides = [1, 1]} : vector<8x1024xf32> to vector<8x256xf32>
    %95 = math.tanh %94 : vector<8x256xf32>
    %96 = vector.extract_strided_slice %81 {offsets = [0, 768], sizes = [8, 256], strides = [1, 1]} : vector<8x1024xf32> to vector<8x256xf32>
    %97 = arith.negf %96 : vector<8x256xf32>
    %98 = math.exp %97 : vector<8x256xf32>
    %cst_38 = arith.constant 1.000000e+00 : f32
    %99 = vector.broadcast %cst_38 : f32 to vector<8x256xf32>
    %100 = arith.addf %99, %98 : vector<8x256xf32>
    %101 = arith.divf %99, %100 : vector<8x256xf32>
    %102 = arith.mulf %93, %71 : vector<8x256xf32>
    %103 = arith.mulf %87, %95 : vector<8x256xf32>
    %104 = arith.addf %102, %103 : vector<8x256xf32>
    %105 = math.tanh %104 : vector<8x256xf32>
    %106 = arith.mulf %101, %105 : vector<8x256xf32>
    %107 = vector.broadcast %12 : vector<8x1xf32> to vector<8x256xf32>
    %108 = arith.mulf %107, %106 : vector<8x256xf32>
    %cst_39 = arith.constant 1.000000e+00 : f32
    %109 = vector.broadcast %cst_39 : f32 to vector<8x1xf32>
    %110 = arith.subf %109, %12 : vector<8x1xf32>
    %111 = vector.broadcast %110 : vector<8x1xf32> to vector<8x256xf32>
    %112 = arith.mulf %111, %70 : vector<8x256xf32>
    %113 = arith.addf %108, %112 : vector<8x256xf32>
    %114 = vector.broadcast %12 : vector<8x1xf32> to vector<8x256xf32>
    %115 = arith.mulf %114, %104 : vector<8x256xf32>
    %cst_40 = arith.constant 1.000000e+00 : f32
    %116 = vector.broadcast %cst_40 : f32 to vector<8x1xf32>
    %117 = arith.subf %116, %12 : vector<8x1xf32>
    %118 = vector.broadcast %117 : vector<8x1xf32> to vector<8x256xf32>
    %119 = arith.mulf %118, %71 : vector<8x256xf32>
    %120 = arith.addf %115, %119 : vector<8x256xf32>
    %121 = vector.broadcast %12 : vector<8x1xf32> to vector<8x256xf32>
    %122 = arith.mulf %121, %106 : vector<8x256xf32>
    %c0_41 = arith.constant 0 : index
    %c0_42 = arith.constant 0 : index
    %123 = vector.load %arg12[%c0_41, %c0_42] : memref<8x256xf32, #tpu.memory_space<vmem>>, vector<8x256xf32>
    tpu.vector_store %arg12[%c0_41, %c0_42], %58 {strides = array<i32>} : memref<8x256xf32, #tpu.memory_space<vmem>>, vector<8x256xf32>,
    %c0_43 = arith.constant 0 : index
    %c0_44 = arith.constant 0 : index
    %124 = vector.load %arg13[%c0_43, %c0_44] : memref<8x256xf32, #tpu.memory_space<vmem>>, vector<8x256xf32>
    tpu.vector_store %arg13[%c0_43, %c0_44], %65 {strides = array<i32>} : memref<8x256xf32, #tpu.memory_space<vmem>>, vector<8x256xf32>,
    %c0_45 = arith.constant 0 : index
    %c0_46 = arith.constant 0 : index
    %125 = vector.load %arg14[%c0_45, %c0_46] : memref<8x256xf32, #tpu.memory_space<vmem>>, vector<8x256xf32>
    tpu.vector_store %arg14[%c0_45, %c0_46], %113 {strides = array<i32>} : memref<8x256xf32, #tpu.memory_space<vmem>>, vector<8x256xf32>,
    %c0_47 = arith.constant 0 : index
    %c0_48 = arith.constant 0 : index
    %126 = vector.load %arg15[%c0_47, %c0_48] : memref<8x256xf32, #tpu.memory_space<vmem>>, vector<8x256xf32>
    tpu.vector_store %arg15[%c0_47, %c0_48], %120 {strides = array<i32>} : memref<8x256xf32, #tpu.memory_space<vmem>>, vector<8x256xf32>,
    %c0_49 = arith.constant 0 : index
    %c0_50 = arith.constant 0 : index
    %c0_51 = arith.constant 0 : index
    %127 = vector.load %arg10[%c0_49, %c0_50, %c0_51] : memref<1x8x256xf32, #tpu.memory_space<vmem>>, vector<1x8x256xf32>
    %128 = vector.shape_cast %127 : vector<1x8x256xf32> to vector<8x256xf32>
    %129 = vector.shape_cast %67 : vector<8x256xf32> to vector<1x8x256xf32>
    tpu.vector_store %arg10[%c0_49, %c0_50, %c0_51], %129 {strides = array<i32>} : memref<1x8x256xf32, #tpu.memory_space<vmem>>, vector<1x8x256xf32>,
    %c0_52 = arith.constant 0 : index
    %c0_53 = arith.constant 0 : index
    %c0_54 = arith.constant 0 : index
    %130 = vector.load %arg11[%c0_52, %c0_53, %c0_54] : memref<1x8x256xf32, #tpu.memory_space<vmem>>, vector<1x8x256xf32>
    %131 = vector.shape_cast %130 : vector<1x8x256xf32> to vector<8x256xf32>
    %132 = vector.shape_cast %122 : vector<8x256xf32> to vector<1x8x256xf32>
    tpu.vector_store %arg11[%c0_52, %c0_53, %c0_54], %132 {strides = array<i32>} : memref<1x8x256xf32, #tpu.memory_space<vmem>>, vector<1x8x256xf32>,
    return
  }
  func.func @transform_0(%arg0: i32) -> (i32, i32, i32) {
    %c0_i32 = arith.constant 0 : i32
    %c0_i32_0 = arith.constant 0 : i32
    %c0_i32_1 = arith.constant 0 : i32
    return %arg0, %c0_i32, %c0_i32_0 : i32, i32, i32
  }
  func.func @transform_1(%arg0: i32) -> (i32, i32, i32) {
    %c7_i32 = arith.constant 7 : i32
    %0 = arith.subi %c7_i32, %arg0 : i32
    %c0_i32 = arith.constant 0 : i32
    %c0_i32_0 = arith.constant 0 : i32
    %c0_i32_1 = arith.constant 0 : i32
    return %0, %c0_i32, %c0_i32_0 : i32, i32, i32
  }
  func.func @transform_2(%arg0: i32) -> (i32, i32) {
    %c0_i32 = arith.constant 0 : i32
    %c0_i32_0 = arith.constant 0 : i32
    %c0_i32_1 = arith.constant 0 : i32
    return %c0_i32, %c0_i32_0 : i32, i32
  }
  func.func @transform_3(%arg0: i32) -> (i32, i32) {
    %c0_i32 = arith.constant 0 : i32
    %c0_i32_0 = arith.constant 0 : i32
    %c0_i32_1 = arith.constant 0 : i32
    return %c0_i32, %c0_i32_0 : i32, i32
  }
  func.func @transform_4(%arg0: i32) -> (i32, i32) {
    %c0_i32 = arith.constant 0 : i32
    %c0_i32_0 = arith.constant 0 : i32
    %c0_i32_1 = arith.constant 0 : i32
    return %c0_i32, %c0_i32_0 : i32, i32
  }
  func.func @transform_5(%arg0: i32) -> (i32, i32) {
    %c0_i32 = arith.constant 0 : i32
    %c0_i32_0 = arith.constant 0 : i32
    %c0_i32_1 = arith.constant 0 : i32
    return %c0_i32, %c0_i32_0 : i32, i32
  }
  func.func @transform_6(%arg0: i32) -> (i32, i32) {
    %c0_i32 = arith.constant 0 : i32
    %c0_i32_0 = arith.constant 0 : i32
    %c0_i32_1 = arith.constant 0 : i32
    return %c0_i32, %c0_i32_0 : i32, i32
  }
  func.func @transform_7(%arg0: i32) -> (i32, i32) {
    %c0_i32 = arith.constant 0 : i32
    %c0_i32_0 = arith.constant 0 : i32
    %c0_i32_1 = arith.constant 0 : i32
    return %c0_i32, %c0_i32_0 : i32, i32
  }
  func.func @transform_8(%arg0: i32) -> (i32, i32) {
    %c0_i32 = arith.constant 0 : i32
    %c0_i32_0 = arith.constant 0 : i32
    %c0_i32_1 = arith.constant 0 : i32
    return %c0_i32, %c0_i32_0 : i32, i32
  }
  func.func @transform_9(%arg0: i32) -> (i32, i32, i32) {
    %c0_i32 = arith.constant 0 : i32
    %c0_i32_0 = arith.constant 0 : i32
    %c0_i32_1 = arith.constant 0 : i32
    return %arg0, %c0_i32, %c0_i32_0 : i32, i32, i32
  }
  func.func @transform_10(%arg0: i32) -> (i32, i32, i32) {
    %c7_i32 = arith.constant 7 : i32
    %0 = arith.subi %c7_i32, %arg0 : i32
    %c0_i32 = arith.constant 0 : i32
    %c0_i32_0 = arith.constant 0 : i32
    %c0_i32_1 = arith.constant 0 : i32
    return %0, %c0_i32, %c0_i32_0 : i32, i32, i32
  }
}

</mosaic_0001>

<bundles_post_ra>
// kernel: tpu_custom_call.1
= control target key start
LH: loop header
LB: loop body
LE: loop exit
PB: predicated region body
PF: predicated region fallthrough
CT: control target
= control target key end

     0   :  { %s6493_s0 = inlined_call_operand.hbm [shape: f32[8,8,256], index: 0, kind: input, shape index: {}]   ;;  %s6494_s1 = inlined_call_operand.hbm [shape: f32[8,8,256], index: 1, kind: input, shape index: {}]   ;;  %s6495_s2 = inlined_call_operand.vmem [shape: s32[8,1], index: 2, kind: input, shape index: {}]   ;;  %s6496_s3 = inlined_call_operand.hbm [shape: bf16[256,1024], index: 3, kind: input, shape index: {}]   ;;  %s6497_s4 = inlined_call_operand.hbm [shape: bf16[256,1024], index: 4, kind: input, shape index: {}]   ;;  %s6498_s5 = inlined_call_operand.vmem [shape: f32[1,1024], index: 5, kind: input, shape index: {}]   ;;  %s6499_s6 = inlined_call_operand.hbm [shape: bf16[256,1024], index: 6, kind: input, shape index: {}]   ;;  %s6500_s7 = inlined_call_operand.hbm [shape: bf16[256,1024], index: 7, kind: input, shape index: {}]   ;;  %s6501_s8 = inlined_call_operand.vmem [shape: f32[1,1024], index: 8, kind: input, shape index: {}]   ;;  %s6502_s9 = inlined_call_operand.hbm [shape: f32[8,8,256], index: 9, kind: output, shape index: {0}]   ;;  %s6503_s10 = inlined_call_operand.hbm [shape: f32[8,8,256], index: 10, kind: output, shape index: {1}]  }
   0x1   :  { %6516 = sst [smem:[#allocation27_spill]] %s6493_s0 }
   0x2   :  { %6517 = sst [smem:[#allocation28_spill]] %s6495_s2 }
   0x3   :  { %6518 = sst [smem:[#allocation29_spill]] %s6496_s3 }
   0x4   :  { %6519 = sst [smem:[#allocation30_spill]] %s6497_s4 }
   0x5   :  { %6520 = sst [smem:[#allocation31_spill]] %s6498_s5 }
   0x6   :  { %6521 = sst [smem:[#allocation32_spill]] %s6499_s6 }
   0x7   :  { %6522 = sst [smem:[#allocation33_spill]] %s6501_s8 }
   0x8   :  { %6523 = sst [smem:[#allocation34_spill]] %s6502_s9 }
   0x9   :  { %6524 = sst [smem:[#allocation35_spill]] %s6503_s10 }
   0xa   :  { %16 = vsyncpa [#allocation7], 0 }
   0xb   :  { %18 = vsyncpa [#allocation7 + $0x1], 0 }
   0xc   :  { %19 = vsyncpa [#allocation10], 0 }
   0xd   :  { %21 = vsyncpa [#allocation10 + $0x1], 0 }
   0xe   :  { %22 = vsyncpa [#allocation13], 0 }
   0xf   :  { %23 = vsyncpa [#allocation16], 0 }
  0x10   :  { %24 = vsyncpa [#allocation8], 0 }
  0x11   :  { %26 = vsyncpa [#allocation8 + $0x1], 0 }
  0x12   :  { %27 = vsyncpa [#allocation19], 0 }
  0x13   :  { %29 = vsyncpa [#allocation19 + $0x1], 0  ;;  %s5854_s13 = smov 0   ;;  %s5856_s14 = smov 0  }
  0x14   :  { %s5858_s15 = smov 0   ;;  %s5860_s16 = smov 0  }
  0x15   :  { %s5862_s17 = smov 0   ;;  %s5864_s18 = smov 0  }
  0x16   :  { %s5866_s19 = smov 0  }
  0x17 LB: > { %s5786_s20 = smov [#allocation11]   ;;  %s5890_s22 = sadd.s32 4294967295, %s5784_s19   ;;  %s5784_s19 = sphi %s5866_s19, %s6572_s19   ;;  %s5780_s18 = sphi %s5864_s18, %s6571_s18   ;;  %s5776_s17 = sphi %s5862_s17, %s6570_s17   ;;  %s5772_s16 = sphi %s5860_s16, %s6569_s16   ;;  %s5768_s15 = sphi %s5858_s15, %s6568_s15   ;;  %s5764_s14 = sphi %s5856_s14, %s6567_s14   ;;  %s5760_s13 = sphi %s5854_s13, %s6566_s13  }
  0x18   : > { %s310_s21 = sshll.u32 %s5786_s20, 4  ;;  %p4713_p0 = scmp.ge.s32.totalorder %s5784_s19, 1  ;;  %s5896_s21 = int_to_ptr.vmem [resolvable:$true] %s310_s21 }
  0x19   : > { %p6506_p1 = scmp.eq.s32.totalorder %s5890_s22, 0  ;;  %p295_p2 = scmp.lt.s32.totalorder %s5784_s19, 9 }
  0x1a   : > { %s5787_s24 = smov [#allocation12]   ;;  %s5788_s27 = smov [#allocation14]  }
  0x1b   : > { %p5898_p4 = pnand %p4713_p0, %p295_p2  ;;  %s323_s25 = sshll.u32 %s5787_s24, 4  ;;  %s5910_s25 = int_to_ptr.vmem [resolvable:$true] %s323_s25 }
  0x1c   : > { %s339_s28 = sshll.u32 %s5788_s27, 4  ;;  %s6527_s3 = sld [smem:[#allocation29_spill]]  ;;  %s5912_s28 = int_to_ptr.vmem [resolvable:$true] %s339_s28 }
  0x1d   : > { %s6525_s23 = scalar_select %p5898_p4, 1, 0 }
  0x1e   : > { %p5297_p5 = pneg %p5898_p4 }
  0x20   : > { %p5906_p6 = pnand %p5297_p5, %p6506_p1 }
  0x22   : > { %s5474_s11 = scalar_lea.hbm %s6527_s3, 16384  ;;  %p5922_p8 = pneg %p5906_p6 }
  0x23   : > { %p5475_p7 = scmp.ne.s32.totalorder %s6527_s3, %s5474_s11  ;;  %p5481_p11 = scmp.lt.u32.totalorder %s5474_s11, %s6527_s3 }
  0x25   : > { %p5477_p9 = pnand %p5922_p8, %p5475_p7 }
  0x27   : > { %p5478_p10 = pneg %p5477_p9 }
  0x29   : > { %p5483_p12 = pnand %p5481_p11, %p5478_p10 }
  0x2b   : > { %5486 = shalt.err (!%p5483_p12)
}
  0x2c   : > { %s5487_s29 = scalar_lea.vmem %s5896_s21, 16384  ;;  %p5495_p5 = scmp.lt.s32.totalorder %s5896_s21, %s5896_s21 }
  0x2d   : > { %p5488_p13 = scmp.ne.s32.totalorder %s5896_s21, %s5487_s29  ;;  %p5496_p3 = scmp.lt.s32.totalorder %s5487_s29, %s5487_s29 }
  0x2f   : > { %p5490_p0 = pnand %p5488_p13, %p5922_p8  ;;  %p5497_p7 = por %p5496_p3, %p5495_p5 }
  0x31   : > { %p5491_p2 = pneg %p5490_p0 }
  0x33   : > { %p5498_p9 = pnand %p5497_p7, %p5491_p2 }
  0x35   : > { %5501 = shalt.err (!%p5498_p9)
}
  0x36   : > { %s5789_s30 = smov 512   ;;  %s5790_s10 = smov 32  }
  0x37   : > { %5300 = dma.hbm_to_vmem [thread:$0]  (!%p5906_p6), %s6527_s3, 16384, %s5896_s21, [#allocation10], %s5789_s30, %s5789_s30, %s5790_s10  }
  0x38   : > { %s6529_s4 = sld [smem:[#allocation30_spill]] }
  0x3e   : > { %s5502_s29 = scalar_lea.hbm %s6529_s4, 16384 }
  0x3f   : > { %p5503_p3 = scmp.ne.s32.totalorder %s6529_s4, %s5502_s29  ;;  %p5509_p12 = scmp.lt.u32.totalorder %s5502_s29, %s6529_s4 }
  0x41   : > { %p5505_p10 = pnand %p5503_p3, %p5922_p8 }
  0x43   : > { %p5506_p11 = pneg %p5505_p10 }
  0x45   : > { %p5511_p13 = pnand %p5509_p12, %p5506_p11 }
  0x47   : > { %5514 = shalt.err (!%p5511_p13)
}
  0x48   : > { %s5515_s21 = scalar_lea.vmem %s5910_s25, 16384  ;;  %p5523_p7 = scmp.lt.s32.totalorder %s5910_s25, %s5910_s25 }
  0x49   : > { %p5516_p0 = scmp.ne.s32.totalorder %s5910_s25, %s5515_s21  ;;  %p5524_p9 = scmp.lt.s32.totalorder %s5515_s21, %s5515_s21 }
  0x4b   : > { %p5518_p2 = pnand %p5516_p0, %p5922_p8  ;;  %p5525_p3 = por %p5524_p9, %p5523_p7 }
  0x4d   : > { %p5519_p5 = pneg %p5518_p2 }
  0x4f   : > { %p5526_p10 = pnand %p5525_p3, %p5519_p5 }
  0x51   : > { %5529 = shalt.err (!%p5526_p10)
}
  0x52   : > { %5303 = dma.hbm_to_vmem [thread:$0]  (!%p5906_p6), %s6529_s4, 16384, %s5910_s25, [#allocation13], %s5789_s30, %s5789_s30, %s5790_s10  }
  0x53   : > { %s6530_s6 = sld [smem:[#allocation32_spill]] }
  0x59   : > { %s5530_s11 = scalar_lea.hbm %s6530_s6, 16384 }
  0x5a   : > { %p5531_p11 = scmp.ne.s32.totalorder %s6530_s6, %s5530_s11  ;;  %p5537_p0 = scmp.lt.u32.totalorder %s5530_s11, %s6530_s6 }
  0x5c   : > { %p5533_p12 = pnand %p5531_p11, %p5922_p8 }
  0x5e   : > { %p5534_p13 = pneg %p5533_p12 }
  0x60   : > { %p5539_p2 = pnand %p5537_p0, %p5534_p13 }
  0x62   : > { %5542 = shalt.err (!%p5539_p2)
}
  0x63   : > { %s5543_s25 = scalar_lea.vmem %s5912_s28, 16384  ;;  %p5551_p3 = scmp.lt.s32.totalorder %s5912_s28, %s5912_s28 }
  0x64   : > { %p5544_p5 = scmp.ne.s32.totalorder %s5912_s28, %s5543_s25  ;;  %p5552_p10 = scmp.lt.s32.totalorder %s5543_s25, %s5543_s25 }
  0x66   : > { %p5546_p7 = pnand %p5544_p5, %p5922_p8  ;;  %p5553_p11 = por %p5552_p10, %p5551_p3 }
  0x68   : > { %p5547_p9 = pneg %p5546_p7 }
  0x6a   : > { %p5554_p12 = pnand %p5553_p11, %p5547_p9 }
  0x6c   : > { %5557 = shalt.err (!%p5554_p12)
}
  0x6d   : > { %5306 = dma.hbm_to_vmem [thread:$0]  (!%p5906_p6), %s6530_s6, 16384, %s5912_s28, [#allocation13], %s5789_s30, %s5789_s30, %s5790_s10  }
  0x6e   : > { %s5791_s5 = smov [#allocation15]   ;;  %s5558_s12 = scalar_lea.hbm %s6500_s7, 16384 }
  0x6f   : > { %s352_s8 = sshll.u32 %s5791_s5, 4  ;;  %p5559_p13 = scmp.ne.s32.totalorder %s6500_s7, %s5558_s12  ;;  %s353_s8 = int_to_ptr.vmem [resolvable:$true] %s352_s8 }
  0x70   : > { %p5565_p5 = scmp.lt.u32.totalorder %s5558_s12, %s6500_s7 }
  0x71   : > { %p5561_p0 = pnand %p5559_p13, %p5922_p8 }
  0x73   : > { %p5562_p2 = pneg %p5561_p0 }
  0x75   : > { %p5567_p7 = pnand %p5565_p5, %p5562_p2 }
  0x77   : > { %5570 = shalt.err (!%p5567_p7)
}
  0x78   : > { %s5571_s28 = scalar_lea.vmem %s353_s8, 16384  ;;  %p5579_p11 = scmp.lt.s32.totalorder %s353_s8, %s353_s8 }
  0x79   : > { %p5572_p9 = scmp.ne.s32.totalorder %s353_s8, %s5571_s28  ;;  %p5580_p12 = scmp.lt.s32.totalorder %s5571_s28, %s5571_s28 }
  0x7b   : > { %p5574_p3 = pnand %p5572_p9, %p5922_p8  ;;  %p5581_p1 = por %p5580_p12, %p5579_p11 }
  0x7d   : > { %p5575_p10 = pneg %p5574_p3 }
  0x7f   : > { %p5582_p4 = pnand %p5581_p1, %p5575_p10 }
  0x81   : > { %5585 = shalt.err (!%p5582_p4)
}
  0x82   : > { %5309 = dma.hbm_to_vmem [thread:$0]  (!%p5906_p6), %s6500_s7, 16384, %s353_s8, [#allocation16], %s5789_s30, %s5789_s30, %s5790_s10  }
  0x83   : > { %s4712_s26 = sadd.s32 4294967294, %s5784_s19   ;;  %s42_s24 = sadd.s32 1, %s5780_s18 }
  0x84   : > { %p49_p1 = scmp.ne.s32.totalorder %s5780_s18, %s5776_s17  ;;  %p6510_p4 = scmp.eq.s32.totalorder %s5784_s19, 0 }
  0x85   : > { %p55_p8 = scmp.ne.s32.totalorder %s5776_s17, %s5772_s16  ;;  %p6509_p13 = scmp.eq.s32.totalorder %s5890_s22, 7 }
  0x86   : > { %p51_p0 = por %p6510_p4, %p49_p1  ;;  %p6029_p2 = scmp.eq.s32.totalorder %s4712_s26, 7 }
  0x87   : > { %p6532_p5 = scmp.eq.s32.totalorder %s5890_s22, 0  ;;  %p6041_p6 = por %p6509_p13, %p49_p1 }
  0x88   : > { %p6047_p9 = por %p6029_p2, %p55_p8  ;;  %p6508_p3 = scmp.lt.s32.totalorder %s5784_s19, 8 }
  0x89   : > { %p6035_p7 = por %p6532_p5, %p55_p8  ;;  %s369_s8 = sand.u32 1, %s5780_s18  }
  0x8a   : > { %s6534_s30 = scalar_select %p6041_p6, 1, 0 }
  0x8b   : > { %s6533_s9 = scalar_select %p6035_p7, 1, 0 }
  0x8c   : > { %s6535_s10 = scalar_select %p6047_p9, 1, 0 }
  0x8d   : > { %s5269_s11 = sshll.u32 %s5784_s19, 8  ;;  %s4719_s12 = sshll.u32 %s369_s8, 4 }
  0x8e   : > { %s6536_s0 = sld [smem:[#allocation27_spill]]  ;;  %s373_s25 = scalar_lea.vmem [#allocation6], %s4719_s12 }
  0x8f   : > { %s381_s28 = sshll.u32 %s373_s25, 4  ;;  %p6061_p10 = pnand %p6508_p3, %p51_p0  ;;  %s6065_s28 = int_to_ptr.vmem [resolvable:$true] %s381_s28 }
  0x90   : > { %s370_s2 = scalar_lea.sflag [#allocation7], %s369_s8 }
  0x91   : > { %p5588_p12 = pneg %p6061_p10 }
  0x94   : > { %s6057_s29 = scalar_lea.hbm %s6536_s0, %s5269_s11  ;;  %s5591_s20 = scalar_lea.hbm %s6536_s0, 2048 }
  0x95   : > { %s5586_s26 = scalar_lea.hbm %s6057_s29, 256  ;;  %p5592_p0 = scmp.lt.u32.totalorder %s6057_s29, %s6536_s0 }
  0x96   : > { %p5587_p11 = scmp.ne.s32.totalorder %s6057_s29, %s5586_s26  ;;  %p5593_p5 = scmp.lt.u32.totalorder %s5591_s20, %s5586_s26 }
  0x97   : > { %p5595_p13 = scmp.lt.u32.totalorder %s5586_s26, %s6057_s29 }
  0x98   : > { %p5589_p1 = pnand %p5588_p12, %p5587_p11  ;;  %p5594_p3 = por %p5593_p5, %p5592_p0 }
  0x9a   : > { %p5590_p8 = pneg %p5589_p1  ;;  %p5596_p4 = por %p5595_p13, %p5594_p3 }
  0x9c   : > { %p5597_p9 = pnand %p5596_p4, %p5590_p8 }
  0x9e   : > { %5600 = shalt.err (!%p5597_p9)
}
  0x9f   : > { %s5601_s8 = scalar_lea.vmem %s6065_s28, 256  ;;  %s5792_s11 = smov [#allocation6]  }
  0xa0   : > { %p5602_p11 = scmp.ne.s32.totalorder %s6065_s28, %s5601_s8  ;;  %s5606_s12 = sshll.u32 %s5792_s11, 4  ;;  %s5607_s12 = int_to_ptr.vmem [resolvable:$false] %s5606_s12 }
  0xa1   : > { %s5608_s27 = scalar_lea.vmem %s5607_s12, 512  ;;  %p5609_p7 = scmp.lt.s32.totalorder %s6065_s28, %s5607_s12 }
  0xa2   : > { %p5604_p1 = pnand %p5602_p11, %p5588_p12  ;;  %p5610_p0 = scmp.lt.s32.totalorder %s5608_s27, %s5601_s8 }
  0xa4   : > { %p5605_p6 = pneg %p5604_p1  ;;  %p5611_p5 = por %p5610_p0, %p5609_p7 }
  0xa6   : > { %p5612_p13 = pnand %p5611_p5, %p5605_p6 }
  0xa8   : > { %5615 = shalt.err (!%p5612_p13)
}
  0xa9   : > { %5313 = dma.hbm_to_vmem [thread:$0]  (!%p6061_p10), %s6057_s29, 256, %s6065_s28, %s370_s2  }
  0xaa   : > { %s6093_s26 = sadd.s32 1, %s5784_s19   ;;  %s65_s21 = ssub.s32 7, %s5784_s19 }
  0xab   : > { %s39_s20 = ssub.s32 %s5784_s19, %s6093_s26  ;;  %s66_s25 = ssub.s32 7, %s6093_s26 }
  0xac   : > { %p40_p4 = scmp.eq.s32.totalorder %s39_s20, 0  ;;  %s67_s8 = ssub.s32 %s65_s21, %s66_s25 }
  0xad   : > { %p68_p7 = scmp.eq.s32.totalorder %s67_s8, 0  ;;  %s70_s11 = sadd.s32 1, %s5768_s15 }
  0xae   : > { %s6103_s12 = scalar_select %p40_p4, %s5780_s18, %s42_s24  }
  0xaf   : > { %s6106_s27 = scalar_select %p68_p7, %s5768_s15, %s70_s11  }
  0xb0   : > { %p77_p6 = scmp.ne.s32.totalorder %s5768_s15, %s5764_s14  ;;  %p83_p9 = scmp.ne.s32.totalorder %s5764_s14, %s5760_s13 }
  0xb1   : > { %s388_s29 = sand.u32 1, %s5784_s19   ;;  %s390_s28 = sand.u32 1, %s5768_s15  }
  0xb2   : > { %p6538_p3 = scmp.eq.s32.totalorder %s5784_s19, 0  ;;  %p6539_p12 = scmp.eq.s32.totalorder %s5890_s22, 0 }
  0xb3   : > { %p6541_p11 = scmp.eq.s32.totalorder %s5890_s22, 7  ;;  %p6130_p0 = por %p6029_p2, %p83_p9 }
  0xb4   : > { %p79_p10 = por %p77_p6, %p6538_p3  ;;  %p6118_p8 = por %p83_p9, %p6539_p12 }
  0xb5   : > { %p6124_p1 = por %p6541_p11, %p77_p6  ;;  %s4722_s25 = sshll.u32 %s390_s28, 4 }
  0xb6   : > { %s6543_s24 = scalar_select %p6130_p0, 1, 0 }
  0xb7   : > { %s6542_s20 = scalar_select %p6124_p1, 1, 0 }
  0xb8   : > { %s5270_s8 = sshll.u32 %s65_s21, 8  ;;  %s392_s4 = scalar_lea.vmem [#allocation9], %s4722_s25 }
  0xb9   : > { %s6137_s3 = scalar_lea.hbm %s6494_s1, %s5270_s8  ;;  %s401_s6 = sshll.u32 %s392_s4, 4  ;;  %s6139_s6 = int_to_ptr.vmem [resolvable:$true] %s401_s6 }
  0xba   : > { %p6544_p5 = scmp.lt.s32.totalorder %s5784_s19, 8  ;;  %s389_s21 = scalar_lea.sflag [#allocation10], %s388_s29 }
  0xbb   : > { %s5616_s28 = scalar_lea.hbm %s6137_s3, 256  ;;  %s5621_s25 = scalar_lea.hbm %s6494_s1, 2048 }
  0xbc   : > { %p6143_p2 = pnand %p6544_p5, %p79_p10  ;;  %p5617_p13 = scmp.ne.s32.totalorder %s6137_s3, %s5616_s28 }
  0xbd   : > { %p5622_p9 = scmp.lt.u32.totalorder %s6137_s3, %s6494_s1  ;;  %p5623_p3 = scmp.lt.u32.totalorder %s5621_s25, %s5616_s28 }
  0xbe   : > { %p5618_p4 = pneg %p6143_p2  ;;  %p5625_p12 = scmp.lt.u32.totalorder %s5616_s28, %s6137_s3 }
  0xbf   : > { %p5624_p10 = por %p5623_p3, %p5622_p9 }
  0xc0   : > { %p5619_p7 = pnand %p5618_p4, %p5617_p13 }
  0xc1   : > { %p5626_p11 = por %p5625_p12, %p5624_p10 }
  0xc2   : > { %p5620_p6 = pneg %p5619_p7 }
  0xc4   : > { %p5627_p5 = pnand %p5626_p11, %p5620_p6 }
  0xc6   : > { %5630 = shalt.err (!%p5627_p5)
}
  0xc7   : > { %s5631_s29 = scalar_lea.vmem %s6139_s6, 256  ;;  %s5793_s0 = smov [#allocation9]  }
  0xc8   : > { %p5632_p13 = scmp.ne.s32.totalorder %s6139_s6, %s5631_s29  ;;  %s5636_s4 = sshll.u32 %s5793_s0, 4  ;;  %s5637_s4 = int_to_ptr.vmem [resolvable:$false] %s5636_s4 }
  0xc9   : > { %s5638_s8 = scalar_lea.vmem %s5637_s4, 512  ;;  %p5639_p1 = scmp.lt.s32.totalorder %s6139_s6, %s5637_s4 }
  0xca   : > { %p5634_p7 = pnand %p5632_p13, %p5618_p4  ;;  %p5640_p9 = scmp.lt.s32.totalorder %s5638_s8, %s5631_s29 }
  0xcc   : > { %p5635_p0 = pneg %p5634_p7  ;;  %p5641_p3 = por %p5640_p9, %p5639_p1 }
  0xce   : > { %p5642_p10 = pnand %p5641_p3, %p5635_p0 }
  0xd0   : > { %5645 = shalt.err (!%p5642_p10)
}
  0xd1   : > { %5316 = dma.hbm_to_vmem [thread:$0]  (!%p6143_p2), %s6137_s3, 256, %s6139_s6, %s389_s21  }
  0xd2   : > { %p6546_p6 = scmp.ne.s32.totalorder %s6525_s23, 0 }
  0xd3   : > { %s6175_s28 = sand.u32 (!%p6546_p6), 1, %s5776_s17   ;;  %p6547_p1 = scmp.ne.s32.totalorder (!%p6546_p6), %s6533_s9, 0 }
  0xd4   : > { %410 = sbr.rel (%p6546_p6) target bundleno = 1022 (0x3fe), region = 56  ;;  %s4726_s25 = sshll.u32 (!%p6546_p6), %s6175_s28, 4 }
  0xd5   : > { %s413_s11 = scalar_lea.sflag (!%p6546_p6), [#allocation7], %s6175_s28  ;;  %s6179_s29 = scalar_lea.vmem (!%p6546_p6), [#allocation6], %s4726_s25 }
  0xdb   : > { %5731 = dma.done.wait (%p6547_p1), %s413_s11, 256  }
  0xdc   : > { %5733 = vsyncadd (%p6547_p1), %s413_s11, 4294967040  ;;  %s421_s3 = sand.u32 1, %s5890_s22   ;;  %s6514_s6 = sand.u32 1, %s5764_s14  }
  0xdd   : > { %s6189_s23 = sshll.u32 %s6514_s6, 4  ;;  %s422_s5 = scalar_lea.sflag [#allocation10], %s421_s3 }
  0xde   : > { %s425_s21 = scalar_lea.vmem [#allocation9], %s6189_s23 }
  0xdf   : > { %5735 = dma.done.wait (%p6118_p8), %s422_s5, 256  }
  0xe0   : > { %5737 = vsyncadd (%p6118_p8), %s422_s5, 4294967040  ;;  %p6548_p0 = scmp.eq.s32.totalorder %s5890_s22, 0 }
  0xe2   : > { %5739 = dma.done.wait (%p6548_p0), [#allocation10], 16384   ;;  %p6549_p2 = pmov %p6548_p0 }
  0xe3   : > { %p6550_p4 = pmov %p6548_p0 }
  0xe4   : > { %5741 = vsyncadd (%p6549_p2), [#allocation10], 4294950912 }
  0xe5   : > { %5743 = dma.done.wait (%p6550_p4), [#allocation13], 32768   ;;  %p6551_p12 = pmov %p6548_p0 }
  0xe6   : > { %p6552_p11 = pmov %p6548_p0 }
  0xe7   : > { %5745 = vsyncadd (%p6551_p12), [#allocation13], 4294934528 }
  0xe8   : > { %5747 = dma.done.wait (%p6552_p11), [#allocation16], 16384   ;;  %p6553_p5 = pmov %p6548_p0 }
  0xe9   : > { %s6208_s9 = scalar_lea.vmem [#allocation17], %s4726_s25  ;;  %s6211_s2 = scalar_lea.vmem [#allocation18], %s6189_s23 }
  0xea   : > { %5749 = vsyncadd (%p6553_p5), [#allocation16], 4294950912  ;;  %p6554_p8 = scmp.ne.s32.totalorder %s5890_s22, 0 }
  0xeb   : > { %v5794_v0 = vmov (!%p6554_p8), 0.0  }
  0xec   : > { %493 = sbr.rel (%p6554_p8) target bundleno = 243 (0xf3), region = 84  ;;  %494 = vst [vmem:[#allocation2] sm:$0xff] (!%p6554_p8), %v5794_v0  ;;  %495 = vst [vmem:[#allocation2 + $0x8] sm:$0xff] (!%p6554_p8), %v5794_v0 }
  0xed   : > { %496 = vst [vmem:[#allocation3] sm:$0xff] (!%p6554_p8), %v5794_v0  ;;  %497 = vst [vmem:[#allocation3 + $0x8] sm:$0xff] (!%p6554_p8), %v5794_v0 }
  0xee   : > { %498 = vst [vmem:[#allocation4] sm:$0xff] (!%p6554_p8), %v5794_v0  ;;  %499 = vst [vmem:[#allocation4 + $0x8] sm:$0xff] (!%p6554_p8), %v5794_v0 }
  0xef   : > { %500 = vst [vmem:[#allocation5] sm:$0xff] (!%p6554_p8), %v5794_v0  ;;  %501 = vst [vmem:[#allocation5 + $0x8] sm:$0xff] (!%p6554_p8), %v5794_v0 }
  0xf3 PF: > { %v650_v1 = vld [vmem:[#allocation12] sm:$0xff]  ;;  %v651_v3 = vld [vmem:[#allocation12 + $0x8] sm:$0xff]  ;;  %s6515_s0 = ssub.s32 7, %s5890_s22  ;;  %s6555_s25 = sld [smem:[#allocation28_spill]] }
  0xf4   : > { %v654_v2 = vld [vmem:[#allocation12 + $0x20] sm:$0xff]  ;;  %v655_v5 = vld [vmem:[#allocation12 + $0x28] sm:$0xff]  ;;  %s6556_s3 = sld [smem:[#allocation31_spill]]  ;;  %s5271_s23 = sshll.u32 %s5890_s22, 8 }
  0xf5   : > { %v4738_v4 = vcombine.high %v650_v1, %v654_v2  ;;  %v4737_v6 = vcombine.low %v650_v1, %v654_v2  ;;  %v658_v7 = vld [vmem:[#allocation12 + $0x40] sm:$0xff]  ;;  %v4740_v9 = vcombine.high %v651_v3, %v655_v5  ;;  %v4739_v10 = vcombine.low %v651_v3, %v655_v5  ;;  %v659_v12 = vld [vmem:[#allocation12 + $0x48] sm:$0xff]  ;;  %s4534_s5 = sshll.u32 %s6208_s9, 4  ;;  %s6557_s8 = sld [smem:[#allocation34_spill]]  ;;  %s4535_s5 = int_to_ptr.vmem [resolvable:$true] %s4534_s5 }
  0xf6   : > { %v662_v8 = vld [vmem:[#allocation12 + $0x60] sm:$0xff]  ;;  %v663_v13 = vld [vmem:[#allocation12 + $0x68] sm:$0xff]  ;;  %s4515_s11 = scalar_lea.sflag [#allocation8], %s6175_s28  ;;  %p6558_p7 = scmp.ne.s32.totalorder %s6534_s30, 0 }
  0xf7   : > { %v4746_v11 = vcombine.high %v658_v7, %v662_v8  ;;  %v666_v14 = vld [vmem:[#allocation12 + $0x80] sm:$0xff]  ;;  %1418 = vmatprep.subr.bf16.mxu0 %v4738_v4  ;;  %v4748_v15 = vcombine.high %v659_v12, %v663_v13  ;;  %v667_v17 = vld [vmem:[#allocation12 + $0x88] sm:$0xff]  ;;  %1459 = vmatprep.subr.bf16.mxu1 %v4740_v9  ;;  %v4745_v19 = vcombine.low %v658_v7, %v662_v8 }
  0xf8   : > { %v670_v16 = vld [vmem:[#allocation12 + $0xa0] sm:$0xff]  ;;  %v671_v18 = vld [vmem:[#allocation12 + $0xa8] sm:$0xff]  ;;  %1419 = vmatpush1.bf16.msra.mxu0 %v4737_v6  ;;  %1460 = vmatpush1.bf16.msra.mxu1 %v4739_v10  ;;  %v4747_v20 = vcombine.low %v659_v12, %v663_v13 }
  0xf9   : > { %1420 = vmatprep.subr.bf16.mxu0 %v4746_v11  ;;  %v4754_v21 = vcombine.high %v666_v14, %v670_v16  ;;  %1461 = vmatprep.subr.bf16.mxu1 %v4748_v15  ;;  %v4756_v22 = vcombine.high %v667_v17, %v671_v18  ;;  %v674_v23 = vld [vmem:[#allocation12 + $0xc0] sm:$0xff]  ;;  %v675_v25 = vld [vmem:[#allocation12 + $0xc8] sm:$0xff]  ;;  %v4753_v27 = vcombine.low %v666_v14, %v670_v16 }
  0xfa   : > { %v678_v24 = vld [vmem:[#allocation12 + $0xe0] sm:$0xff]  ;;  %v679_v26 = vld [vmem:[#allocation12 + $0xe8] sm:$0xff]  ;;  %v4755_v28 = vcombine.low %v667_v17, %v671_v18 }
  0xfb   : > { %v4762_v29 = vcombine.high %v674_v23, %v678_v24  ;;  %v4764_v30 = vcombine.high %v675_v25, %v679_v26  ;;  %v682_v31 = vld [vmem:[#allocation12 + $0x100] sm:$0xff]  ;;  %v683_v33 = vld [vmem:[#allocation12 + $0x108] sm:$0xff]  ;;  %v4761_v35 = vcombine.low %v674_v23, %v678_v24  ;;  %v4763_v36 = vcombine.low %v675_v25, %v679_v26 }
  0xfc   : > { %1421 = vmatpush1.bf16.msra.mxu0 %v4745_v19  ;;  %1462 = vmatpush1.bf16.msra.mxu1 %v4747_v20  ;;  %v686_v32 = vld [vmem:[#allocation12 + $0x120] sm:$0xff]  ;;  %v687_v34 = vld [vmem:[#allocation12 + $0x128] sm:$0xff] }
  0xfd   : > { %1422 = vmatprep.subr.bf16.mxu0 %v4754_v21  ;;  %1463 = vmatprep.subr.bf16.mxu1 %v4756_v22  ;;  %v4770_v37 = vcombine.high %v682_v31, %v686_v32  ;;  %v4772_v38 = vcombine.high %v683_v33, %v687_v34  ;;  %v690_v39 = vld [vmem:[#allocation12 + $0x140] sm:$0xff]  ;;  %v691_v41 = vld [vmem:[#allocation12 + $0x148] sm:$0xff]  ;;  %v4769_v43 = vcombine.low %v682_v31, %v686_v32 }
  0xfe   : > { %v694_v40 = vld [vmem:[#allocation12 + $0x160] sm:$0xff]  ;;  %v695_v42 = vld [vmem:[#allocation12 + $0x168] sm:$0xff]  ;;  %v4771_v44 = vcombine.low %v683_v33, %v687_v34 }
  0xff   : > { %v4778_v45 = vcombine.high %v690_v39, %v694_v40  ;;  %v4780_v46 = vcombine.high %v691_v41, %v695_v42  ;;  %v698_v47 = vld [vmem:[#allocation12 + $0x180] sm:$0xff]  ;;  %v699_v49 = vld [vmem:[#allocation12 + $0x188] sm:$0xff]  ;;  %v4777_v51 = vcombine.low %v690_v39, %v694_v40  ;;  %v4779_v52 = vcombine.low %v691_v41, %v695_v42 }
 0x100   : > { %1423 = vmatpush1.bf16.msra.mxu0 %v4753_v27  ;;  %1464 = vmatpush1.bf16.msra.mxu1 %v4755_v28  ;;  %v702_v48 = vld [vmem:[#allocation12 + $0x1a0] sm:$0xff]  ;;  %v703_v50 = vld [vmem:[#allocation12 + $0x1a8] sm:$0xff] }
 0x101   : > { %1424 = vmatprep.subr.bf16.mxu0 %v4762_v29  ;;  %1465 = vmatprep.subr.bf16.mxu1 %v4764_v30  ;;  %v4786_v53 = vcombine.high %v698_v47, %v702_v48  ;;  %v515_v54 = vld [vmem:[#allocation2 + $0x8] sm:$0xff]  ;;  %v4788_v55 = vcombine.high %v699_v49, %v703_v50  ;;  %v706_v56 = vld [vmem:[#allocation12 + $0x1c0] sm:$0xff]  ;;  %v4785_v61 = vcombine.low %v698_v47, %v702_v48 }
 0x102   : > { %v710_v57 = vld [vmem:[#allocation12 + $0x1e0] sm:$0xff]  ;;  %v6215_v58 = vpack.c.bf16 %v515_v54, %v515_v54  ;;  %v707_v59 = vld [vmem:[#allocation12 + $0x1c8] sm:$0xff]  ;;  %v4787_v62 = vcombine.low %v699_v49, %v703_v50 }
 0x103   : > { %v711_v60 = vld [vmem:[#allocation12 + $0x1e8] sm:$0xff]  ;;  %v4794_v63 = vcombine.high %v706_v56, %v710_v57  ;;  %v714_v1 = vld [vmem:[#allocation12 + $0x200] sm:$0xff]  ;;  %v4793_v5 = vcombine.low %v706_v56, %v710_v57 }
 0x104   : > { %1425 = vmatpush1.bf16.msra.mxu0 %v4761_v35  ;;  %1466 = vmatpush1.bf16.msra.mxu1 %v4763_v36  ;;  %v4796_v0 = vcombine.high %v707_v59, %v711_v60  ;;  %v718_v2 = vld [vmem:[#allocation12 + $0x220] sm:$0xff]  ;;  %v715_v3 = vld [vmem:[#allocation12 + $0x208] sm:$0xff]  ;;  %v4795_v6 = vcombine.low %v707_v59, %v711_v60 }
 0x105   : > { %1426 = vmatprep.subr.bf16.mxu0 %v4770_v37  ;;  %1467 = vmatprep.subr.bf16.mxu1 %v4772_v38  ;;  %v719_v4 = vld [vmem:[#allocation12 + $0x228] sm:$0xff]  ;;  %v4802_v7 = vcombine.high %v714_v1, %v718_v2  ;;  %v722_v9 = vld [vmem:[#allocation12 + $0x240] sm:$0xff]  ;;  %v4801_v13 = vcombine.low %v714_v1, %v718_v2  ;;  %v652_v2 = vld [vmem:[#allocation12 + $0x10] sm:$0xff] }
 0x106   : > { %1450 = vmatprep.mubr.bf16.mxu0 %v6215_v58  ;;  %1491 = vmatprep.mubr.bf16.mxu1 %v6215_v58  ;;  %v4804_v8 = vcombine.high %v715_v3, %v719_v4  ;;  %v726_v10 = vld [vmem:[#allocation12 + $0x260] sm:$0xff]  ;;  %v723_v11 = vld [vmem:[#allocation12 + $0x248] sm:$0xff]  ;;  %v4803_v14 = vcombine.low %v715_v3, %v719_v4  ;;  %v656_v3 = vld [vmem:[#allocation12 + $0x30] sm:$0xff] }
 0x107   : > { %v727_v12 = vld [vmem:[#allocation12 + $0x268] sm:$0xff]  ;;  %v4810_v15 = vcombine.high %v722_v9, %v726_v10  ;;  %v730_v17 = vld [vmem:[#allocation12 + $0x280] sm:$0xff]  ;;  %v4809_v21 = vcombine.low %v722_v9, %v726_v10  ;;  %v653_v4 = vld [vmem:[#allocation12 + $0x18] sm:$0xff]  ;;  %v4742_v9 = vcombine.high %v652_v2, %v656_v3 }
 0x108   : > { %1427 = vmatpush1.bf16.msra.mxu0 %v4769_v43  ;;  %1468 = vmatpush1.bf16.msra.mxu1 %v4771_v44  ;;  %v4812_v16 = vcombine.high %v723_v11, %v727_v12  ;;  %v734_v18 = vld [vmem:[#allocation12 + $0x2a0] sm:$0xff]  ;;  %v731_v19 = vld [vmem:[#allocation12 + $0x288] sm:$0xff]  ;;  %v4811_v22 = vcombine.low %v723_v11, %v727_v12  ;;  %v660_v11 = vld [vmem:[#allocation12 + $0x50] sm:$0xff] }
 0x109   : > { %1428 = vmatprep.subr.bf16.mxu0 %v4778_v45  ;;  %1469 = vmatprep.subr.bf16.mxu1 %v4780_v46  ;;  %v735_v20 = vld [vmem:[#allocation12 + $0x2a8] sm:$0xff]  ;;  %v4818_v23 = vcombine.high %v730_v17, %v734_v18  ;;  %v738_v25 = vld [vmem:[#allocation12 + $0x2c0] sm:$0xff]  ;;  %v4817_v29 = vcombine.low %v730_v17, %v734_v18  ;;  %v664_v12 = vld [vmem:[#allocation12 + $0x70] sm:$0xff] }
 0x10a   : > { %v4820_v24 = vcombine.high %v731_v19, %v735_v20  ;;  %v742_v26 = vld [vmem:[#allocation12 + $0x2e0] sm:$0xff]  ;;  %v739_v27 = vld [vmem:[#allocation12 + $0x2c8] sm:$0xff]  ;;  %v4819_v30 = vcombine.low %v731_v19, %v735_v20  ;;  %v4750_v18 = vcombine.high %v660_v11, %v664_v12  ;;  %v668_v20 = vld [vmem:[#allocation12 + $0x90] sm:$0xff] }
 0x10b   : > { %v743_v28 = vld [vmem:[#allocation12 + $0x2e8] sm:$0xff]  ;;  %v4826_v31 = vcombine.high %v738_v25, %v742_v26  ;;  %v746_v33 = vld [vmem:[#allocation12 + $0x300] sm:$0xff]  ;;  %v4825_v37 = vcombine.low %v738_v25, %v742_v26 }
 0x10c   : > { %1429 = vmatpush1.bf16.msra.mxu0 %v4777_v51  ;;  %1470 = vmatpush1.bf16.msra.mxu1 %v4779_v52  ;;  %v4828_v32 = vcombine.high %v739_v27, %v743_v28  ;;  %v750_v34 = vld [vmem:[#allocation12 + $0x320] sm:$0xff]  ;;  %v747_v35 = vld [vmem:[#allocation12 + $0x308] sm:$0xff]  ;;  %v4827_v38 = vcombine.low %v739_v27, %v743_v28  ;;  %v676_v28 = vld [vmem:[#allocation12 + $0xd0] sm:$0xff] }
 0x10d   : > { %1430 = vmatprep.subr.bf16.mxu0 %v4786_v53  ;;  %1471 = vmatprep.subr.bf16.mxu1 %v4788_v55  ;;  %v751_v36 = vld [vmem:[#allocation12 + $0x328] sm:$0xff]  ;;  %v4834_v39 = vcombine.high %v746_v33, %v750_v34  ;;  %v754_v41 = vld [vmem:[#allocation12 + $0x340] sm:$0xff]  ;;  %v4833_v45 = vcombine.low %v746_v33, %v750_v34 }
 0x10e   : > { %v4836_v40 = vcombine.high %v747_v35, %v751_v36  ;;  %v758_v42 = vld [vmem:[#allocation12 + $0x360] sm:$0xff]  ;;  %v755_v43 = vld [vmem:[#allocation12 + $0x348] sm:$0xff]  ;;  %v4835_v46 = vcombine.low %v747_v35, %v751_v36  ;;  %v684_v36 = vld [vmem:[#allocation12 + $0x110] sm:$0xff] }
 0x10f   : > { %v759_v44 = vld [vmem:[#allocation12 + $0x368] sm:$0xff]  ;;  %v4842_v47 = vcombine.high %v754_v41, %v758_v42  ;;  %v762_v49 = vld [vmem:[#allocation12 + $0x380] sm:$0xff]  ;;  %v4841_v53 = vcombine.low %v754_v41, %v758_v42 }
 0x110   : > { %1431 = vmatpush1.bf16.msra.mxu0 %v4785_v61  ;;  %1472 = vmatpush1.bf16.msra.mxu1 %v4787_v62  ;;  %v4844_v48 = vcombine.high %v755_v43, %v759_v44  ;;  %v766_v50 = vld [vmem:[#allocation12 + $0x3a0] sm:$0xff]  ;;  %v763_v51 = vld [vmem:[#allocation12 + $0x388] sm:$0xff]  ;;  %v4843_v54 = vcombine.low %v755_v43, %v759_v44  ;;  %v692_v43 = vld [vmem:[#allocation12 + $0x150] sm:$0xff] }
 0x111   : > { %1432 = vmatprep.subr.bf16.mxu0 %v4794_v63  ;;  %1473 = vmatprep.subr.bf16.mxu1 %v4796_v0  ;;  %v767_v52 = vld [vmem:[#allocation12 + $0x3a8] sm:$0xff]  ;;  %v4850_v55 = vcombine.high %v762_v49, %v766_v50  ;;  %v770_v57 = vld [vmem:[#allocation12 + $0x3c0] sm:$0xff]  ;;  %v4849_v62 = vcombine.low %v762_v49, %v766_v50  ;;  %v696_v44 = vld [vmem:[#allocation12 + $0x170] sm:$0xff] }
 0x112   : > { %v4852_v56 = vcombine.high %v763_v51, %v767_v52  ;;  %v774_v59 = vld [vmem:[#allocation12 + $0x3e0] sm:$0xff]  ;;  %v771_v60 = vld [vmem:[#allocation12 + $0x3c8] sm:$0xff]  ;;  %v4851_v63 = vcombine.low %v763_v51, %v767_v52  ;;  %v4782_v49 = vcombine.high %v692_v43, %v696_v44  ;;  %v700_v51 = vld [vmem:[#allocation12 + $0x190] sm:$0xff] }
 0x113   : > { %v775_v61 = vld [vmem:[#allocation12 + $0x3e8] sm:$0xff]  ;;  %v4858_v0 = vcombine.high %v770_v57, %v774_v59  ;;  %v704_v52 = vld [vmem:[#allocation12 + $0x1b0] sm:$0xff] }
 0x114   : > { %1433 = vmatpush1.bf16.msra.mxu0 %v4793_v5  ;;  %1474 = vmatpush1.bf16.msra.mxu1 %v4795_v6  ;;  %v4860_v1 = vcombine.high %v771_v60, %v775_v61  ;;  %v657_v5 = vld [vmem:[#allocation12 + $0x38] sm:$0xff]  ;;  %v4857_v6 = vcombine.low %v770_v57, %v774_v59  ;;  %v4790_v57 = vcombine.high %v700_v51, %v704_v52 }
 0x115   : > { %1434 = vmatprep.subr.bf16.mxu0 %v4802_v7  ;;  %1475 = vmatprep.subr.bf16.mxu1 %v4804_v8  ;;  %v514_v7 = vld [vmem:[#allocation2] sm:$0xff]  ;;  %v4859_v8 = vcombine.low %v771_v60, %v775_v61  ;;  %v4744_v10 = vcombine.high %v653_v4, %v657_v5  ;;  %v4743_v17 = vcombine.low %v653_v4, %v657_v5  ;;  %v708_v60 = vld [vmem:[#allocation12 + $0x1d0] sm:$0xff] }
 0x116   : > { %v712_v61 = vld [vmem:[#allocation12 + $0x1f0] sm:$0xff] }
 0x117   : > { %v716_v4 = vld [vmem:[#allocation12 + $0x210] sm:$0xff] }
 0x118   : > { %1435 = vmatpush1.bf16.msra.mxu0 %v4801_v13  ;;  %1476 = vmatpush1.bf16.msra.mxu1 %v4803_v14  ;;  %v6219_v13 = vpack.c.bf16 %v514_v7, %v514_v7  ;;  %v661_v14 = vld [vmem:[#allocation12 + $0x58] sm:$0xff]  ;;  %v720_v5 = vld [vmem:[#allocation12 + $0x230] sm:$0xff] }
 0x119   : > { %1436 = vmatprep.subr.bf16.mxu0 %v4810_v15  ;;  %1477 = vmatprep.subr.bf16.mxu1 %v4812_v16  ;;  %v665_v15 = vld [vmem:[#allocation12 + $0x78] sm:$0xff]  ;;  %v4741_v16 = vcombine.low %v652_v2, %v656_v3  ;;  %v4798_v2 = vcombine.high %v708_v60, %v712_v61 }
 0x11a   : > { %v4752_v19 = vcombine.high %v661_v14, %v665_v15  ;;  %v4751_v25 = vcombine.low %v661_v14, %v665_v15  ;;  %v721_v7 = vld [vmem:[#allocation12 + $0x238] sm:$0xff]  ;;  %v728_v14 = vld [vmem:[#allocation12 + $0x270] sm:$0xff] }
 0x11b   : > { %v725_v15 = vld [vmem:[#allocation12 + $0x258] sm:$0xff] }
 0x11c   : > { %1437 = vmatpush1.bf16.msra.mxu0 %v4809_v21  ;;  %1478 = vmatpush1.bf16.msra.mxu1 %v4811_v22  ;;  %v672_v21 = vld [vmem:[#allocation12 + $0xb0] sm:$0xff]  ;;  %v669_v22 = vld [vmem:[#allocation12 + $0x98] sm:$0xff] }
 0x11d   : > { %1438 = vmatprep.subr.bf16.mxu0 %v4818_v23  ;;  %1479 = vmatprep.subr.bf16.mxu1 %v4820_v24  ;;  %v673_v23 = vld [vmem:[#allocation12 + $0xb8] sm:$0xff]  ;;  %v4749_v24 = vcombine.low %v660_v11, %v664_v12  ;;  %v4758_v26 = vcombine.high %v668_v20, %v672_v21  ;;  %v724_v12 = vld [vmem:[#allocation12 + $0x250] sm:$0xff] }
 0x11e   : > { %v4760_v27 = vcombine.high %v669_v22, %v673_v23  ;;  %v4759_v33 = vcombine.low %v669_v22, %v673_v23  ;;  %v736_v22 = vld [vmem:[#allocation12 + $0x2b0] sm:$0xff]  ;;  %v733_v23 = vld [vmem:[#allocation12 + $0x298] sm:$0xff] }
 0x120   : > { %1439 = vmatpush1.bf16.msra.mxu0 %v4817_v29  ;;  %1480 = vmatpush1.bf16.msra.mxu1 %v4819_v30  ;;  %v680_v29 = vld [vmem:[#allocation12 + $0xf0] sm:$0xff]  ;;  %v677_v30 = vld [vmem:[#allocation12 + $0xd8] sm:$0xff] }
 0x121   : > { %1440 = vmatprep.subr.bf16.mxu0 %v4826_v31  ;;  %1481 = vmatprep.subr.bf16.mxu1 %v4828_v32  ;;  %v681_v31 = vld [vmem:[#allocation12 + $0xf8] sm:$0xff]  ;;  %v4757_v32 = vcombine.low %v668_v20, %v672_v21  ;;  %v4766_v34 = vcombine.high %v676_v28, %v680_v29  ;;  %v732_v21 = vld [vmem:[#allocation12 + $0x290] sm:$0xff] }
 0x122   : > { %v4768_v35 = vcombine.high %v677_v30, %v681_v31  ;;  %v4767_v41 = vcombine.low %v677_v30, %v681_v31  ;;  %v744_v30 = vld [vmem:[#allocation12 + $0x2f0] sm:$0xff]  ;;  %v741_v31 = vld [vmem:[#allocation12 + $0x2d8] sm:$0xff] }
 0x124   : > { %1441 = vmatpush1.bf16.msra.mxu0 %v4825_v37  ;;  %1482 = vmatpush1.bf16.msra.mxu1 %v4827_v38  ;;  %v688_v37 = vld [vmem:[#allocation12 + $0x130] sm:$0xff]  ;;  %v685_v38 = vld [vmem:[#allocation12 + $0x118] sm:$0xff] }
 0x125   : > { %1442 = vmatprep.subr.bf16.mxu0 %v4834_v39  ;;  %1483 = vmatprep.subr.bf16.mxu1 %v4836_v40  ;;  %v689_v39 = vld [vmem:[#allocation12 + $0x138] sm:$0xff]  ;;  %v4765_v40 = vcombine.low %v676_v28, %v680_v29  ;;  %v4774_v42 = vcombine.high %v684_v36, %v688_v37  ;;  %v740_v29 = vld [vmem:[#allocation12 + $0x2d0] sm:$0xff] }
 0x128   : > { %1443 = vmatpush1.bf16.msra.mxu0 %v4833_v45  ;;  %1484 = vmatpush1.bf16.msra.mxu1 %v4835_v46  ;;  %v693_v45 = vld [vmem:[#allocation12 + $0x158] sm:$0xff] }
 0x129   : > { %1444 = vmatprep.subr.bf16.mxu0 %v4842_v47  ;;  %1485 = vmatprep.subr.bf16.mxu1 %v4844_v48  ;;  %v697_v46 = vld [vmem:[#allocation12 + $0x178] sm:$0xff]  ;;  %v4773_v47 = vcombine.low %v684_v36, %v688_v37  ;;  %v4775_v48 = vcombine.low %v685_v38, %v689_v39  ;;  %v748_v37 = vld [vmem:[#allocation12 + $0x310] sm:$0xff] }
 0x12a   : > { %v4784_v50 = vcombine.high %v693_v45, %v697_v46 }
 0x12c   : > { %1445 = vmatpush1.bf16.msra.mxu0 %v4841_v53  ;;  %1486 = vmatpush1.bf16.msra.mxu1 %v4843_v54  ;;  %v701_v53 = vld [vmem:[#allocation12 + $0x198] sm:$0xff] }
 0x12d   : > { %1446 = vmatprep.subr.bf16.mxu0 %v4850_v55  ;;  %1487 = vmatprep.subr.bf16.mxu1 %v4852_v56  ;;  %v705_v54 = vld [vmem:[#allocation12 + $0x1b8] sm:$0xff]  ;;  %v4781_v55 = vcombine.low %v692_v43, %v696_v44  ;;  %v4783_v56 = vcombine.low %v693_v45, %v697_v46  ;;  %v756_v44 = vld [vmem:[#allocation12 + $0x350] sm:$0xff] }
 0x12e   : > { %v4792_v59 = vcombine.high %v701_v53, %v705_v54  ;;  %v760_v45 = vld [vmem:[#allocation12 + $0x370] sm:$0xff]  ;;  %v757_v46 = vld [vmem:[#allocation12 + $0x358] sm:$0xff] }
 0x130   : > { %1447 = vmatpush1.bf16.msra.mxu0 %v4849_v62  ;;  %1488 = vmatpush1.bf16.msra.mxu1 %v4851_v63  ;;  %v709_v62 = vld [vmem:[#allocation12 + $0x1d8] sm:$0xff] }
 0x131   : > { %1448 = vmatprep.subr.bf16.mxu0 %v4858_v0  ;;  %1489 = vmatprep.subr.bf16.mxu1 %v4860_v1  ;;  %v713_v63 = vld [vmem:[#allocation12 + $0x1f8] sm:$0xff]  ;;  %v4789_v0 = vcombine.low %v700_v51, %v704_v52  ;;  %v4791_v1 = vcombine.low %v701_v53, %v705_v54  ;;  %v764_v52 = vld [vmem:[#allocation12 + $0x390] sm:$0xff] }
 0x132   : > { %v4800_v3 = vcombine.high %v709_v62, %v713_v63  ;;  %v768_v53 = vld [vmem:[#allocation12 + $0x3b0] sm:$0xff]  ;;  %v765_v54 = vld [vmem:[#allocation12 + $0x398] sm:$0xff] }
 0x134   : > { %1449 = vmatpush1.bf16.msra.mxu0 %v4857_v6  ;;  %1490 = vmatpush1.bf16.msra.mxu1 %v4859_v8  ;;  %v717_v6 = vld [vmem:[#allocation12 + $0x218] sm:$0xff]  ;;  %v4797_v8 = vcombine.low %v708_v60, %v712_v61  ;;  %v772_v61 = vld [vmem:[#allocation12 + $0x3d0] sm:$0xff] }
 0x135   : > { %1500 = vmatprep.subr.bf16.mxu0 %v4742_v9  ;;  %1541 = vmatprep.subr.bf16.mxu1 %v4744_v10  ;;  %v4799_v9 = vcombine.low %v709_v62, %v713_v63  ;;  %v4806_v10 = vcombine.high %v716_v4, %v720_v5  ;;  %v4808_v11 = vcombine.high %v717_v6, %v721_v7  ;;  %v776_v62 = vld [vmem:[#allocation12 + $0x3f0] sm:$0xff]  ;;  %v773_v63 = vld [vmem:[#allocation12 + $0x3d8] sm:$0xff] }
 0x137   : > { %1451 = vmatmul.mubr.bf16.vlgmr.msra.gmra.mrb[0].mxu0 %v6219_v13  ;;  %1492 = vmatmul.mubr.bf16.vlgmr.msra.gmra.mrb[0].mxu1 %v6219_v13 }
 0x138   : > { %1501 = vmatpush1.bf16.msra.mxu0 %v4741_v16  ;;  %1542 = vmatpush1.bf16.msra.mxu1 %v4743_v17  ;;  %v729_v16 = vld [vmem:[#allocation12 + $0x278] sm:$0xff]  ;;  %v4805_v17 = vcombine.low %v716_v4, %v720_v5  ;;  %v520_v5 = vld [vmem:[#allocation11] sm:$0xff] }
 0x139   : > { %1502 = vmatprep.subr.bf16.mxu0 %v4750_v18  ;;  %1543 = vmatprep.subr.bf16.mxu1 %v4752_v19  ;;  %v4807_v18 = vcombine.low %v717_v6, %v721_v7  ;;  %v4814_v19 = vcombine.high %v724_v12, %v728_v14  ;;  %v4816_v20 = vcombine.high %v725_v15, %v729_v16  ;;  %v524_v6 = vld [vmem:[#allocation11 + $0x20] sm:$0xff]  ;;  %v521_v7 = vld [vmem:[#allocation11 + $0x8] sm:$0xff] }
 0x13a   : > { %1532 = vmatprep.mubr.bf16.mxu0 %v6215_v58  ;;  %1573 = vmatprep.mubr.bf16.mxu1 %v6215_v58  ;;  %v4776_v58 = vcombine.high %v685_v38, %v689_v39  ;;  %v752_v38 = vld [vmem:[#allocation12 + $0x330] sm:$0xff]  ;;  %v749_v39 = vld [vmem:[#allocation12 + $0x318] sm:$0xff] }
 0x13c   : > { %1503 = vmatpush1.bf16.msra.mxu0 %v4749_v24  ;;  %1544 = vmatpush1.bf16.msra.mxu1 %v4751_v25  ;;  %v737_v24 = vld [vmem:[#allocation12 + $0x2b8] sm:$0xff]  ;;  %v4813_v25 = vcombine.low %v724_v12, %v728_v14  ;;  %v528_v14 = vld [vmem:[#allocation11 + $0x40] sm:$0xff] }
 0x13d   : > { %1504 = vmatprep.subr.bf16.mxu0 %v4758_v26  ;;  %1545 = vmatprep.subr.bf16.mxu1 %v4760_v27  ;;  %v4815_v26 = vcombine.low %v725_v15, %v729_v16  ;;  %v4822_v27 = vcombine.high %v732_v21, %v736_v22  ;;  %v4824_v28 = vcombine.high %v733_v23, %v737_v24  ;;  %v532_v15 = vld [vmem:[#allocation11 + $0x60] sm:$0xff]  ;;  %v529_v16 = vld [vmem:[#allocation11 + $0x48] sm:$0xff] }
 0x140   : > { %1505 = vmatpush1.bf16.msra.mxu0 %v4757_v32  ;;  %1546 = vmatpush1.bf16.msra.mxu1 %v4759_v33  ;;  %v745_v32 = vld [vmem:[#allocation12 + $0x2f8] sm:$0xff]  ;;  %v4821_v33 = vcombine.low %v732_v21, %v736_v22  ;;  %v4874_v21 = vcombine.high %v528_v14, %v532_v15 }
 0x141   : > { %1506 = vmatprep.subr.bf16.mxu0 %v4766_v34  ;;  %1547 = vmatprep.subr.bf16.mxu1 %v4768_v35  ;;  %v4823_v34 = vcombine.low %v733_v23, %v737_v24  ;;  %v4830_v35 = vcombine.high %v740_v29, %v744_v30  ;;  %v4832_v36 = vcombine.high %v741_v31, %v745_v32  ;;  %v536_v23 = vld [vmem:[#allocation11 + $0x80] sm:$0xff] }
 0x142   : > { %v540_v24 = vld [vmem:[#allocation11 + $0xa0] sm:$0xff] }
 0x144   : > { %1507 = vmatpush1.bf16.msra.mxu0 %v4765_v40  ;;  %1548 = vmatpush1.bf16.msra.mxu1 %v4767_v41  ;;  %v753_v40 = vld [vmem:[#allocation12 + $0x338] sm:$0xff]  ;;  %v4829_v41 = vcombine.low %v740_v29, %v744_v30  ;;  %v4882_v30 = vcombine.high %v536_v23, %v540_v24 }
 0x145   : > { %1508 = vmatprep.subr.bf16.mxu0 %v4774_v42  ;;  %1549 = vmatprep.subr.bf16.mxu1 %v4776_v58  ;;  %v4831_v42 = vcombine.low %v741_v31, %v745_v32  ;;  %v4838_v58 = vcombine.high %v748_v37, %v752_v38  ;;  %v4840_v43 = vcombine.high %v749_v39, %v753_v40  ;;  %v544_v32 = vld [vmem:[#allocation11 + $0xc0] sm:$0xff] }
 0x148   : > { %1509 = vmatpush1.bf16.msra.mxu0 %v4773_v47  ;;  %1550 = vmatpush1.bf16.msra.mxu1 %v4775_v48  ;;  %v761_v47 = vld [vmem:[#allocation12 + $0x378] sm:$0xff]  ;;  %v4837_v48 = vcombine.low %v748_v37, %v752_v38 }
 0x149   : > { %1510 = vmatprep.subr.bf16.mxu0 %v4782_v49  ;;  %1551 = vmatprep.subr.bf16.mxu1 %v4784_v50  ;;  %v4839_v49 = vcombine.low %v749_v39, %v753_v40  ;;  %v4846_v50 = vcombine.high %v756_v44, %v760_v45  ;;  %v4848_v51 = vcombine.high %v757_v46, %v761_v47  ;;  %v552_v39 = vld [vmem:[#allocation11 + $0x100] sm:$0xff] }
 0x14a   : > { %v556_v40 = vld [vmem:[#allocation11 + $0x120] sm:$0xff] }
 0x14c   : > { %1511 = vmatpush1.bf16.msra.mxu0 %v4781_v55  ;;  %1552 = vmatpush1.bf16.msra.mxu1 %v4783_v56  ;;  %v769_v55 = vld [vmem:[#allocation12 + $0x3b8] sm:$0xff]  ;;  %v4845_v56 = vcombine.low %v756_v44, %v760_v45  ;;  %v4898_v44 = vcombine.high %v552_v39, %v556_v40 }
 0x14d   : > { %1512 = vmatprep.subr.bf16.mxu0 %v4790_v57  ;;  %1553 = vmatprep.subr.bf16.mxu1 %v4792_v59  ;;  %v4847_v57 = vcombine.low %v757_v46, %v761_v47  ;;  %v4854_v59 = vcombine.high %v764_v52, %v768_v53  ;;  %v4856_v60 = vcombine.high %v765_v54, %v769_v55  ;;  %v560_v46 = vld [vmem:[#allocation11 + $0x140] sm:$0xff] }
 0x14e   : > { %v564_v47 = vld [vmem:[#allocation11 + $0x160] sm:$0xff] }
 0x150   : > { %1513 = vmatpush1.bf16.msra.mxu0 %v4789_v0  ;;  %1554 = vmatpush1.bf16.msra.mxu1 %v4791_v1  ;;  %v777_v0 = vld [vmem:[#allocation12 + $0x3f8] sm:$0xff]  ;;  %v4853_v1 = vcombine.low %v764_v52, %v768_v53  ;;  %v4906_v52 = vcombine.high %v560_v46, %v564_v47 }
 0x151   : > { %1514 = vmatprep.subr.bf16.mxu0 %v4798_v2  ;;  %1555 = vmatprep.subr.bf16.mxu1 %v4800_v3  ;;  %v4855_v2 = vcombine.low %v765_v54, %v769_v55  ;;  %v4862_v3 = vcombine.high %v772_v61, %v776_v62  ;;  %v4864_v4 = vcombine.high %v773_v63, %v777_v0  ;;  %v568_v54 = vld [vmem:[#allocation11 + $0x180] sm:$0xff] }
 0x152   : > { %v572_v55 = vld [vmem:[#allocation11 + $0x1a0] sm:$0xff] }
 0x154   : > { %1515 = vmatpush1.bf16.msra.mxu0 %v4797_v8  ;;  %1556 = vmatpush1.bf16.msra.mxu1 %v4799_v9  ;;  %v525_v8 = vld [vmem:[#allocation11 + $0x28] sm:$0xff]  ;;  %v4861_v9 = vcombine.low %v772_v61, %v776_v62  ;;  %v4914_v61 = vcombine.high %v568_v54, %v572_v55 }
 0x155   : > { %1516 = vmatprep.subr.bf16.mxu0 %v4806_v10  ;;  %1557 = vmatprep.subr.bf16.mxu1 %v4808_v11  ;;  %v4863_v10 = vcombine.low %v773_v63, %v777_v0  ;;  %v4866_v11 = vcombine.high %v520_v5, %v524_v6  ;;  %v4868_v12 = vcombine.high %v521_v7, %v525_v8  ;;  %v576_v63 = vld [vmem:[#allocation11 + $0x1c0] sm:$0xff] }
 0x156   : > { %v580_v0 = vld [vmem:[#allocation11 + $0x1e0] sm:$0xff] }
 0x158   : > { %1517 = vmatpush1.bf16.msra.mxu0 %v4805_v17  ;;  %1558 = vmatpush1.bf16.msra.mxu1 %v4807_v18  ;;  %v533_v17 = vld [vmem:[#allocation11 + $0x68] sm:$0xff] }
 0x159   : > { %1518 = vmatprep.subr.bf16.mxu0 %v4814_v19  ;;  %1559 = vmatprep.subr.bf16.mxu1 %v4816_v20  ;;  %v513_v18 = vld [vmem:[%s6179_s29 + $0x8] sm:$0xff]  ;;  %v4865_v19 = vcombine.low %v520_v5, %v524_v6  ;;  %v4867_v20 = vcombine.low %v521_v7, %v525_v8  ;;  %v4876_v22 = vcombine.high %v529_v16, %v533_v17  ;;  %v584_v7 = vld [vmem:[#allocation11 + $0x200] sm:$0xff] }
 0x15a   : > { %v4875_v29 = vcombine.low %v529_v16, %v533_v17  ;;  %v4922_v5 = vcombine.high %v576_v63, %v580_v0  ;;  %v588_v8 = vld [vmem:[#allocation11 + $0x220] sm:$0xff] }
 0x15b   : > { %v592_v16 = vld [vmem:[#allocation11 + $0x240] sm:$0xff] }
 0x15c   : > { %1519 = vmatpush1.bf16.msra.mxu0 %v4813_v25  ;;  %1560 = vmatpush1.bf16.msra.mxu1 %v4815_v26  ;;  %v6226_v25 = vpack.c.bf16 %v513_v18, %v513_v18  ;;  %v537_v26 = vld [vmem:[#allocation11 + $0x88] sm:$0xff]  ;;  %v596_v17 = vld [vmem:[#allocation11 + $0x260] sm:$0xff] }
 0x15d   : > { %1520 = vmatprep.subr.bf16.mxu0 %v4822_v27  ;;  %1561 = vmatprep.subr.bf16.mxu1 %v4824_v28  ;;  %v541_v27 = vld [vmem:[#allocation11 + $0xa8] sm:$0xff]  ;;  %v4873_v28 = vcombine.low %v528_v14, %v532_v15  ;;  %v4930_v14 = vcombine.high %v584_v7, %v588_v8 }
 0x15e   : > { %v4884_v31 = vcombine.high %v537_v26, %v541_v27  ;;  %v593_v18 = vld [vmem:[#allocation11 + $0x248] sm:$0xff] }
 0x160   : > { %1521 = vmatpush1.bf16.msra.mxu0 %v4821_v33  ;;  %1562 = vmatpush1.bf16.msra.mxu1 %v4823_v34  ;;  %v548_v33 = vld [vmem:[#allocation11 + $0xe0] sm:$0xff]  ;;  %v545_v34 = vld [vmem:[#allocation11 + $0xc8] sm:$0xff] }
 0x161   : > { %1522 = vmatprep.subr.bf16.mxu0 %v4830_v35  ;;  %1563 = vmatprep.subr.bf16.mxu1 %v4832_v36  ;;  %v549_v35 = vld [vmem:[#allocation11 + $0xe8] sm:$0xff]  ;;  %v4881_v36 = vcombine.low %v536_v23, %v540_v24  ;;  %v4890_v37 = vcombine.high %v544_v32, %v548_v33  ;;  %v600_v24 = vld [vmem:[#allocation11 + $0x280] sm:$0xff] }
 0x162   : > { %v4892_v38 = vcombine.high %v545_v34, %v549_v35 }
 0x164   : > { %1523 = vmatpush1.bf16.msra.mxu0 %v4829_v41  ;;  %1564 = vmatpush1.bf16.msra.mxu1 %v4831_v42  ;;  %v553_v41 = vld [vmem:[#allocation11 + $0x108] sm:$0xff] }
 0x165   : > { %1524 = vmatprep.subr.bf16.mxu0 %v4838_v58  ;;  %1565 = vmatprep.subr.bf16.mxu1 %v4840_v43  ;;  %v557_v42 = vld [vmem:[#allocation11 + $0x128] sm:$0xff]  ;;  %v4889_v58 = vcombine.low %v544_v32, %v548_v33  ;;  %v4891_v43 = vcombine.low %v545_v34, %v549_v35  ;;  %v608_v33 = vld [vmem:[#allocation11 + $0x2c0] sm:$0xff] }
 0x166   : > { %v4900_v45 = vcombine.high %v553_v41, %v557_v42  ;;  %v612_v34 = vld [vmem:[#allocation11 + $0x2e0] sm:$0xff]  ;;  %v609_v35 = vld [vmem:[#allocation11 + $0x2c8] sm:$0xff] }
 0x168   : > { %1525 = vmatpush1.bf16.msra.mxu0 %v4837_v48  ;;  %1566 = vmatpush1.bf16.msra.mxu1 %v4839_v49  ;;  %v561_v48 = vld [vmem:[#allocation11 + $0x148] sm:$0xff] }
 0x169   : > { %1526 = vmatprep.subr.bf16.mxu0 %v4846_v50  ;;  %1567 = vmatprep.subr.bf16.mxu1 %v4848_v51  ;;  %v565_v49 = vld [vmem:[#allocation11 + $0x168] sm:$0xff]  ;;  %v4897_v50 = vcombine.low %v552_v39, %v556_v40  ;;  %v4899_v51 = vcombine.low %v553_v41, %v557_v42  ;;  %v616_v40 = vld [vmem:[#allocation11 + $0x300] sm:$0xff] }
 0x16a   : > { %v4908_v53 = vcombine.high %v561_v48, %v565_v49  ;;  %v620_v41 = vld [vmem:[#allocation11 + $0x320] sm:$0xff]  ;;  %v617_v42 = vld [vmem:[#allocation11 + $0x308] sm:$0xff] }
 0x16c   : > { %1527 = vmatpush1.bf16.msra.mxu0 %v4845_v56  ;;  %1568 = vmatpush1.bf16.msra.mxu1 %v4847_v57  ;;  %v569_v56 = vld [vmem:[#allocation11 + $0x188] sm:$0xff] }
 0x16d   : > { %1528 = vmatprep.subr.bf16.mxu0 %v4854_v59  ;;  %1569 = vmatprep.subr.bf16.mxu1 %v4856_v60  ;;  %v573_v57 = vld [vmem:[#allocation11 + $0x1a8] sm:$0xff]  ;;  %v4905_v59 = vcombine.low %v560_v46, %v564_v47  ;;  %v4907_v60 = vcombine.low %v561_v48, %v565_v49  ;;  %v624_v47 = vld [vmem:[#allocation11 + $0x340] sm:$0xff] }
 0x16e   : > { %v4916_v62 = vcombine.high %v569_v56, %v573_v57  ;;  %v628_v48 = vld [vmem:[#allocation11 + $0x360] sm:$0xff]  ;;  %v625_v49 = vld [vmem:[#allocation11 + $0x348] sm:$0xff] }
 0x170   : > { %1529 = vmatpush1.bf16.msra.mxu0 %v4853_v1  ;;  %1570 = vmatpush1.bf16.msra.mxu1 %v4855_v2  ;;  %v577_v1 = vld [vmem:[#allocation11 + $0x1c8] sm:$0xff] }
 0x171   : > { %1530 = vmatprep.subr.bf16.mxu0 %v4862_v3  ;;  %1571 = vmatprep.subr.bf16.mxu1 %v4864_v4  ;;  %v581_v2 = vld [vmem:[#allocation11 + $0x1e8] sm:$0xff]  ;;  %v4913_v3 = vcombine.low %v568_v54, %v572_v55  ;;  %v4915_v4 = vcombine.low %v569_v56, %v573_v57  ;;  %v632_v55 = vld [vmem:[#allocation11 + $0x380] sm:$0xff] }
 0x172   : > { %v4924_v6 = vcombine.high %v577_v1, %v581_v2  ;;  %v636_v56 = vld [vmem:[#allocation11 + $0x3a0] sm:$0xff]  ;;  %v633_v57 = vld [vmem:[#allocation11 + $0x388] sm:$0xff] }
 0x174   : > { %1531 = vmatpush1.bf16.msra.mxu0 %v4861_v9  ;;  %1572 = vmatpush1.bf16.msra.mxu1 %v4863_v10  ;;  %v585_v9 = vld [vmem:[#allocation11 + $0x208] sm:$0xff] }
 0x175   : > { %2222 = vmatprep.subr.bf16.mxu0 %v4866_v11  ;;  %2263 = vmatprep.subr.bf16.mxu1 %v4868_v12  ;;  %v589_v10 = vld [vmem:[#allocation11 + $0x228] sm:$0xff]  ;;  %v4921_v11 = vcombine.low %v576_v63, %v580_v0  ;;  %v4923_v12 = vcombine.low %v577_v1, %v581_v2  ;;  %v640_v0 = vld [vmem:[#allocation11 + $0x3c0] sm:$0xff] }
 0x176   : > { %v4932_v15 = vcombine.high %v585_v9, %v589_v10  ;;  %v644_v1 = vld [vmem:[#allocation11 + $0x3e0] sm:$0xff]  ;;  %v641_v2 = vld [vmem:[#allocation11 + $0x3c8] sm:$0xff] }
 0x177   : > { %1533 = vmatmul.mubr.bf16.vlgmr.msra.gmra.mrb[4].mxu0 %v6219_v13  ;;  %1574 = vmatmul.mubr.bf16.vlgmr.msra.gmra.mrb[4].mxu1 %v6219_v13  ;;  %v4883_v13 = vcombine.low %v537_v26, %v541_v27  ;;  %v604_v26 = vld [vmem:[#allocation11 + $0x2a0] sm:$0xff]  ;;  %v601_v27 = vld [vmem:[#allocation11 + $0x288] sm:$0xff] }
 0x178   : > { %2223 = vmatpush1.bf16.msra.mxu0 %v4865_v19  ;;  %2264 = vmatpush1.bf16.msra.mxu1 %v4867_v20  ;;  %v597_v19 = vld [vmem:[#allocation11 + $0x268] sm:$0xff]  ;;  %v4929_v20 = vcombine.low %v584_v7, %v588_v8  ;;  %v522_v8 = vld [vmem:[#allocation11 + $0x10] sm:$0xff] }
 0x179   : > { %2224 = vmatprep.subr.bf16.mxu0 %v4874_v21  ;;  %2265 = vmatprep.subr.bf16.mxu1 %v4876_v22  ;;  %v4931_v21 = vcombine.low %v585_v9, %v589_v10  ;;  %v4938_v22 = vcombine.high %v592_v16, %v596_v17  ;;  %v4940_v23 = vcombine.high %v593_v18, %v597_v19  ;;  %v526_v9 = vld [vmem:[#allocation11 + $0x30] sm:$0xff]  ;;  %v523_v10 = vld [vmem:[#allocation11 + $0x18] sm:$0xff] }
 0x17a   : > { %2254 = vmatprep.mubr.bf16.mxu0 %v6226_v25  ;;  %2295 = vmatprep.mubr.bf16.mxu1 %v6226_v25 }
 0x17c   : > { %2225 = vmatpush1.bf16.msra.mxu0 %v4873_v28  ;;  %2266 = vmatpush1.bf16.msra.mxu1 %v4875_v29  ;;  %v605_v28 = vld [vmem:[#allocation11 + $0x2a8] sm:$0xff]  ;;  %v4937_v29 = vcombine.low %v592_v16, %v596_v17  ;;  %v4870_v16 = vcombine.high %v522_v8, %v526_v9 }
 0x17d   : > { %2226 = vmatprep.subr.bf16.mxu0 %v4882_v30  ;;  %2267 = vmatprep.subr.bf16.mxu1 %v4884_v31  ;;  %v4939_v30 = vcombine.low %v593_v18, %v597_v19  ;;  %v4946_v31 = vcombine.high %v600_v24, %v604_v26  ;;  %v4948_v32 = vcombine.high %v601_v27, %v605_v28  ;;  %v530_v18 = vld [vmem:[#allocation11 + $0x50] sm:$0xff] }
 0x17e   : > { %v534_v19 = vld [vmem:[#allocation11 + $0x70] sm:$0xff] }
 0x180   : > { %2227 = vmatpush1.bf16.msra.mxu0 %v4881_v36  ;;  %2268 = vmatpush1.bf16.msra.mxu1 %v4883_v13  ;;  %v613_v36 = vld [vmem:[#allocation11 + $0x2e8] sm:$0xff]  ;;  %v4945_v13 = vcombine.low %v600_v24, %v604_v26  ;;  %v4878_v26 = vcombine.high %v530_v18, %v534_v19 }
 0x181   : > { %2228 = vmatprep.subr.bf16.mxu0 %v4890_v37  ;;  %2269 = vmatprep.subr.bf16.mxu1 %v4892_v38  ;;  %v4947_v37 = vcombine.low %v601_v27, %v605_v28  ;;  %v4954_v38 = vcombine.high %v608_v33, %v612_v34  ;;  %v4956_v39 = vcombine.high %v609_v35, %v613_v36  ;;  %v538_v28 = vld [vmem:[#allocation11 + $0x90] sm:$0xff] }
 0x184   : > { %2229 = vmatpush1.bf16.msra.mxu0 %v4889_v58  ;;  %2270 = vmatpush1.bf16.msra.mxu1 %v4891_v43  ;;  %v621_v58 = vld [vmem:[#allocation11 + $0x328] sm:$0xff]  ;;  %v4953_v43 = vcombine.low %v608_v33, %v612_v34 }
 0x185   : > { %2230 = vmatprep.subr.bf16.mxu0 %v4898_v44  ;;  %2271 = vmatprep.subr.bf16.mxu1 %v4900_v45  ;;  %v4955_v44 = vcombine.low %v609_v35, %v613_v36  ;;  %v4962_v45 = vcombine.high %v616_v40, %v620_v41  ;;  %v4964_v46 = vcombine.high %v617_v42, %v621_v58  ;;  %v546_v36 = vld [vmem:[#allocation11 + $0xd0] sm:$0xff] }
 0x188   : > { %2231 = vmatpush1.bf16.msra.mxu0 %v4897_v50  ;;  %2272 = vmatpush1.bf16.msra.mxu1 %v4899_v51  ;;  %v629_v50 = vld [vmem:[#allocation11 + $0x368] sm:$0xff]  ;;  %v4961_v51 = vcombine.low %v616_v40, %v620_v41 }
 0x189   : > { %2232 = vmatprep.subr.bf16.mxu0 %v4906_v52  ;;  %2273 = vmatprep.subr.bf16.mxu1 %v4908_v53  ;;  %v4963_v52 = vcombine.low %v617_v42, %v621_v58  ;;  %v4970_v53 = vcombine.high %v624_v47, %v628_v48  ;;  %v4972_v54 = vcombine.high %v625_v49, %v629_v50  ;;  %v554_v58 = vld [vmem:[#allocation11 + $0x110] sm:$0xff] }
 0x18c   : > { %2233 = vmatpush1.bf16.msra.mxu0 %v4905_v59  ;;  %2274 = vmatpush1.bf16.msra.mxu1 %v4907_v60  ;;  %v637_v59 = vld [vmem:[#allocation11 + $0x3a8] sm:$0xff]  ;;  %v4969_v60 = vcombine.low %v624_v47, %v628_v48 }
 0x18d   : > { %2234 = vmatprep.subr.bf16.mxu0 %v4914_v61  ;;  %2275 = vmatprep.subr.bf16.mxu1 %v4916_v62  ;;  %v4971_v61 = vcombine.low %v625_v49, %v629_v50  ;;  %v4978_v62 = vcombine.high %v632_v55, %v636_v56  ;;  %v4980_v63 = vcombine.high %v633_v57, %v637_v59  ;;  %v562_v49 = vld [vmem:[#allocation11 + $0x150] sm:$0xff] }
 0x18e   : > { %v566_v50 = vld [vmem:[#allocation11 + $0x170] sm:$0xff] }
 0x190   : > { %2235 = vmatpush1.bf16.msra.mxu0 %v4913_v3  ;;  %2276 = vmatpush1.bf16.msra.mxu1 %v4915_v4  ;;  %v645_v3 = vld [vmem:[#allocation11 + $0x3e8] sm:$0xff]  ;;  %v4977_v4 = vcombine.low %v632_v55, %v636_v56  ;;  %v4910_v55 = vcombine.high %v562_v49, %v566_v50 }
 0x191   : > { %2236 = vmatprep.subr.bf16.mxu0 %v4922_v5  ;;  %2277 = vmatprep.subr.bf16.mxu1 %v4924_v6  ;;  %v4979_v5 = vcombine.low %v633_v57, %v637_v59  ;;  %v4986_v6 = vcombine.high %v640_v0, %v644_v1  ;;  %v4988_v7 = vcombine.high %v641_v2, %v645_v3  ;;  %v570_v57 = vld [vmem:[#allocation11 + $0x190] sm:$0xff] }
 0x192   : > { %v574_v59 = vld [vmem:[#allocation11 + $0x1b0] sm:$0xff] }
 0x194   : > { %2237 = vmatpush1.bf16.msra.mxu0 %v4921_v11  ;;  %2278 = vmatpush1.bf16.msra.mxu1 %v4923_v12  ;;  %v527_v11 = vld [vmem:[#allocation11 + $0x38] sm:$0xff]  ;;  %v4985_v12 = vcombine.low %v640_v0, %v644_v1  ;;  %v4918_v0 = vcombine.high %v570_v57, %v574_v59 }
 0x195   : > { %2238 = vmatprep.subr.bf16.mxu0 %v4930_v14  ;;  %2279 = vmatprep.subr.bf16.mxu1 %v4932_v15  ;;  %v512_v14 = vld [vmem:[%s6179_s29] sm:$0xff]  ;;  %v4987_v15 = vcombine.low %v641_v2, %v645_v3  ;;  %v4872_v17 = vcombine.high %v523_v10, %v527_v11  ;;  %v4871_v24 = vcombine.low %v523_v10, %v527_v11  ;;  %s5646_s29 = scalar_lea.vmem %s4535_s5, 256 }
 0x196   : > { %v578_v2 = vld [vmem:[#allocation11 + $0x1d0] sm:$0xff]  ;;  %p5647_p13 = scmp.ne.s32.totalorder %s4535_s5, %s5646_s29 }
 0x197   : > { %v582_v3 = vld [vmem:[#allocation11 + $0x1f0] sm:$0xff] }
 0x198   : > { %2239 = vmatpush1.bf16.msra.mxu0 %v4929_v20  ;;  %2280 = vmatpush1.bf16.msra.mxu1 %v4931_v21  ;;  %v6233_v20 = vpack.c.bf16 %v512_v14, %v512_v14  ;;  %v531_v21 = vld [vmem:[#allocation11 + $0x58] sm:$0xff]  ;;  %v586_v10 = vld [vmem:[#allocation11 + $0x210] sm:$0xff]  ;;  %p5648_p9 = pnand %p5647_p13, %p6558_p7 }
 0x199   : > { %2240 = vmatprep.subr.bf16.mxu0 %v4938_v22  ;;  %2281 = vmatprep.subr.bf16.mxu1 %v4940_v23  ;;  %v535_v22 = vld [vmem:[#allocation11 + $0x78] sm:$0xff]  ;;  %v4869_v23 = vcombine.low %v522_v8, %v526_v9  ;;  %v4926_v8 = vcombine.high %v578_v2, %v582_v3  ;;  %v590_v11 = vld [vmem:[#allocation11 + $0x230] sm:$0xff] }
 0x19a   : > { %v4880_v27 = vcombine.high %v531_v21, %v535_v22  ;;  %v4879_v33 = vcombine.low %v531_v21, %v535_v22  ;;  %v591_v14 = vld [vmem:[#allocation11 + $0x238] sm:$0xff]  ;;  %v598_v21 = vld [vmem:[#allocation11 + $0x270] sm:$0xff]  ;;  %p5649_p3 = pneg %p5648_p9 }
 0x19b   : > { %v595_v22 = vld [vmem:[#allocation11 + $0x258] sm:$0xff] }
 0x19c   : > { %2241 = vmatpush1.bf16.msra.mxu0 %v4937_v29  ;;  %2282 = vmatpush1.bf16.msra.mxu1 %v4939_v30  ;;  %v542_v29 = vld [vmem:[#allocation11 + $0xb0] sm:$0xff]  ;;  %v539_v30 = vld [vmem:[#allocation11 + $0x98] sm:$0xff] }
 0x19d   : > { %2242 = vmatprep.subr.bf16.mxu0 %v4946_v31  ;;  %2283 = vmatprep.subr.bf16.mxu1 %v4948_v32  ;;  %v543_v31 = vld [vmem:[#allocation11 + $0xb8] sm:$0xff]  ;;  %v4877_v32 = vcombine.low %v530_v18, %v534_v19  ;;  %v4886_v34 = vcombine.high %v538_v28, %v542_v29  ;;  %v594_v19 = vld [vmem:[#allocation11 + $0x250] sm:$0xff] }
 0x19e   : > { %v4888_v35 = vcombine.high %v539_v30, %v543_v31  ;;  %v4887_v40 = vcombine.low %v539_v30, %v543_v31  ;;  %v606_v30 = vld [vmem:[#allocation11 + $0x2b0] sm:$0xff]  ;;  %v502_v31 = vld [vmem:[%s6555_s25] sm:$0xff]  ;;  %s6385_s25 = scalar_lea.hbm %s6557_s8, %s5271_s23 }
 0x1a0   : > { %2243 = vmatpush1.bf16.msra.mxu0 %v4945_v13  ;;  %2284 = vmatpush1.bf16.msra.mxu1 %v4947_v37  ;;  %v550_v13 = vld [vmem:[#allocation11 + $0xf0] sm:$0xff]  ;;  %v547_v37 = vld [vmem:[#allocation11 + $0xd8] sm:$0xff] }
 0x1a1   : > { %2244 = vmatprep.subr.bf16.mxu0 %v4954_v38  ;;  %2285 = vmatprep.subr.bf16.mxu1 %v4956_v39  ;;  %v551_v38 = vld [vmem:[#allocation11 + $0xf8] sm:$0xff]  ;;  %v4885_v39 = vcombine.low %v538_v28, %v542_v29  ;;  %v4894_v41 = vcombine.high %v546_v36, %v550_v13  ;;  %v602_v29 = vld [vmem:[#allocation11 + $0x290] sm:$0xff] }
 0x1a2   : > { %v4896_v42 = vcombine.high %v547_v37, %v551_v38  ;;  %v4895_v47 = vcombine.low %v547_v37, %v551_v38 }
 0x1a4   : > { %2245 = vmatpush1.bf16.msra.mxu0 %v4953_v43  ;;  %2286 = vmatpush1.bf16.msra.mxu1 %v4955_v44  ;;  %v558_v43 = vld [vmem:[#allocation11 + $0x130] sm:$0xff]  ;;  %v555_v44 = vld [vmem:[#allocation11 + $0x118] sm:$0xff] }
 0x1a5   : > { %2246 = vmatprep.subr.bf16.mxu0 %v4962_v45  ;;  %2287 = vmatprep.subr.bf16.mxu1 %v4964_v46  ;;  %v559_v45 = vld [vmem:[#allocation11 + $0x138] sm:$0xff]  ;;  %v4893_v46 = vcombine.low %v546_v36, %v550_v13  ;;  %v4902_v48 = vcombine.high %v554_v58, %v558_v43  ;;  %v4941_v36 = vcombine.low %v594_v19, %v598_v21  ;;  %v5795_v13 = vmov 0.0  }
 0x1a8   : > { %2247 = vmatpush1.bf16.msra.mxu0 %v4961_v51  ;;  %2288 = vmatpush1.bf16.msra.mxu1 %v4963_v52  ;;  %v563_v51 = vld [vmem:[#allocation11 + $0x158] sm:$0xff] }
 0x1a9   : > { %2248 = vmatprep.subr.bf16.mxu0 %v4970_v53  ;;  %2289 = vmatprep.subr.bf16.mxu1 %v4972_v54  ;;  %v567_v52 = vld [vmem:[#allocation11 + $0x178] sm:$0xff]  ;;  %v4901_v53 = vcombine.low %v554_v58, %v558_v43  ;;  %v4903_v54 = vcombine.low %v555_v44, %v559_v45  ;;  %v614_v58 = vld [vmem:[#allocation11 + $0x2f0] sm:$0xff]  ;;  %v5796_v43 = vmov 0  }
 0x1aa   : > { %v4912_v56 = vcombine.high %v563_v51, %v567_v52  ;;  %5399 = vset.pattern.permute.xlu0 %v5796_v43  ;;  %5405 = vset.pattern.permute.xlu1 %v5796_v43  ;;  %v2666_v43 = vld [vmem:[#allocation15 + $0xa8] sm:$0xff] }
 0x1ac   : > { %2249 = vmatpush1.bf16.msra.mxu0 %v4969_v60  ;;  %2290 = vmatpush1.bf16.msra.mxu1 %v4971_v61  ;;  %v571_v60 = vld [vmem:[#allocation11 + $0x198] sm:$0xff] }
 0x1ad   : > { %2250 = vmatprep.subr.bf16.mxu0 %v4978_v62  ;;  %2291 = vmatprep.subr.bf16.mxu1 %v4980_v63  ;;  %v575_v61 = vld [vmem:[#allocation11 + $0x1b8] sm:$0xff]  ;;  %v4909_v62 = vcombine.low %v562_v49, %v566_v50  ;;  %v4911_v63 = vcombine.low %v563_v51, %v567_v52  ;;  %v618_v51 = vld [vmem:[#allocation11 + $0x310] sm:$0xff] }
 0x1ae   : > { %v4920_v1 = vcombine.high %v571_v60, %v575_v61  ;;  %v622_v52 = vld [vmem:[#allocation11 + $0x330] sm:$0xff] }
 0x1b0   : > { %2251 = vmatpush1.bf16.msra.mxu0 %v4977_v4  ;;  %2292 = vmatpush1.bf16.msra.mxu1 %v4979_v5  ;;  %v579_v4 = vld [vmem:[#allocation11 + $0x1d8] sm:$0xff] }
 0x1b1   : > { %2252 = vmatprep.subr.bf16.mxu0 %v4986_v6  ;;  %2293 = vmatprep.subr.bf16.mxu1 %v4988_v7  ;;  %v583_v5 = vld [vmem:[#allocation11 + $0x1f8] sm:$0xff]  ;;  %v4917_v6 = vcombine.low %v570_v57, %v574_v59  ;;  %v4919_v7 = vcombine.low %v571_v60, %v575_v61  ;;  %v4966_v57 = vcombine.high %v618_v51, %v622_v52  ;;  %v626_v60 = vld [vmem:[#allocation11 + $0x350] sm:$0xff] }
 0x1b2   : > { %v4928_v9 = vcombine.high %v579_v4, %v583_v5  ;;  %v630_v61 = vld [vmem:[#allocation11 + $0x370] sm:$0xff] }
 0x1b4   : > { %2253 = vmatpush1.bf16.msra.mxu0 %v4985_v12  ;;  %2294 = vmatpush1.bf16.msra.mxu1 %v4987_v15  ;;  %v587_v12 = vld [vmem:[#allocation11 + $0x218] sm:$0xff]  ;;  %v4925_v15 = vcombine.low %v578_v2, %v582_v3  ;;  %v4974_v2 = vcombine.high %v626_v60, %v630_v61 }
 0x1b5   : > { %2304 = vmatprep.subr.bf16.mxu0 %v4870_v16  ;;  %2345 = vmatprep.subr.bf16.mxu1 %v4872_v17  ;;  %v4927_v16 = vcombine.low %v579_v4, %v583_v5  ;;  %v4934_v17 = vcombine.high %v586_v10, %v590_v11  ;;  %v4936_v18 = vcombine.high %v587_v12, %v591_v14  ;;  %v634_v4 = vld [vmem:[#allocation11 + $0x390] sm:$0xff] }
 0x1b6   : > { %v638_v5 = vld [vmem:[#allocation11 + $0x3b0] sm:$0xff] }
 0x1b7   : > { %2255 = vmatmul.mubr.bf16.vlgmr.msra.gmra.mrb[8].mxu0 %v6233_v20  ;;  %2296 = vmatmul.mubr.bf16.vlgmr.msra.gmra.mrb[8].mxu1 %v6233_v20 }
 0x1b8   : > { %2305 = vmatpush1.bf16.msra.mxu0 %v4869_v23  ;;  %2346 = vmatpush1.bf16.msra.mxu1 %v4871_v24  ;;  %v599_v23 = vld [vmem:[#allocation11 + $0x278] sm:$0xff]  ;;  %v4933_v24 = vcombine.low %v586_v10, %v590_v11  ;;  %v4982_v10 = vcombine.high %v634_v4, %v638_v5 }
 0x1b9   : > { %2306 = vmatprep.subr.bf16.mxu0 %v4878_v26  ;;  %2347 = vmatprep.subr.bf16.mxu1 %v4880_v27  ;;  %v4935_v26 = vcombine.low %v587_v12, %v591_v14  ;;  %v4942_v27 = vcombine.high %v594_v19, %v598_v21  ;;  %v4944_v28 = vcombine.high %v595_v22, %v599_v23  ;;  %v642_v12 = vld [vmem:[#allocation11 + $0x3d0] sm:$0xff] }
 0x1ba   : > { %2336 = vmatprep.mubr.bf16.mxu0 %v6226_v25  ;;  %2377 = vmatprep.mubr.bf16.mxu1 %v6226_v25  ;;  %v4904_v25 = vcombine.high %v555_v44, %v559_v45  ;;  %v4943_v38 = vcombine.low %v595_v22, %v599_v23  ;;  %v611_v45 = vld [vmem:[#allocation11 + $0x2d8] sm:$0xff]  ;;  %v646_v14 = vld [vmem:[#allocation11 + $0x3f0] sm:$0xff]  ;;  %v2645_v22 = vld [vmem:[#allocation15] sm:$0xff] }
 0x1bb   : > { %v4990_v19 = vcombine.high %v642_v12, %v646_v14  ;;  %v2649_v23 = vld [vmem:[#allocation15 + $0x20] sm:$0xff] }
 0x1bc   : > { %2307 = vmatpush1.bf16.msra.mxu0 %v4877_v32  ;;  %2348 = vmatpush1.bf16.msra.mxu1 %v4879_v33  ;;  %v503_v32 = vstv %s5890_s22  ;;  %v508_v33 = vstv %s6515_s0 }
 0x1bd   : > { %2308 = vmatprep.subr.bf16.mxu0 %v4886_v34  ;;  %2349 = vmatprep.subr.bf16.mxu1 %v4888_v35  ;;  %v603_v34 = vld [vmem:[#allocation11 + $0x298] sm:$0xff]  ;;  %vm504_vm0 = vcmp.gt.s32.totalorder %v502_v31, %v503_v32  ;;  %vm509_vm1 = vcmp.gt.s32.totalorder %v502_v31, %v508_v33  ;;  %v2653_v31 = vld [vmem:[#allocation15 + $0x40] sm:$0xff]  ;;  %v2654_v33 = vld [vmem:[#allocation15 + $0x48] sm:$0xff] }
 0x1be   : > { %v607_v35 = vld [vmem:[#allocation11 + $0x2b8] sm:$0xff]  ;;  %v4735_v37 = vsel %vm504_vm0, 1.0, %v5795_v13  ;;  %v2657_v32 = vld [vmem:[#allocation15 + $0x60] sm:$0xff] }
 0x1c0   : > { %2309 = vmatpush1.bf16.msra.mxu0 %v4885_v39  ;;  %2350 = vmatpush1.bf16.msra.mxu1 %v4887_v40  ;;  %v4950_v39 = vcombine.high %v602_v29, %v606_v30  ;;  %v6246_v40 = vsel %vm509_vm1, 1.0, %v5795_v13 }
 0x1c1   : > { %2310 = vmatprep.subr.bf16.mxu0 %v4894_v41  ;;  %2351 = vmatprep.subr.bf16.mxu1 %v4896_v42  ;;  %v4952_v41 = vcombine.high %v603_v34, %v607_v35  ;;  %v610_v42 = vld [vmem:[#allocation11 + $0x2d0] sm:$0xff]  ;;  %v5400_v44 = vpack.i.bf16 %v6246_v40, %v4735_v37 }
 0x1c2   : > { %v4958_v49 = vcombine.high %v610_v42, %v614_v58 }
 0x1c3   : > { %5401 = vperm.xlu0 %5399, %v5400_v44   ;;  %v5007_v44 = vcombine.low %v2653_v31, %v2657_v32 }
 0x1c4   : > { %2311 = vmatpush1.bf16.msra.mxu0 %v4893_v46  ;;  %2352 = vmatpush1.bf16.msra.mxu1 %v4895_v47  ;;  %v615_v46 = vld [vmem:[#allocation11 + $0x2f8] sm:$0xff]  ;;  %v4949_v47 = vcombine.low %v602_v29, %v606_v30  ;;  %v5000_v29 = vcombine.high %v2645_v22, %v2649_v23 }
 0x1c5   : > { %2312 = vmatprep.subr.bf16.mxu0 %v4902_v48  ;;  %2353 = vmatprep.subr.bf16.mxu1 %v4904_v25  ;;  %v2491_v48 = vsub.f32 1.0, %v4735_v37  ;;  %v4951_v25 = vcombine.low %v603_v34, %v607_v35  ;;  %v4960_v50 = vcombine.high %v611_v45, %v615_v46  ;;  %v2658_v34 = vld [vmem:[#allocation15 + $0x68] sm:$0xff]  ;;  %v5008_v37 = vcombine.high %v2653_v31, %v2657_v32 }
 0x1c6   : > { %v2510_v35 = vld [vmem:[#allocation4 + $0x8] sm:$0xff] }
 0x1c7   : > { %2494 = vperm.xlu0 %5399, %v2491_v48   ;;  %v2669_v48 = vld [vmem:[#allocation15 + $0xc0] sm:$0xff] }
 0x1c8   : > { %2313 = vmatpush1.bf16.msra.mxu0 %v4901_v53  ;;  %2354 = vmatpush1.bf16.msra.mxu1 %v4903_v54  ;;  %v619_v53 = vld [vmem:[#allocation11 + $0x318] sm:$0xff] }
 0x1c9   : > { %2314 = vmatprep.subr.bf16.mxu0 %v4910_v55  ;;  %2355 = vmatprep.subr.bf16.mxu1 %v4912_v56  ;;  %v623_v54 = vld [vmem:[#allocation11 + $0x338] sm:$0xff]  ;;  %v4957_v55 = vcombine.low %v610_v42, %v614_v58  ;;  %v4959_v56 = vcombine.low %v611_v45, %v615_v46  ;;  %v6249_v42 = vpack.c.bf16 %v2510_v35, %v2510_v35  ;;  %v2662_v58 = vld [vmem:[#allocation15 + $0x88] sm:$0xff]  ;;  %v2713_v35 = vld [vmem:[#allocation15 + $0x220] sm:$0xff] }
 0x1ca   : > { %v4968_v59 = vcombine.high %v619_v53, %v623_v54  ;;  %v5009_v45 = vcombine.low %v2654_v33, %v2658_v34 }
 0x1cc   : > { %2315 = vmatpush1.bf16.msra.mxu0 %v4909_v62  ;;  %2356 = vmatpush1.bf16.msra.mxu1 %v4911_v63  ;;  %v627_v62 = vld [vmem:[#allocation11 + $0x358] sm:$0xff] }
 0x1cd   : > { %2316 = vmatprep.subr.bf16.mxu0 %v4918_v0  ;;  %2357 = vmatprep.subr.bf16.mxu1 %v4920_v1  ;;  %v631_v63 = vld [vmem:[#allocation11 + $0x378] sm:$0xff]  ;;  %v4965_v0 = vcombine.low %v618_v51, %v622_v52  ;;  %v4967_v1 = vcombine.low %v619_v53, %v623_v54  ;;  %v2677_v54 = vld [vmem:[#allocation15 + $0x100] sm:$0xff] }
 0x1ce   : > { %v4976_v3 = vcombine.high %v627_v62, %v631_v63 }
 0x1d0   : > { %2317 = vmatpush1.bf16.msra.mxu0 %v4917_v6  ;;  %2358 = vmatpush1.bf16.msra.mxu1 %v4919_v7  ;;  %v635_v6 = vld [vmem:[#allocation11 + $0x398] sm:$0xff] }
 0x1d1   : > { %2318 = vmatprep.subr.bf16.mxu0 %v4926_v8  ;;  %2359 = vmatprep.subr.bf16.mxu1 %v4928_v9  ;;  %v639_v7 = vld [vmem:[#allocation11 + $0x3b8] sm:$0xff]  ;;  %v4973_v8 = vcombine.low %v626_v60, %v630_v61  ;;  %v4975_v9 = vcombine.low %v627_v62, %v631_v63  ;;  %v2685_v63 = vld [vmem:[#allocation15 + $0x140] sm:$0xff] }
 0x1d2   : > { %v4984_v11 = vcombine.high %v635_v6, %v639_v7 }
 0x1d4   : > { %2319 = vmatpush1.bf16.msra.mxu0 %v4925_v15  ;;  %2360 = vmatpush1.bf16.msra.mxu1 %v4927_v16  ;;  %v643_v15 = vld [vmem:[#allocation11 + $0x3d8] sm:$0xff] }
 0x1d5   : > { %2320 = vmatprep.subr.bf16.mxu0 %v4934_v17  ;;  %2361 = vmatprep.subr.bf16.mxu1 %v4936_v18  ;;  %v647_v16 = vld [vmem:[#allocation11 + $0x3f8] sm:$0xff]  ;;  %v4981_v17 = vcombine.low %v634_v4, %v638_v5  ;;  %v4983_v18 = vcombine.low %v635_v6, %v639_v7  ;;  %v2693_v7 = vld [vmem:[#allocation15 + $0x180] sm:$0xff] }
 0x1d6   : > { %v4992_v21 = vcombine.high %v643_v15, %v647_v16 }
 0x1d8   : > { %2321 = vmatpush1.bf16.msra.mxu0 %v4933_v24  ;;  %2362 = vmatpush1.bf16.msra.mxu1 %v4935_v26  ;;  %v2646_v24 = vld [vmem:[#allocation15 + $0x8] sm:$0xff] }
 0x1d9   : > { %2322 = vmatprep.subr.bf16.mxu0 %v4942_v27  ;;  %2363 = vmatprep.subr.bf16.mxu1 %v4944_v28  ;;  %v2650_v26 = vld [vmem:[#allocation15 + $0x28] sm:$0xff]  ;;  %v4989_v27 = vcombine.low %v642_v12, %v646_v14  ;;  %v4991_v28 = vcombine.low %v643_v15, %v647_v16 }
 0x1da   : > { %v5002_v30 = vcombine.high %v2646_v24, %v2650_v26  ;;  %v5001_v13 = vcombine.low %v2646_v24, %v2650_v26 }
 0x1dc   : > { %2323 = vmatpush1.bf16.msra.mxu0 %v4941_v36  ;;  %2364 = vmatpush1.bf16.msra.mxu1 %v4943_v38  ;;  %v4999_v36 = vcombine.low %v2645_v22, %v2649_v23  ;;  %v5010_v38 = vcombine.high %v2654_v33, %v2658_v34  ;;  %v2702_v22 = vld [vmem:[#allocation15 + $0x1c8] sm:$0xff]  ;;  %v2709_v34 = vld [vmem:[#allocation15 + $0x200] sm:$0xff] }
 0x1dd   : > { %2324 = vmatprep.subr.bf16.mxu0 %v4950_v39  ;;  %2365 = vmatprep.subr.bf16.mxu1 %v4952_v41  ;;  %v2661_v39 = vld [vmem:[#allocation15 + $0x80] sm:$0xff]  ;;  %v2706_v23 = vld [vmem:[#allocation15 + $0x1e8] sm:$0xff] }
 0x1de   : > { %v2665_v41 = vld [vmem:[#allocation15 + $0xa0] sm:$0xff]  ;;  %v5058_v33 = vcombine.high %v2702_v22, %v2706_v23 }
 0x1df   : > { %v5016_v46 = vcombine.high %v2661_v39, %v2665_v41  ;;  %v5015_v51 = vcombine.low %v2661_v39, %v2665_v41  ;;  %v5064_v39 = vcombine.high %v2709_v34, %v2713_v35 }
 0x1e0   : > { %2325 = vmatpush1.bf16.msra.mxu0 %v4949_v47  ;;  %2366 = vmatpush1.bf16.msra.mxu1 %v4951_v25  ;;  %v5018_v47 = vcombine.high %v2662_v58, %v2666_v43  ;;  %v2673_v25 = vld [vmem:[#allocation15 + $0xe0] sm:$0xff] }
 0x1e1   : > { %2326 = vmatprep.subr.bf16.mxu0 %v4958_v49  ;;  %2367 = vmatprep.subr.bf16.mxu1 %v4960_v50  ;;  %v2670_v49 = vld [vmem:[#allocation15 + $0xc8] sm:$0xff]  ;;  %v5024_v52 = vcombine.high %v2669_v48, %v2673_v25 }
 0x1e2   : > { %v2674_v50 = vld [vmem:[#allocation15 + $0xe8] sm:$0xff] }
 0x1e3   : > { %v5026_v53 = vcombine.high %v2670_v49, %v2674_v50  ;;  %v5025_v60 = vcombine.low %v2670_v49, %v2674_v50  ;;  %v2725_v49 = vld [vmem:[#allocation15 + $0x280] sm:$0xff] }
 0x1e4   : > { %2327 = vmatpush1.bf16.msra.mxu0 %v4957_v55  ;;  %2368 = vmatpush1.bf16.msra.mxu1 %v4959_v56  ;;  %v2681_v55 = vld [vmem:[#allocation15 + $0x120] sm:$0xff]  ;;  %v2678_v56 = vld [vmem:[#allocation15 + $0x108] sm:$0xff] }
 0x1e5   : > { %2328 = vmatprep.subr.bf16.mxu0 %v4966_v57  ;;  %2369 = vmatprep.subr.bf16.mxu1 %v4968_v59  ;;  %v2682_v57 = vld [vmem:[#allocation15 + $0x128] sm:$0xff]  ;;  %v5023_v59 = vcombine.low %v2669_v48, %v2673_v25  ;;  %v5032_v61 = vcombine.high %v2677_v54, %v2681_v55  ;;  %v2729_v50 = vld [vmem:[#allocation15 + $0x2a0] sm:$0xff] }
 0x1e6   : > { %v5034_v62 = vcombine.high %v2678_v56, %v2682_v57  ;;  %v5033_v4 = vcombine.low %v2678_v56, %v2682_v57  ;;  %v2733_v56 = vld [vmem:[#allocation15 + $0x2c0] sm:$0xff] }
 0x1e7   : > { %v2737_v57 = vld [vmem:[#allocation15 + $0x2e0] sm:$0xff] }
 0x1e8   : > { %2329 = vmatpush1.bf16.msra.mxu0 %v4965_v0  ;;  %2370 = vmatpush1.bf16.msra.mxu1 %v4967_v1  ;;  %v2689_v0 = vld [vmem:[#allocation15 + $0x160] sm:$0xff]  ;;  %v2686_v1 = vld [vmem:[#allocation15 + $0x148] sm:$0xff] }
 0x1e9   : > { %2330 = vmatprep.subr.bf16.mxu0 %v4974_v2  ;;  %2371 = vmatprep.subr.bf16.mxu1 %v4976_v3  ;;  %v2690_v2 = vld [vmem:[#allocation15 + $0x168] sm:$0xff]  ;;  %v5031_v3 = vcombine.low %v2677_v54, %v2681_v55  ;;  %v5040_v5 = vcombine.high %v2685_v63, %v2689_v0  ;;  %v5080_v54 = vcombine.high %v2725_v49, %v2729_v50 }
 0x1ea   : > { %v5042_v6 = vcombine.high %v2686_v1, %v2690_v2  ;;  %v5041_v12 = vcombine.low %v2686_v1, %v2690_v2  ;;  %v2741_v1 = vld [vmem:[#allocation15 + $0x300] sm:$0xff] }
 0x1eb   : > { %v2745_v2 = vld [vmem:[#allocation15 + $0x320] sm:$0xff] }
 0x1ec   : > { %2331 = vmatpush1.bf16.msra.mxu0 %v4973_v8  ;;  %2372 = vmatpush1.bf16.msra.mxu1 %v4975_v9  ;;  %v2697_v8 = vld [vmem:[#allocation15 + $0x1a0] sm:$0xff]  ;;  %v2694_v9 = vld [vmem:[#allocation15 + $0x188] sm:$0xff] }
 0x1ed   : > { %2332 = vmatprep.subr.bf16.mxu0 %v4982_v10  ;;  %2373 = vmatprep.subr.bf16.mxu1 %v4984_v11  ;;  %v2698_v10 = vld [vmem:[#allocation15 + $0x1a8] sm:$0xff]  ;;  %v5039_v11 = vcombine.low %v2685_v63, %v2689_v0  ;;  %v5048_v14 = vcombine.high %v2693_v7, %v2697_v8  ;;  %v5088_v63 = vcombine.high %v2733_v56, %v2737_v57 }
 0x1ee   : > { %v5050_v16 = vcombine.high %v2694_v9, %v2698_v10 }
 0x1f0   : > { %2333 = vmatpush1.bf16.msra.mxu0 %v4981_v17  ;;  %2374 = vmatpush1.bf16.msra.mxu1 %v4983_v18  ;;  %v2701_v17 = vld [vmem:[#allocation15 + $0x1c0] sm:$0xff] }
 0x1f1   : > { %2334 = vmatprep.subr.bf16.mxu0 %v4990_v19  ;;  %2375 = vmatprep.subr.bf16.mxu1 %v4992_v21  ;;  %v2705_v18 = vld [vmem:[#allocation15 + $0x1e0] sm:$0xff] }
 0x1f2   : > { %v5056_v31 = vcombine.high %v2701_v17, %v2705_v18 }
 0x1f4   : > { %2335 = vmatpush1.bf16.msra.mxu0 %v4989_v27  ;;  %2376 = vmatpush1.bf16.msra.mxu1 %v4991_v28  ;;  %v5047_v27 = vcombine.low %v2693_v7, %v2697_v8  ;;  %v5096_v7 = vcombine.high %v2741_v1, %v2745_v2 }
 0x1f5   : > { %3413 = vmatprep.subr.bf16.mxu0 %v5000_v29  ;;  %3454 = vmatprep.subr.bf16.mxu1 %v5002_v30  ;;  %v5049_v30 = vcombine.low %v2694_v9, %v2698_v10  ;;  %v2749_v9 = vld [vmem:[#allocation15 + $0x340] sm:$0xff] }
 0x1f6   : > { %v2753_v10 = vld [vmem:[#allocation15 + $0x360] sm:$0xff] }
 0x1f7   : > { %2337 = vmatmul.mubr.bf16.vlgmr.msra.gmra.mrb[12].mxu0 %v6233_v20  ;;  %2378 = vmatmul.mubr.bf16.vlgmr.msra.gmra.mrb[12].mxu1 %v6233_v20  ;;  %v5017_v20 = vcombine.low %v2662_v58, %v2666_v43  ;;  %v2717_v58 = vld [vmem:[#allocation15 + $0x240] sm:$0xff] }
 0x1f8   : > { %3414 = vmatpush1.bf16.msra.mxu0 %v4999_v36  ;;  %3455 = vmatpush1.bf16.msra.mxu1 %v5001_v13  ;;  %v2710_v36 = vld [vmem:[#allocation15 + $0x208] sm:$0xff]  ;;  %v2721_v43 = vld [vmem:[#allocation15 + $0x260] sm:$0xff] }
 0x1f9   : > { %3415 = vmatprep.subr.bf16.mxu0 %v5008_v37  ;;  %3456 = vmatprep.subr.bf16.mxu1 %v5010_v38  ;;  %v2714_v13 = vld [vmem:[#allocation15 + $0x228] sm:$0xff]  ;;  %v5055_v37 = vcombine.low %v2701_v17, %v2705_v18  ;;  %v5057_v38 = vcombine.low %v2702_v22, %v2706_v23  ;;  %v5072_v48 = vcombine.high %v2717_v58, %v2721_v43  ;;  %v2757_v22 = vld [vmem:[#allocation15 + $0x380] sm:$0xff] }
 0x1fa   : > { %3445 = vmatprep.mubr.bf16.mxu0 %v6249_v42  ;;  %3486 = vmatprep.mubr.bf16.mxu1 %v6249_v42  ;;  %v5066_v41 = vcombine.high %v2710_v36, %v2714_v13  ;;  %v5104_v17 = vcombine.high %v2749_v9, %v2753_v10  ;;  %v2761_v23 = vld [vmem:[#allocation15 + $0x3a0] sm:$0xff] }
 0x1fc   : > { %3416 = vmatpush1.bf16.msra.mxu0 %v5007_v44  ;;  %3457 = vmatpush1.bf16.msra.mxu1 %v5009_v45  ;;  %v2718_v44 = vld [vmem:[#allocation15 + $0x248] sm:$0xff] }
 0x1fd   : > { %3417 = vmatprep.subr.bf16.mxu0 %v5016_v46  ;;  %3458 = vmatprep.subr.bf16.mxu1 %v5018_v47  ;;  %v2722_v45 = vld [vmem:[#allocation15 + $0x268] sm:$0xff]  ;;  %v5063_v46 = vcombine.low %v2709_v34, %v2713_v35  ;;  %v5065_v47 = vcombine.low %v2710_v36, %v2714_v13  ;;  %v5111_v36 = vcombine.low %v2757_v22, %v2761_v23 }
 0x1fe   : > { %v5074_v25 = vcombine.high %v2718_v44, %v2722_v45  ;;  %v2766_v34 = vld [vmem:[#allocation15 + $0x3c8] sm:$0xff] }
 0x1ff   : > { %v2770_v35 = vld [vmem:[#allocation15 + $0x3e8] sm:$0xff] }
 0x200   : > { %3418 = vmatpush1.bf16.msra.mxu0 %v5015_v51  ;;  %3459 = vmatpush1.bf16.msra.mxu1 %v5017_v20  ;;  %v2726_v51 = vld [vmem:[#allocation15 + $0x288] sm:$0xff] }
 0x201   : > { %3419 = vmatprep.subr.bf16.mxu0 %v5024_v52  ;;  %3460 = vmatprep.subr.bf16.mxu1 %v5026_v53  ;;  %v2730_v20 = vld [vmem:[#allocation15 + $0x2a8] sm:$0xff]  ;;  %v5071_v52 = vcombine.low %v2717_v58, %v2721_v43  ;;  %v5073_v53 = vcombine.low %v2718_v44, %v2722_v45  ;;  %v2648_v58 = vld [vmem:[#allocation15 + $0x18] sm:$0xff]  ;;  %v2509_v45 = vld [vmem:[#allocation4] sm:$0xff] }
 0x202   : > { %v5082_v55 = vcombine.high %v2726_v51, %v2730_v20  ;;  %v2652_v43 = vld [vmem:[#allocation15 + $0x38] sm:$0xff] }
 0x204   : > { %3420 = vmatpush1.bf16.msra.mxu0 %v5023_v59  ;;  %3461 = vmatpush1.bf16.msra.mxu1 %v5025_v60  ;;  %v2734_v59 = vld [vmem:[#allocation15 + $0x2c8] sm:$0xff] }
 0x205   : > { %3421 = vmatprep.subr.bf16.mxu0 %v5032_v61  ;;  %3462 = vmatprep.subr.bf16.mxu1 %v5034_v62  ;;  %v2738_v60 = vld [vmem:[#allocation15 + $0x2e8] sm:$0xff]  ;;  %v5079_v61 = vcombine.low %v2725_v49, %v2729_v50  ;;  %v5081_v62 = vcombine.low %v2726_v51, %v2730_v20  ;;  %v2659_v49 = vld [vmem:[#allocation15 + $0x70] sm:$0xff]  ;;  %v6263_v50 = vpack.c.bf16 %v2509_v45, %v2509_v45  ;;  %v2656_v51 = vld [vmem:[#allocation15 + $0x58] sm:$0xff] }
 0x206   : > { %v5090_v0 = vcombine.high %v2734_v59, %v2738_v60  ;;  %v2660_v20 = vld [vmem:[#allocation15 + $0x78] sm:$0xff] }
 0x207   : > { %v2708_v45 = vld [vmem:[#allocation15 + $0x1f8] sm:$0xff] }
 0x208   : > { %3422 = vmatpush1.bf16.msra.mxu0 %v5031_v3  ;;  %3463 = vmatpush1.bf16.msra.mxu1 %v5033_v4  ;;  %v2742_v3 = vld [vmem:[#allocation15 + $0x308] sm:$0xff] }
 0x209   : > { %3423 = vmatprep.subr.bf16.mxu0 %v5040_v5  ;;  %3464 = vmatprep.subr.bf16.mxu1 %v5042_v6  ;;  %v2746_v4 = vld [vmem:[#allocation15 + $0x328] sm:$0xff]  ;;  %v5087_v5 = vcombine.low %v2733_v56, %v2737_v57  ;;  %v5089_v6 = vcombine.low %v2734_v59, %v2738_v60  ;;  %v2663_v56 = vld [vmem:[#allocation15 + $0x90] sm:$0xff]  ;;  %v2664_v59 = vld [vmem:[#allocation15 + $0x98] sm:$0xff] }
 0x20a   : > { %v6255_v15 = vpop.f32.mrb[0].mxu0  ;;  %v6257_v19 = vpop.f32.mrb[0].mxu1  ;;  %v5098_v8 = vcombine.high %v2742_v3, %v2746_v4  ;;  %v2667_v57 = vld [vmem:[#allocation15 + $0xb0] sm:$0xff]  ;;  %v2668_v60 = vld [vmem:[#allocation15 + $0xb8] sm:$0xff] }
 0x20b   : > { %v6259_v21 = vpop.f32.mrb[1].mxu0  ;;  %v6261_v24 = vpop.f32.mrb[1].mxu1 }
 0x20c   : > { %v1456_v26 = vpop.f32.mrb[2].mxu0  ;;  %3424 = vmatpush1.bf16.msra.mxu0 %v5039_v11  ;;  %v1497_v28 = vpop.f32.mrb[2].mxu1  ;;  %3465 = vmatpush1.bf16.msra.mxu1 %v5041_v12  ;;  %v2750_v11 = vld [vmem:[#allocation15 + $0x348] sm:$0xff] }
 0x20d   : > { %v1457_v29 = vpop.f32.mrb[3].mxu0  ;;  %3425 = vmatprep.subr.bf16.mxu0 %v5048_v14  ;;  %v1498_v32 = vpop.f32.mrb[3].mxu1  ;;  %3466 = vmatprep.subr.bf16.mxu1 %v5050_v16  ;;  %v2754_v12 = vld [vmem:[#allocation15 + $0x368] sm:$0xff]  ;;  %v5095_v14 = vcombine.low %v2741_v1, %v2745_v2  ;;  %v5097_v16 = vcombine.low %v2742_v3, %v2746_v4  ;;  %v5103_v28 = vcombine.low %v2749_v9, %v2753_v10  ;;  %v2671_v1 = vld [vmem:[#allocation15 + $0xd0] sm:$0xff]  ;;  %v2672_v3 = vld [vmem:[#allocation15 + $0xd8] sm:$0xff] }
 0x20e   : > { %v5106_v18 = vcombine.high %v2750_v11, %v2754_v12  ;;  %v2758_v26 = vld [vmem:[#allocation15 + $0x388] sm:$0xff]  ;;  %v5105_v29 = vcombine.low %v2750_v11, %v2754_v12  ;;  %v2765_v32 = vld [vmem:[#allocation15 + $0x3c0] sm:$0xff]  ;;  %v2675_v2 = vld [vmem:[#allocation15 + $0xf0] sm:$0xff] }
 0x20f   : > { %v2676_v4 = vld [vmem:[#allocation15 + $0xf8] sm:$0xff]  ;;  %v2679_v9 = vld [vmem:[#allocation15 + $0x110] sm:$0xff] }
 0x210   : > { %3426 = vmatpush1.bf16.msra.mxu0 %v5047_v27  ;;  %3467 = vmatpush1.bf16.msra.mxu1 %v5049_v30  ;;  %v2762_v27 = vld [vmem:[#allocation15 + $0x3a8] sm:$0xff]  ;;  %v5112_v30 = vcombine.high %v2757_v22, %v2761_v23  ;;  %v2683_v10 = vld [vmem:[#allocation15 + $0x130] sm:$0xff]  ;;  %v2680_v11 = vld [vmem:[#allocation15 + $0x118] sm:$0xff] }
 0x211   : > { %3427 = vmatprep.subr.bf16.mxu0 %v5056_v31  ;;  %3468 = vmatprep.subr.bf16.mxu1 %v5058_v33  ;;  %v5114_v31 = vcombine.high %v2758_v26, %v2762_v27  ;;  %v2769_v33 = vld [vmem:[#allocation15 + $0x3e0] sm:$0xff]  ;;  %v5113_v13 = vcombine.low %v2758_v26, %v2762_v27  ;;  %v2684_v12 = vld [vmem:[#allocation15 + $0x138] sm:$0xff]  ;;  %v2691_v22 = vld [vmem:[#allocation15 + $0x170] sm:$0xff]  ;;  %v5035_v27 = vcombine.low %v2679_v9, %v2683_v10 }
 0x212   : > { %v5119_v44 = vcombine.low %v2765_v32, %v2769_v33  ;;  %v2688_v23 = vld [vmem:[#allocation15 + $0x158] sm:$0xff] }
 0x213   : > { %v2692_v26 = vld [vmem:[#allocation15 + $0x178] sm:$0xff] }
 0x214   : > { %3428 = vmatpush1.bf16.msra.mxu0 %v5055_v37  ;;  %3469 = vmatpush1.bf16.msra.mxu1 %v5057_v38  ;;  %v5120_v37 = vcombine.high %v2765_v32, %v2769_v33  ;;  %v5122_v38 = vcombine.high %v2766_v34, %v2770_v35  ;;  %v2699_v32 = vld [vmem:[#allocation15 + $0x1b0] sm:$0xff]  ;;  %v2696_v33 = vld [vmem:[#allocation15 + $0x198] sm:$0xff] }
 0x215   : > { %3429 = vmatprep.subr.bf16.mxu0 %v5064_v39  ;;  %3470 = vmatprep.subr.bf16.mxu1 %v5066_v41  ;;  %v2647_v39 = vld [vmem:[#allocation15 + $0x10] sm:$0xff] }
 0x216   : > { %v2651_v41 = vld [vmem:[#allocation15 + $0x30] sm:$0xff] }
 0x218   : > { %3430 = vmatpush1.bf16.msra.mxu0 %v5063_v46  ;;  %3471 = vmatpush1.bf16.msra.mxu1 %v5065_v47  ;;  %v5121_v46 = vcombine.low %v2766_v34, %v2770_v35  ;;  %v5004_v47 = vcombine.high %v2647_v39, %v2651_v41  ;;  %v2700_v34 = vld [vmem:[#allocation15 + $0x1b8] sm:$0xff] }
 0x219   : > { %3431 = vmatprep.subr.bf16.mxu0 %v5072_v48  ;;  %3472 = vmatprep.subr.bf16.mxu1 %v5074_v25  ;;  %v5006_v48 = vcombine.high %v2648_v58, %v2652_v43  ;;  %v2655_v25 = vld [vmem:[#allocation15 + $0x50] sm:$0xff] }
 0x21c   : > { %3432 = vmatpush1.bf16.msra.mxu0 %v5071_v52  ;;  %3473 = vmatpush1.bf16.msra.mxu1 %v5073_v53  ;;  %v5003_v52 = vcombine.low %v2647_v39, %v2651_v41  ;;  %v5005_v53 = vcombine.low %v2648_v58, %v2652_v43  ;;  %v2703_v39 = vld [vmem:[#allocation15 + $0x1d0] sm:$0xff] }
 0x21d   : > { %3433 = vmatprep.subr.bf16.mxu0 %v5080_v54  ;;  %3474 = vmatprep.subr.bf16.mxu1 %v5082_v55  ;;  %v5012_v54 = vcombine.high %v2655_v25, %v2659_v49  ;;  %v5014_v55 = vcombine.high %v2656_v51, %v2660_v20  ;;  %v2707_v41 = vld [vmem:[#allocation15 + $0x1f0] sm:$0xff] }
 0x220   : > { %3434 = vmatpush1.bf16.msra.mxu0 %v5079_v61  ;;  %3475 = vmatpush1.bf16.msra.mxu1 %v5081_v62  ;;  %v5011_v61 = vcombine.low %v2655_v25, %v2659_v49  ;;  %v5013_v62 = vcombine.low %v2656_v51, %v2660_v20  ;;  %v5053_v51 = vcombine.low %v2696_v33, %v2700_v34 }
 0x221   : > { %3435 = vmatprep.subr.bf16.mxu0 %v5088_v63  ;;  %3476 = vmatprep.subr.bf16.mxu1 %v5090_v0  ;;  %v5020_v63 = vcombine.high %v2663_v56, %v2667_v57  ;;  %v5022_v0 = vcombine.high %v2664_v59, %v2668_v60  ;;  %v5060_v20 = vcombine.high %v2703_v39, %v2707_v41 }
 0x224   : > { %3436 = vmatpush1.bf16.msra.mxu0 %v5087_v5  ;;  %3477 = vmatpush1.bf16.msra.mxu1 %v5089_v6  ;;  %v5019_v5 = vcombine.low %v2663_v56, %v2667_v57  ;;  %v5021_v6 = vcombine.low %v2664_v59, %v2668_v60  ;;  %v2712_v56 = vld [vmem:[#allocation15 + $0x218] sm:$0xff]  ;;  %v5059_v59 = vcombine.low %v2703_v39, %v2707_v41 }
 0x225   : > { %3437 = vmatprep.subr.bf16.mxu0 %v5096_v7  ;;  %3478 = vmatprep.subr.bf16.mxu1 %v5098_v8  ;;  %v5028_v7 = vcombine.high %v2671_v1, %v2675_v2  ;;  %v5030_v8 = vcombine.high %v2672_v3, %v2676_v4  ;;  %v2716_v57 = vld [vmem:[#allocation15 + $0x238] sm:$0xff] }
 0x226   : > { %v2752_v39 = vld [vmem:[#allocation15 + $0x358] sm:$0xff] }
 0x227   : > { %v2756_v41 = vld [vmem:[#allocation15 + $0x378] sm:$0xff] }
 0x228   : > { %3438 = vmatpush1.bf16.msra.mxu0 %v5095_v14  ;;  %3479 = vmatpush1.bf16.msra.mxu1 %v5097_v16  ;;  %v5027_v14 = vcombine.low %v2671_v1, %v2675_v2  ;;  %v5029_v16 = vcombine.low %v2672_v3, %v2676_v4  ;;  %v2720_v1 = vld [vmem:[#allocation15 + $0x258] sm:$0xff]  ;;  %v5069_v4 = vcombine.low %v2712_v56, %v2716_v57 }
 0x229   : > { %3439 = vmatprep.subr.bf16.mxu0 %v5104_v17  ;;  %3480 = vmatprep.subr.bf16.mxu1 %v5106_v18  ;;  %v5036_v17 = vcombine.high %v2679_v9, %v2683_v10  ;;  %v2687_v18 = vld [vmem:[#allocation15 + $0x150] sm:$0xff]  ;;  %v2724_v2 = vld [vmem:[#allocation15 + $0x278] sm:$0xff] }
 0x22a   : > { %v5043_v35 = vcombine.low %v2687_v18, %v2691_v22  ;;  %v2728_v9 = vld [vmem:[#allocation15 + $0x298] sm:$0xff] }
 0x22b   : > { %v2732_v10 = vld [vmem:[#allocation15 + $0x2b8] sm:$0xff] }
 0x22c   : > { %3440 = vmatpush1.bf16.msra.mxu0 %v5103_v28  ;;  %3481 = vmatpush1.bf16.msra.mxu1 %v5105_v29  ;;  %v5037_v28 = vcombine.low %v2680_v11, %v2684_v12  ;;  %v5044_v29 = vcombine.high %v2687_v18, %v2691_v22  ;;  %v2736_v18 = vld [vmem:[#allocation15 + $0x2d8] sm:$0xff] }
 0x22d   : > { %3441 = vmatprep.subr.bf16.mxu0 %v5112_v30  ;;  %3482 = vmatprep.subr.bf16.mxu1 %v5114_v31  ;;  %v5046_v30 = vcombine.high %v2688_v23, %v2692_v26  ;;  %v2695_v31 = vld [vmem:[#allocation15 + $0x190] sm:$0xff]  ;;  %v2740_v22 = vld [vmem:[#allocation15 + $0x2f8] sm:$0xff] }
 0x230   : > { %3442 = vmatpush1.bf16.msra.mxu0 %v5111_v36  ;;  %3483 = vmatpush1.bf16.msra.mxu1 %v5113_v13  ;;  %v5045_v36 = vcombine.low %v2688_v23, %v2692_v26  ;;  %v5052_v13 = vcombine.high %v2695_v31, %v2699_v32  ;;  %v5085_v26 = vcombine.low %v2728_v9, %v2732_v10 }
 0x231   : > { %3443 = vmatprep.subr.bf16.mxu0 %v5120_v37  ;;  %3484 = vmatprep.subr.bf16.mxu1 %v5122_v38  ;;  %v5054_v38 = vcombine.high %v2696_v33, %v2700_v34  ;;  %v5093_v34 = vcombine.low %v2736_v18, %v2740_v22 }
 0x234   : > { %3444 = vmatpush1.bf16.msra.mxu0 %v5119_v44  ;;  %3485 = vmatpush1.bf16.msra.mxu1 %v5121_v46  ;;  %v2704_v44 = vld [vmem:[#allocation15 + $0x1d8] sm:$0xff] }
 0x235   : > { %3495 = vmatprep.subr.bf16.mxu0 %v5004_v47  ;;  %3536 = vmatprep.subr.bf16.mxu1 %v5006_v48  ;;  %v5051_v48 = vcombine.low %v2695_v31, %v2699_v32  ;;  %v5061_v60 = vcombine.low %v2704_v44, %v2708_v45  ;;  %v2744_v31 = vld [vmem:[#allocation15 + $0x318] sm:$0xff] }
 0x236   : > { %v2748_v32 = vld [vmem:[#allocation15 + $0x338] sm:$0xff] }
 0x237   : > { %3446 = vmatmul.mubr.bf16.vlgmr.msra.gmra.mrb[16].mxu0 %v6263_v50  ;;  %3487 = vmatmul.mubr.bf16.vlgmr.msra.gmra.mrb[16].mxu1 %v6263_v50 }
 0x238   : > { %3496 = vmatpush1.bf16.msra.mxu0 %v5003_v52  ;;  %3537 = vmatpush1.bf16.msra.mxu1 %v5005_v53  ;;  %v5062_v53 = vcombine.high %v2704_v44, %v2708_v45  ;;  %v5101_v45 = vcombine.low %v2744_v31, %v2748_v32 }
 0x239   : > { %3497 = vmatprep.subr.bf16.mxu0 %v5012_v54  ;;  %3538 = vmatprep.subr.bf16.mxu1 %v5014_v55  ;;  %v2711_v54 = vld [vmem:[#allocation15 + $0x210] sm:$0xff] }
 0x23a   : > { %3527 = vmatprep.mubr.bf16.mxu0 %v6249_v42  ;;  %3568 = vmatprep.mubr.bf16.mxu1 %v6249_v42  ;;  %v5038_v42 = vcombine.high %v2680_v11, %v2684_v12  ;;  %v2715_v55 = vld [vmem:[#allocation15 + $0x230] sm:$0xff]  ;;  %v5077_v12 = vcombine.low %v2720_v1, %v2724_v2 }
 0x23b   : > { %v5067_v3 = vcombine.low %v2711_v54, %v2715_v55 }
 0x23c   : > { %3498 = vmatpush1.bf16.msra.mxu0 %v5011_v61  ;;  %3539 = vmatpush1.bf16.msra.mxu1 %v5013_v62  ;;  %v5068_v61 = vcombine.high %v2711_v54, %v2715_v55  ;;  %v5070_v62 = vcombine.high %v2712_v56, %v2716_v57  ;;  %v2767_v56 = vld [vmem:[#allocation15 + $0x3d0] sm:$0xff] }
 0x23d   : > { %3499 = vmatprep.subr.bf16.mxu0 %v5020_v63  ;;  %3540 = vmatprep.subr.bf16.mxu1 %v5022_v0  ;;  %v2719_v63 = vld [vmem:[#allocation15 + $0x250] sm:$0xff] }
 0x23e   : > { %v2723_v0 = vld [vmem:[#allocation15 + $0x270] sm:$0xff] }
 0x23f   : > { %v5075_v11 = vcombine.low %v2719_v63, %v2723_v0  ;;  %v2771_v57 = vld [vmem:[#allocation15 + $0x3f0] sm:$0xff] }
 0x240   : > { %3500 = vmatpush1.bf16.msra.mxu0 %v5019_v5  ;;  %3541 = vmatpush1.bf16.msra.mxu1 %v5021_v6  ;;  %v5076_v5 = vcombine.high %v2719_v63, %v2723_v0  ;;  %v5078_v6 = vcombine.high %v2720_v1, %v2724_v2  ;;  %v5124_v63 = vcombine.high %v2767_v56, %v2771_v57  ;;  %v2515_v1 = vld [vmem:[#allocation14] sm:$0xff] }
 0x241   : > { %3501 = vmatprep.subr.bf16.mxu0 %v5028_v7  ;;  %3542 = vmatprep.subr.bf16.mxu1 %v5030_v8  ;;  %v2727_v7 = vld [vmem:[#allocation15 + $0x290] sm:$0xff]  ;;  %v2519_v2 = vld [vmem:[#allocation14 + $0x20] sm:$0xff] }
 0x242   : > { %v2731_v8 = vld [vmem:[#allocation15 + $0x2b0] sm:$0xff] }
 0x243   : > { %v5083_v23 = vcombine.low %v2727_v7, %v2731_v8 }
 0x244   : > { %3502 = vmatpush1.bf16.msra.mxu0 %v5027_v14  ;;  %3543 = vmatpush1.bf16.msra.mxu1 %v5029_v16  ;;  %v5084_v14 = vcombine.high %v2727_v7, %v2731_v8  ;;  %v5086_v16 = vcombine.high %v2728_v9, %v2732_v10  ;;  %v5128_v7 = vcombine.high %v2515_v1, %v2519_v2  ;;  %v2523_v9 = vld [vmem:[#allocation14 + $0x40] sm:$0xff] }
 0x245   : > { %3503 = vmatprep.subr.bf16.mxu0 %v5036_v17  ;;  %3544 = vmatprep.subr.bf16.mxu1 %v5038_v42  ;;  %v2735_v17 = vld [vmem:[#allocation15 + $0x2d0] sm:$0xff]  ;;  %v2527_v10 = vld [vmem:[#allocation14 + $0x60] sm:$0xff] }
 0x246   : > { %v2739_v42 = vld [vmem:[#allocation15 + $0x2f0] sm:$0xff] }
 0x247   : > { %v5091_v33 = vcombine.low %v2735_v17, %v2739_v42 }
 0x248   : > { %3504 = vmatpush1.bf16.msra.mxu0 %v5035_v27  ;;  %3545 = vmatpush1.bf16.msra.mxu1 %v5037_v28  ;;  %v5092_v27 = vcombine.high %v2735_v17, %v2739_v42  ;;  %v5094_v28 = vcombine.high %v2736_v18, %v2740_v22  ;;  %v5136_v42 = vcombine.high %v2523_v9, %v2527_v10  ;;  %v2531_v22 = vld [vmem:[#allocation14 + $0x80] sm:$0xff] }
 0x249   : > { %3505 = vmatprep.subr.bf16.mxu0 %v5044_v29  ;;  %3546 = vmatprep.subr.bf16.mxu1 %v5046_v30  ;;  %v2743_v29 = vld [vmem:[#allocation15 + $0x310] sm:$0xff] }
 0x24a   : > { %v6269_v37 = vpop.f32.mrb[4].mxu0  ;;  %v6271_v58 = vpop.f32.mrb[4].mxu1  ;;  %v2747_v30 = vld [vmem:[#allocation15 + $0x330] sm:$0xff] }
 0x24b   : > { %v6273_v43 = vpop.f32.mrb[5].mxu0  ;;  %v6275_v46 = vpop.f32.mrb[5].mxu1  ;;  %v5099_v44 = vcombine.low %v2743_v29, %v2747_v30 }
 0x24c   : > { %v1538_v47 = vpop.f32.mrb[6].mxu0  ;;  %3506 = vmatpush1.bf16.msra.mxu0 %v5043_v35  ;;  %v1579_v25 = vpop.f32.mrb[6].mxu1  ;;  %3547 = vmatpush1.bf16.msra.mxu1 %v5045_v36  ;;  %v5100_v35 = vcombine.high %v2743_v29, %v2747_v30  ;;  %v5102_v36 = vcombine.high %v2744_v31, %v2748_v32  ;;  %v5135_v29 = vcombine.low %v2523_v9, %v2527_v10  ;;  %v2572_v10 = vld [vmem:[#allocation14 + $0x1c8] sm:$0xff] }
 0x24d   : > { %v1539_v49 = vpop.f32.mrb[7].mxu0  ;;  %3507 = vmatprep.subr.bf16.mxu0 %v5052_v13  ;;  %v1580_v52 = vpop.f32.mrb[7].mxu1  ;;  %3548 = vmatprep.subr.bf16.mxu1 %v5054_v38  ;;  %v2751_v13 = vld [vmem:[#allocation15 + $0x350] sm:$0xff] }
 0x24e   : > { %v2755_v38 = vld [vmem:[#allocation15 + $0x370] sm:$0xff] }
 0x24f   : > { %v5108_v47 = vcombine.high %v2751_v13, %v2755_v38  ;;  %v2759_v25 = vld [vmem:[#allocation15 + $0x390] sm:$0xff]  ;;  %v5107_v52 = vcombine.low %v2751_v13, %v2755_v38 }
 0x250   : > { %3508 = vmatpush1.bf16.msra.mxu0 %v5051_v48  ;;  %3549 = vmatpush1.bf16.msra.mxu1 %v5053_v51  ;;  %v5110_v48 = vcombine.high %v2752_v39, %v2756_v41  ;;  %v2763_v49 = vld [vmem:[#allocation15 + $0x3b0] sm:$0xff]  ;;  %v2760_v51 = vld [vmem:[#allocation15 + $0x398] sm:$0xff] }
 0x251   : > { %3509 = vmatprep.subr.bf16.mxu0 %v5060_v20  ;;  %3550 = vmatprep.subr.bf16.mxu1 %v5062_v53  ;;  %v2764_v20 = vld [vmem:[#allocation15 + $0x3b8] sm:$0xff]  ;;  %v5109_v53 = vcombine.low %v2752_v39, %v2756_v41  ;;  %v5116_v54 = vcombine.high %v2759_v25, %v2763_v49  ;;  %v2547_v41 = vld [vmem:[#allocation14 + $0x100] sm:$0xff] }
 0x252   : > { %v5118_v55 = vcombine.high %v2760_v51, %v2764_v20 }
 0x254   : > { %3510 = vmatpush1.bf16.msra.mxu0 %v5059_v59  ;;  %3551 = vmatpush1.bf16.msra.mxu1 %v5061_v60  ;;  %v2768_v59 = vld [vmem:[#allocation15 + $0x3d8] sm:$0xff] }
 0x255   : > { %3511 = vmatprep.subr.bf16.mxu0 %v5068_v61  ;;  %3552 = vmatprep.subr.bf16.mxu1 %v5070_v62  ;;  %v2772_v60 = vld [vmem:[#allocation15 + $0x3f8] sm:$0xff]  ;;  %v5115_v61 = vcombine.low %v2759_v25, %v2763_v49  ;;  %v5117_v62 = vcombine.low %v2760_v51, %v2764_v20  ;;  %v2555_v20 = vld [vmem:[#allocation14 + $0x140] sm:$0xff] }
 0x256   : > { %v5126_v0 = vcombine.high %v2768_v59, %v2772_v60 }
 0x258   : > { %3512 = vmatpush1.bf16.msra.mxu0 %v5067_v3  ;;  %3553 = vmatpush1.bf16.msra.mxu1 %v5069_v4  ;;  %v2516_v3 = vld [vmem:[#allocation14 + $0x8] sm:$0xff] }
 0x259   : > { %3513 = vmatprep.subr.bf16.mxu0 %v5076_v5  ;;  %3554 = vmatprep.subr.bf16.mxu1 %v5078_v6  ;;  %v2520_v4 = vld [vmem:[#allocation14 + $0x28] sm:$0xff]  ;;  %v5123_v5 = vcombine.low %v2767_v56, %v2771_v57  ;;  %v5125_v6 = vcombine.low %v2768_v59, %v2772_v60  ;;  %v2563_v60 = vld [vmem:[#allocation14 + $0x180] sm:$0xff] }
 0x25a   : > { %v5130_v8 = vcombine.high %v2516_v3, %v2520_v4  ;;  %v5129_v17 = vcombine.low %v2516_v3, %v2520_v4 }
 0x25c   : > { %3514 = vmatpush1.bf16.msra.mxu0 %v5075_v11  ;;  %3555 = vmatpush1.bf16.msra.mxu1 %v5077_v12  ;;  %v2524_v11 = vld [vmem:[#allocation14 + $0x48] sm:$0xff] }
 0x25d   : > { %3515 = vmatprep.subr.bf16.mxu0 %v5084_v14  ;;  %3556 = vmatprep.subr.bf16.mxu1 %v5086_v16  ;;  %v2528_v12 = vld [vmem:[#allocation14 + $0x68] sm:$0xff]  ;;  %v5127_v16 = vcombine.low %v2515_v1, %v2519_v2 }
 0x25e   : > { %v2508_v14 = vld [vmem:[%s425_s21 + $0x8] sm:$0xff]  ;;  %v5138_v18 = vcombine.high %v2524_v11, %v2528_v12  ;;  %v5137_v30 = vcombine.low %v2524_v11, %v2528_v12 }
 0x25f   : > { %v2576_v11 = vld [vmem:[#allocation14 + $0x1e8] sm:$0xff] }
 0x260   : > { %3516 = vmatpush1.bf16.msra.mxu0 %v5083_v23  ;;  %3557 = vmatpush1.bf16.msra.mxu1 %v5085_v26  ;;  %v2535_v23 = vld [vmem:[#allocation14 + $0xa0] sm:$0xff]  ;;  %v6279_v26 = vpack.c.bf16 %v2508_v14, %v2508_v14 }
 0x261   : > { %3517 = vmatprep.subr.bf16.mxu0 %v5092_v27  ;;  %3558 = vmatprep.subr.bf16.mxu1 %v5094_v28  ;;  %v2532_v27 = vld [vmem:[#allocation14 + $0x88] sm:$0xff]  ;;  %v5144_v31 = vcombine.high %v2531_v22, %v2535_v23  ;;  %v5143_v13 = vcombine.low %v2531_v22, %v2535_v23 }
 0x262   : > { %v2536_v28 = vld [vmem:[#allocation14 + $0xa8] sm:$0xff] }
 0x263   : > { %v5146_v32 = vcombine.high %v2532_v27, %v2536_v28 }
 0x264   : > { %3518 = vmatpush1.bf16.msra.mxu0 %v5091_v33  ;;  %3559 = vmatpush1.bf16.msra.mxu1 %v5093_v34  ;;  %v2539_v33 = vld [vmem:[#allocation14 + $0xc0] sm:$0xff] }
 0x265   : > { %3519 = vmatprep.subr.bf16.mxu0 %v5100_v35  ;;  %3560 = vmatprep.subr.bf16.mxu1 %v5102_v36  ;;  %v2543_v34 = vld [vmem:[#allocation14 + $0xe0] sm:$0xff]  ;;  %v2540_v35 = vld [vmem:[#allocation14 + $0xc8] sm:$0xff] }
 0x266   : > { %v2544_v36 = vld [vmem:[#allocation14 + $0xe8] sm:$0xff]  ;;  %v5152_v38 = vcombine.high %v2539_v33, %v2543_v34 }
 0x267   : > { %v5154_v39 = vcombine.high %v2540_v35, %v2544_v36  ;;  %v5153_v25 = vcombine.low %v2540_v35, %v2544_v36  ;;  %v2587_v35 = vld [vmem:[#allocation14 + $0x240] sm:$0xff] }
 0x268   : > { %3520 = vmatpush1.bf16.msra.mxu0 %v5099_v44  ;;  %3561 = vmatpush1.bf16.msra.mxu1 %v5101_v45  ;;  %v2551_v44 = vld [vmem:[#allocation14 + $0x120] sm:$0xff]  ;;  %v2548_v45 = vld [vmem:[#allocation14 + $0x108] sm:$0xff] }
 0x269   : > { %3521 = vmatprep.subr.bf16.mxu0 %v5108_v47  ;;  %3562 = vmatprep.subr.bf16.mxu1 %v5110_v48  ;;  %v2552_v47 = vld [vmem:[#allocation14 + $0x128] sm:$0xff]  ;;  %v5151_v48 = vcombine.low %v2539_v33, %v2543_v34  ;;  %v5160_v49 = vcombine.high %v2547_v41, %v2551_v44  ;;  %v5185_v33 = vcombine.low %v2572_v10, %v2576_v11  ;;  %v2591_v36 = vld [vmem:[#allocation14 + $0x260] sm:$0xff] }
 0x26a   : > { %v5162_v51 = vcombine.high %v2548_v45, %v2552_v47  ;;  %v5161_v56 = vcombine.low %v2548_v45, %v2552_v47  ;;  %v2595_v45 = vld [vmem:[#allocation14 + $0x280] sm:$0xff] }
 0x26b   : > { %v2599_v47 = vld [vmem:[#allocation14 + $0x2a0] sm:$0xff] }
 0x26c   : > { %3522 = vmatpush1.bf16.msra.mxu0 %v5107_v52  ;;  %3563 = vmatpush1.bf16.msra.mxu1 %v5109_v53  ;;  %v2559_v52 = vld [vmem:[#allocation14 + $0x160] sm:$0xff]  ;;  %v2556_v53 = vld [vmem:[#allocation14 + $0x148] sm:$0xff] }
 0x26d   : > { %3523 = vmatprep.subr.bf16.mxu0 %v5116_v54  ;;  %3564 = vmatprep.subr.bf16.mxu1 %v5118_v55  ;;  %v2560_v54 = vld [vmem:[#allocation14 + $0x168] sm:$0xff]  ;;  %v5159_v55 = vcombine.low %v2547_v41, %v2551_v44  ;;  %v5168_v57 = vcombine.high %v2555_v20, %v2559_v52  ;;  %v5200_v41 = vcombine.high %v2587_v35, %v2591_v36 }
 0x26e   : > { %v5170_v59 = vcombine.high %v2556_v53, %v2560_v54  ;;  %v5169_v1 = vcombine.low %v2556_v53, %v2560_v54  ;;  %v2603_v53 = vld [vmem:[#allocation14 + $0x2c0] sm:$0xff] }
 0x26f   : > { %v2607_v54 = vld [vmem:[#allocation14 + $0x2e0] sm:$0xff] }
 0x270   : > { %3524 = vmatpush1.bf16.msra.mxu0 %v5115_v61  ;;  %3565 = vmatpush1.bf16.msra.mxu1 %v5117_v62  ;;  %v2567_v61 = vld [vmem:[#allocation14 + $0x1a0] sm:$0xff]  ;;  %v2564_v62 = vld [vmem:[#allocation14 + $0x188] sm:$0xff] }
 0x271   : > { %3525 = vmatprep.subr.bf16.mxu0 %v5124_v63  ;;  %3566 = vmatprep.subr.bf16.mxu1 %v5126_v0  ;;  %v2568_v63 = vld [vmem:[#allocation14 + $0x1a8] sm:$0xff]  ;;  %v5167_v0 = vcombine.low %v2555_v20, %v2559_v52  ;;  %v5176_v2 = vcombine.high %v2563_v60, %v2567_v61  ;;  %v5208_v20 = vcombine.high %v2595_v45, %v2599_v47 }
 0x272   : > { %v5178_v4 = vcombine.high %v2564_v62, %v2568_v63  ;;  %v5177_v23 = vcombine.low %v2564_v62, %v2568_v63  ;;  %v2611_v62 = vld [vmem:[#allocation14 + $0x300] sm:$0xff] }
 0x273   : > { %v2615_v63 = vld [vmem:[#allocation14 + $0x320] sm:$0xff] }
 0x274   : > { %3526 = vmatpush1.bf16.msra.mxu0 %v5123_v5  ;;  %3567 = vmatpush1.bf16.msra.mxu1 %v5125_v6  ;;  %v2571_v5 = vld [vmem:[#allocation14 + $0x1c0] sm:$0xff] }
 0x275   : > { %4217 = vmatprep.subr.bf16.mxu0 %v5128_v7  ;;  %4258 = vmatprep.subr.bf16.mxu1 %v5130_v8  ;;  %v2575_v6 = vld [vmem:[#allocation14 + $0x1e0] sm:$0xff] }
 0x277   : > { %3528 = vmatmul.mubr.bf16.vlgmr.msra.gmra.mrb[20].mxu0 %v6263_v50  ;;  %3569 = vmatmul.mubr.bf16.vlgmr.msra.gmra.mrb[20].mxu1 %v6263_v50  ;;  %v5145_v50 = vcombine.low %v2532_v27, %v2536_v28  ;;  %v5184_v27 = vcombine.high %v2571_v5, %v2575_v6 }
 0x278   : > { %4218 = vmatpush1.bf16.msra.mxu0 %v5127_v16  ;;  %4259 = vmatpush1.bf16.msra.mxu1 %v5129_v17 }
 0x279   : > { %4219 = vmatprep.subr.bf16.mxu0 %v5136_v42  ;;  %4260 = vmatprep.subr.bf16.mxu1 %v5138_v18  ;;  %v5175_v42 = vcombine.low %v2563_v60, %v2567_v61  ;;  %v5216_v60 = vcombine.high %v2603_v53, %v2607_v54 }
 0x27a   : > { %4249 = vmatprep.mubr.bf16.mxu0 %v6279_v26  ;;  %4290 = vmatprep.mubr.bf16.mxu1 %v6279_v26 }
 0x27c   : > { %4220 = vmatpush1.bf16.msra.mxu0 %v5135_v29  ;;  %4261 = vmatpush1.bf16.msra.mxu1 %v5137_v30  ;;  %v2579_v29 = vld [vmem:[#allocation14 + $0x200] sm:$0xff] }
 0x27d   : > { %4221 = vmatprep.subr.bf16.mxu0 %v5144_v31  ;;  %4262 = vmatprep.subr.bf16.mxu1 %v5146_v32  ;;  %v2583_v30 = vld [vmem:[#allocation14 + $0x220] sm:$0xff]  ;;  %v2584_v31 = vld [vmem:[#allocation14 + $0x228] sm:$0xff]  ;;  %v5183_v32 = vcombine.low %v2571_v5, %v2575_v6  ;;  %v2388_v5 = vlaneseq }
 0x280   : > { %4222 = vmatpush1.bf16.msra.mxu0 %v5143_v13  ;;  %4263 = vmatpush1.bf16.msra.mxu1 %v5145_v50  ;;  %v2588_v13 = vld [vmem:[#allocation14 + $0x248] sm:$0xff] }
 0x281   : > { %4223 = vmatprep.subr.bf16.mxu0 %v5152_v38  ;;  %4264 = vmatprep.subr.bf16.mxu1 %v5154_v39  ;;  %v2592_v50 = vld [vmem:[#allocation14 + $0x268] sm:$0xff]  ;;  %v5191_v38 = vcombine.low %v2579_v29, %v2583_v30 }
 0x282   : > { %v5202_v44 = vcombine.high %v2588_v13, %v2592_v50 }
 0x284   : > { %4224 = vmatpush1.bf16.msra.mxu0 %v5151_v48  ;;  %4265 = vmatpush1.bf16.msra.mxu1 %v5153_v25  ;;  %v2596_v48 = vld [vmem:[#allocation14 + $0x288] sm:$0xff] }
 0x285   : > { %4225 = vmatprep.subr.bf16.mxu0 %v5160_v49  ;;  %4266 = vmatprep.subr.bf16.mxu1 %v5162_v51  ;;  %v2600_v25 = vld [vmem:[#allocation14 + $0x2a8] sm:$0xff]  ;;  %v5199_v49 = vcombine.low %v2587_v35, %v2591_v36  ;;  %v5201_v51 = vcombine.low %v2588_v13, %v2592_v50 }
 0x286   : > { %v5210_v52 = vcombine.high %v2596_v48, %v2600_v25  ;;  %v2636_v36 = vld [vmem:[#allocation14 + $0x3c8] sm:$0xff] }
 0x287   : > { %v2640_v13 = vld [vmem:[#allocation14 + $0x3e8] sm:$0xff] }
 0x288   : > { %4226 = vmatpush1.bf16.msra.mxu0 %v5159_v55  ;;  %4267 = vmatpush1.bf16.msra.mxu1 %v5161_v56  ;;  %v2604_v55 = vld [vmem:[#allocation14 + $0x2c8] sm:$0xff] }
 0x289   : > { %4227 = vmatprep.subr.bf16.mxu0 %v5168_v57  ;;  %4268 = vmatprep.subr.bf16.mxu1 %v5170_v59  ;;  %v2608_v56 = vld [vmem:[#allocation14 + $0x2e8] sm:$0xff]  ;;  %v5207_v57 = vcombine.low %v2595_v45, %v2599_v47  ;;  %v5209_v59 = vcombine.low %v2596_v48, %v2600_v25  ;;  %v5250_v47 = vcombine.high %v2636_v36, %v2640_v13  ;;  %v2517_v48 = vld [vmem:[#allocation14 + $0x10] sm:$0xff] }
 0x28a   : > { %v2256_v3 = vpop.f32.mrb[8].mxu0  ;;  %v2297_v8 = vpop.f32.mrb[8].mxu1  ;;  %v5218_v61 = vcombine.high %v2604_v55, %v2608_v56  ;;  %v2521_v25 = vld [vmem:[#allocation14 + $0x30] sm:$0xff] }
 0x28b   : > { %v6286_v7 = vadd.f32 %v2256_v3, %v6255_v15  ;;  %v2258_v9 = vpop.f32.mrb[9].mxu0  ;;  %v6289_v12 = vadd.f32 %v2297_v8, %v6257_v19  ;;  %v2299_v16 = vpop.f32.mrb[9].mxu1  ;;  %v5186_v19 = vcombine.high %v2572_v10, %v2576_v11  ;;  %v5217_v3 = vcombine.low %v2604_v55, %v2608_v56  ;;  %v2619_v8 = vld [vmem:[#allocation14 + $0x340] sm:$0xff]  ;;  %v2620_v10 = vld [vmem:[#allocation14 + $0x348] sm:$0xff] }
 0x28c   : > { %v6292_v14 = vadd.f32 %v2258_v9, %v6259_v21  ;;  %v2260_v17 = vpop.f32.mrb[10].mxu0  ;;  %4228 = vmatpush1.bf16.msra.mxu0 %v5167_v0  ;;  %v6295_v18 = vadd.f32 %v2299_v16, %v6261_v24  ;;  %v2301_v22 = vpop.f32.mrb[10].mxu1  ;;  %4269 = vmatpush1.bf16.msra.mxu1 %v5169_v1  ;;  %v2580_v21 = vld [vmem:[#allocation14 + $0x208] sm:$0xff]  ;;  %v5192_v24 = vcombine.high %v2579_v29, %v2583_v30  ;;  %v2623_v9 = vld [vmem:[#allocation14 + $0x360] sm:$0xff] }
 0x28d   : > { %v2261_v15 = vpop.f32.mrb[11].mxu0  ;;  %4229 = vmatprep.subr.bf16.mxu0 %v5176_v2  ;;  %v2302_v28 = vpop.f32.mrb[11].mxu1  ;;  %4270 = vmatprep.subr.bf16.mxu1 %v5178_v4  ;;  %v5194_v34 = vcombine.high %v2580_v21, %v2584_v31  ;;  %v5193_v39 = vcombine.low %v2580_v21, %v2584_v31  ;;  %v2612_v0 = vld [vmem:[#allocation14 + $0x308] sm:$0xff]  ;;  %v5215_v2 = vcombine.low %v2603_v53, %v2607_v54  ;;  %v6297_v22 = vshrl.u32 %v2388_v5, 7  ;;  %v2507_v54 = vld [vmem:[%s425_s21] sm:$0xff] }
 0x28e   : > { %v2616_v1 = vld [vmem:[#allocation14 + $0x328] sm:$0xff]  ;;  %v5224_v4 = vcombine.high %v2611_v62, %v2615_v63  ;;  %v5223_v16 = vcombine.low %v2611_v62, %v2615_v63  ;;  %v5231_v29 = vcombine.low %v2619_v8, %v2623_v9  ;;  %v5249_v56 = vcombine.low %v2636_v36, %v2640_v13  ;;  %v2529_v62 = vld [vmem:[#allocation14 + $0x70] sm:$0xff] }
 0x28f   : > { %v5226_v6 = vcombine.high %v2612_v0, %v2616_v1  ;;  %v2624_v11 = vld [vmem:[#allocation14 + $0x368] sm:$0xff]  ;;  %v5225_v17 = vcombine.low %v2612_v0, %v2616_v1  ;;  %v2390_v31 = vsub.s32 0, %v6297_v22  ;;  %v2398_v35 = vsub.s32 2, %v6297_v22  ;;  %v2526_v1 = vld [vmem:[#allocation14 + $0x58] sm:$0xff]  ;;  %v2549_v36 = vld [vmem:[#allocation14 + $0x110] sm:$0xff] }
 0x290   : > { %4230 = vmatpush1.bf16.msra.mxu0 %v5175_v42  ;;  %4271 = vmatpush1.bf16.msra.mxu1 %v5177_v23  ;;  %v5232_v42 = vcombine.high %v2619_v8, %v2623_v9  ;;  %v5234_v15 = vcombine.high %v2620_v10, %v2624_v11  ;;  %v2627_v23 = vld [vmem:[#allocation14 + $0x380] sm:$0xff]  ;;  %v2628_v28 = vld [vmem:[#allocation14 + $0x388] sm:$0xff]  ;;  %v5233_v30 = vcombine.low %v2620_v10, %v2624_v11  ;;  %v2394_v50 = vsub.s32 1, %v6297_v22  ;;  %v2533_v10 = vld [vmem:[#allocation14 + $0x90] sm:$0xff] }
 0x291   : > { %4231 = vmatprep.subr.bf16.mxu0 %v5184_v27  ;;  %4272 = vmatprep.subr.bf16.mxu1 %v5186_v19  ;;  %v2631_v27 = vld [vmem:[#allocation14 + $0x3a0] sm:$0xff]  ;;  %v2632_v19 = vld [vmem:[#allocation14 + $0x3a8] sm:$0xff]  ;;  %v6324_v0 = vpack.c.bf16 %v2507_v54, %v2507_v54  ;;  %v2537_v11 = vld [vmem:[#allocation14 + $0xb0] sm:$0xff] }
 0x292   : > { %v5240_v21 = vcombine.high %v2627_v23, %v2631_v27  ;;  %v2553_v13 = vld [vmem:[#allocation14 + $0x130] sm:$0xff] }
 0x294   : > { %4232 = vmatpush1.bf16.msra.mxu0 %v5183_v32  ;;  %4273 = vmatpush1.bf16.msra.mxu1 %v5185_v33  ;;  %v5242_v32 = vcombine.high %v2628_v28, %v2632_v19  ;;  %v2635_v33 = vld [vmem:[#allocation14 + $0x3c0] sm:$0xff] }
 0x295   : > { %4233 = vmatprep.subr.bf16.mxu0 %v5192_v24  ;;  %4274 = vmatprep.subr.bf16.mxu1 %v5194_v34  ;;  %v2639_v24 = vld [vmem:[#allocation14 + $0x3e0] sm:$0xff] }
 0x296   : > { %v6303_v34 = vld [vmem:[%s6556_s3] sm:$0xff]  ;;  %v5247_v53 = vcombine.low %v2635_v33, %v2639_v24  ;;  %s5797_s3 = smov [#allocation17]  }
 0x297   : > { %v2391_v45 = vrot.slane %v6303_v34, %v2390_v31  ;;  %s5650_s6 = sshll.u32 %s5797_s3, 4  ;;  %s5651_s6 = int_to_ptr.vmem [resolvable:$false] %s5650_s6 }
 0x298   : > { %4234 = vmatpush1.bf16.msra.mxu0 %v5191_v38  ;;  %4275 = vmatpush1.bf16.msra.mxu1 %v5193_v39  ;;  %v5239_v38 = vcombine.low %v2627_v23, %v2631_v27  ;;  %v2402_v39 = vsub.s32 3, %v6297_v22  ;;  %v5148_v23 = vcombine.high %v2533_v10, %v2537_v11  ;;  %s5652_s0 = scalar_lea.vmem %s5651_s6, 512  ;;  %p5653_p10 = scmp.lt.s32.totalorder %s4535_s5, %s5651_s6 }
 0x299   : > { %4235 = vmatprep.subr.bf16.mxu0 %v5200_v41  ;;  %4276 = vmatprep.subr.bf16.mxu1 %v5202_v44  ;;  %v5241_v41 = vcombine.low %v2628_v28, %v2632_v19  ;;  %v5248_v44 = vcombine.high %v2635_v33, %v2639_v24  ;;  %v2541_v28 = vld [vmem:[#allocation14 + $0xd0] sm:$0xff]  ;;  %p5654_p6 = scmp.lt.s32.totalorder %s5652_s0, %s5646_s29 }
 0x29a   : > { %v2403_v55 = vrot.slane %v6303_v34, %v2402_v39  ;;  %v2545_v19 = vld [vmem:[#allocation14 + $0xf0] sm:$0xff] }
 0x29b   : > { %v5156_v33 = vcombine.high %v2541_v28, %v2545_v19  ;;  %p5655_p1 = por %p5654_p6, %p5653_p10 }
 0x29c   : > { %4236 = vmatpush1.bf16.msra.mxu0 %v5199_v49  ;;  %4277 = vmatpush1.bf16.msra.mxu1 %v5201_v51  ;;  %v2399_v49 = vrot.slane %v6303_v34, %v2398_v35  ;;  %v2518_v51 = vld [vmem:[#allocation14 + $0x18] sm:$0xff]  ;;  %v2431_v5 = vadd.f32 %v2403_v55, %v6295_v18  ;;  %v2406_v55 = vsub.s32 4, %v6297_v22 }
 0x29d   : > { %4237 = vmatprep.subr.bf16.mxu0 %v5208_v20  ;;  %4278 = vmatprep.subr.bf16.mxu1 %v5210_v52  ;;  %v2522_v20 = vld [vmem:[#allocation14 + $0x38] sm:$0xff]  ;;  %v2395_v52 = vrot.slane %v6303_v34, %v2394_v50  ;;  %p5656_p0 = pnand %p5655_p1, %p5649_p3 }
 0x29e   : > { %v2430_v63 = vadd.f32 %v2399_v49, %v6289_v12  ;;  %v4996_v18 = vmul.f32 -1.442695, %v2431_v5  ;;  %v2558_v49 = vld [vmem:[#allocation14 + $0x158] sm:$0xff] }
 0x29f   : > { %v2570_v5 = vld [vmem:[#allocation14 + $0x1b8] sm:$0xff] }
 0x2a0   : > { %4238 = vmatpush1.bf16.msra.mxu0 %v5207_v57  ;;  %4279 = vmatpush1.bf16.msra.mxu1 %v5209_v59  ;;  %v5132_v57 = vcombine.high %v2517_v48, %v2521_v25  ;;  %v2428_v59 = vadd.f32 %v2391_v45, %v6286_v7  ;;  %v4995_v12 = vmul.f32 -1.442695, %v2430_v63  ;;  %v2565_v63 = vld [vmem:[#allocation14 + $0x190] sm:$0xff] }
 0x2a1   : > { %4239 = vmatprep.subr.bf16.mxu0 %v5216_v60  ;;  %4280 = vmatprep.subr.bf16.mxu1 %v5218_v61  ;;  %v5134_v60 = vcombine.high %v2518_v51, %v2522_v20  ;;  %v2525_v61 = vld [vmem:[#allocation14 + $0x50] sm:$0xff] }
 0x2a2   : > { %v5140_v7 = vcombine.high %v2525_v61, %v2529_v62  ;;  %v4993_v8 = vmul.f32 -1.442695, %v2428_v59 }
 0x2a4   : > { %4240 = vmatpush1.bf16.msra.mxu0 %v5215_v2  ;;  %4281 = vmatpush1.bf16.msra.mxu1 %v5217_v3  ;;  %v2530_v2 = vld [vmem:[#allocation14 + $0x78] sm:$0xff]  ;;  %v2429_v3 = vadd.f32 %v2395_v52, %v6292_v14  ;;  %v5139_v14 = vcombine.low %v2525_v61, %v2529_v62  ;;  %5406 = vpow2.f32 %v4993_v8  ;;  %v5163_v52 = vcombine.low %v2549_v36, %v2553_v13 }
 0x2a5   : > { %4241 = vmatprep.subr.bf16.mxu0 %v5224_v4  ;;  %4282 = vmatprep.subr.bf16.mxu1 %v5226_v6  ;;  %v5131_v4 = vcombine.low %v2517_v48, %v2521_v25  ;;  %v5133_v6 = vcombine.low %v2518_v51, %v2522_v20  ;;  %v5142_v9 = vcombine.high %v2526_v1, %v2530_v2  ;;  %5408 = vpow2.f32 %v4995_v12  ;;  %v2557_v48 = vld [vmem:[#allocation14 + $0x150] sm:$0xff]  ;;  %v2562_v51 = vld [vmem:[#allocation14 + $0x178] sm:$0xff] }
 0x2a6   : > { %v2561_v25 = vld [vmem:[#allocation14 + $0x170] sm:$0xff]  ;;  %v2418_v61 = vsub.s32 7, %v6297_v22  ;;  %v5174_v62 = vcombine.high %v2558_v49, %v2562_v51  ;;  %v5173_v8 = vcombine.low %v2558_v49, %v2562_v51  ;;  %v2582_v51 = vld [vmem:[#allocation14 + $0x218] sm:$0xff] }
 0x2a8   : > { %4242 = vmatpush1.bf16.msra.mxu0 %v5223_v16  ;;  %4283 = vmatpush1.bf16.msra.mxu1 %v5225_v17  ;;  %v2534_v16 = vld [vmem:[#allocation14 + $0x98] sm:$0xff] }
 0x2a9   : > { %4243 = vmatprep.subr.bf16.mxu0 %v5232_v42  ;;  %4284 = vmatprep.subr.bf16.mxu1 %v5234_v15  ;;  %v2538_v17 = vld [vmem:[#allocation14 + $0xb8] sm:$0xff]  ;;  %v4994_v42 = vmul.f32 -1.442695, %v2429_v3  ;;  %v5141_v15 = vcombine.low %v2526_v1, %v2530_v2  ;;  %v2569_v1 = vld [vmem:[#allocation14 + $0x1b0] sm:$0xff] }
 0x2aa   : > { %v5150_v27 = vcombine.high %v2534_v16, %v2538_v17  ;;  %v5180_v12 = vcombine.high %v2565_v63, %v2569_v1 }
 0x2ab   : > { %5410 = vpow2.f32 %v4994_v42 }
 0x2ac   : > { %4244 = vmatpush1.bf16.msra.mxu0 %v5231_v29  ;;  %4285 = vmatpush1.bf16.msra.mxu1 %v5233_v30  ;;  %v2542_v29 = vld [vmem:[#allocation14 + $0xd8] sm:$0xff]  ;;  %5412 = vpow2.f32 %v4996_v18 }
 0x2ad   : > { %4245 = vmatprep.subr.bf16.mxu0 %v5240_v21  ;;  %4286 = vmatprep.subr.bf16.mxu1 %v5242_v32  ;;  %v2546_v30 = vld [vmem:[#allocation14 + $0xf8] sm:$0xff]  ;;  %v5147_v21 = vcombine.low %v2533_v10, %v2537_v11  ;;  %v5149_v32 = vcombine.low %v2534_v16, %v2538_v17  ;;  %v2407_v10 = vrot.slane %v6303_v34, %v2406_v55  ;;  %v2573_v16 = vld [vmem:[#allocation14 + $0x1d0] sm:$0xff] }
 0x2ae   : > { %v5158_v24 = vcombine.high %v2542_v29, %v2546_v30  ;;  %v5157_v45 = vcombine.low %v2542_v29, %v2546_v30  ;;  %v5407_v20 = vpop.eup %5406  ;;  %v2577_v17 = vld [vmem:[#allocation14 + $0x1f0] sm:$0xff] }
 0x2af   : > { %v2442_v3 = vadd.f32 1.0, %v5407_v20  ;;  %v2586_v20 = vld [vmem:[#allocation14 + $0x238] sm:$0xff] }
 0x2b0   : > { %4246 = vmatpush1.bf16.msra.mxu0 %v5239_v38  ;;  %4287 = vmatpush1.bf16.msra.mxu1 %v5241_v41  ;;  %v2550_v38 = vld [vmem:[#allocation14 + $0x118] sm:$0xff] }
 0x2b1   : > { %4247 = vmatprep.subr.bf16.mxu0 %v5248_v44  ;;  %4288 = vmatprep.subr.bf16.mxu1 %v5250_v47  ;;  %v2554_v41 = vld [vmem:[#allocation14 + $0x138] sm:$0xff]  ;;  %v5155_v44 = vcombine.low %v2541_v28, %v2545_v19  ;;  %5414 = vrcp.f32 %v2442_v3 }
 0x2b2   : > { %v5166_v47 = vcombine.high %v2550_v38, %v2554_v41  ;;  %v5165_v54 = vcombine.low %v2550_v38, %v2554_v41  ;;  %v2578_v28 = vld [vmem:[#allocation14 + $0x1f8] sm:$0xff] }
 0x2b4   : > { %4248 = vmatpush1.bf16.msra.mxu0 %v5247_v53  ;;  %4289 = vmatpush1.bf16.msra.mxu1 %v5249_v56  ;;  %v5409_v53 = vpop.eup %5408  ;;  %v2414_v56 = vsub.s32 6, %v6297_v22 }
 0x2b5   : > { %4299 = vmatprep.subr.bf16.mxu0 %v5132_v57  ;;  %4340 = vmatprep.subr.bf16.mxu1 %v5134_v60  ;;  %v5172_v57 = vcombine.high %v2557_v48, %v2561_v25  ;;  %v5411_v59 = vpop.eup %5410  ;;  %v2410_v60 = vsub.s32 5, %v6297_v22 }
 0x2b6   : > { %v5413_v2 = vpop.eup %5412  ;;  %v2415_v11 = vrot.slane %v6303_v34, %v2414_v56 }
 0x2b7   : > { %4250 = vmatmul.mubr.bf16.vlgmr.msra.gmra.mrb[24].mxu0 %v6324_v0  ;;  %4291 = vmatmul.mubr.bf16.vlgmr.msra.gmra.mrb[24].mxu1 %v6324_v0  ;;  %v2455_v42 = vadd.f32 1.0, %v5413_v2  ;;  %v2411_v18 = vrot.slane %v6303_v34, %v2410_v60  ;;  %v2594_v2 = vld [vmem:[#allocation14 + $0x278] sm:$0xff] }
 0x2b8   : > { %4300 = vmatpush1.bf16.msra.mxu0 %v5131_v4  ;;  %4341 = vmatpush1.bf16.msra.mxu1 %v5133_v6  ;;  %v2566_v4 = vld [vmem:[#allocation14 + $0x198] sm:$0xff]  ;;  %v2454_v6 = vadd.f32 1.0, %v5409_v53 }
 0x2b9   : > { %4301 = vmatprep.subr.bf16.mxu0 %v5140_v7  ;;  %4342 = vmatprep.subr.bf16.mxu1 %v5142_v9  ;;  %v5171_v7 = vcombine.low %v2557_v48, %v2561_v25  ;;  %v2443_v9 = vadd.f32 1.0, %v5411_v59  ;;  %v4486_v25 = vsub.f32 1.0, %v6246_v40  ;;  %v5198_v59 = vcombine.high %v2582_v51, %v2586_v20  ;;  %v6353_v40 = vpop.permute.xlu0 %5401 }
 0x2ba   : > { %4331 = vmatprep.mubr.bf16.mxu0 %v6279_v26  ;;  %4372 = vmatprep.mubr.bf16.mxu1 %v6279_v26  ;;  %v5164_v26 = vcombine.high %v2549_v36, %v2553_v13  ;;  %5416 = vrcp.f32 %v2454_v6 }
 0x2bb   : > { %5418 = vrcp.f32 %v2443_v9  ;;  %4489 = vperm.xlu1 %5405, %v4486_v25   ;;  %v2597_v9 = vld [vmem:[#allocation14 + $0x290] sm:$0xff] }
 0x2bc   : > { %4302 = vmatpush1.bf16.msra.mxu0 %v5139_v14  ;;  %4343 = vmatpush1.bf16.msra.mxu1 %v5141_v15  ;;  %v2419_v15 = vrot.slane %v6303_v34, %v2418_v61  ;;  %v5188_v34 = vcombine.high %v2573_v16, %v2577_v17  ;;  %5420 = vrcp.f32 %v2455_v42 }
 0x2bd   : > { %4303 = vmatprep.subr.bf16.mxu0 %v5148_v23  ;;  %4344 = vmatprep.subr.bf16.mxu1 %v5150_v27  ;;  %v5182_v23 = vcombine.high %v2566_v4, %v2570_v5  ;;  %v2574_v27 = vld [vmem:[#allocation14 + $0x1d8] sm:$0xff] }
 0x2c0   : > { %4304 = vmatpush1.bf16.msra.mxu0 %v5147_v21  ;;  %4345 = vmatpush1.bf16.msra.mxu1 %v5149_v32  ;;  %v5179_v21 = vcombine.low %v2565_v63, %v2569_v1  ;;  %v5181_v32 = vcombine.low %v2566_v4, %v2570_v5  ;;  %v2593_v63 = vld [vmem:[#allocation14 + $0x270] sm:$0xff]  ;;  %v2590_v1 = vld [vmem:[#allocation14 + $0x258] sm:$0xff]  ;;  %v5415_v4 = vpop.eup %5414  ;;  %v5197_v5 = vcombine.low %v2582_v51, %v2586_v20 }
 0x2c1   : > { %4305 = vmatprep.subr.bf16.mxu0 %v5156_v33  ;;  %4346 = vmatprep.subr.bf16.mxu1 %v5158_v24 }
 0x2c4   : > { %4306 = vmatpush1.bf16.msra.mxu0 %v5155_v44  ;;  %4347 = vmatpush1.bf16.msra.mxu1 %v5157_v45  ;;  %v5190_v45 = vcombine.high %v2574_v27, %v2578_v28 }
 0x2c5   : > { %4307 = vmatprep.subr.bf16.mxu0 %v5164_v26  ;;  %4348 = vmatprep.subr.bf16.mxu1 %v5166_v47 }
 0x2c8   : > { %4308 = vmatpush1.bf16.msra.mxu0 %v5163_v52  ;;  %4349 = vmatpush1.bf16.msra.mxu1 %v5165_v54  ;;  %v5189_v54 = vcombine.low %v2574_v27, %v2578_v28  ;;  %v6355_v27 = vpop.permute.xlu0 %2494 }
 0x2c9   : > { %4309 = vmatprep.subr.bf16.mxu0 %v5172_v57  ;;  %4350 = vmatprep.subr.bf16.mxu1 %v5174_v62  ;;  %v2589_v62 = vld [vmem:[#allocation14 + $0x250] sm:$0xff] }
 0x2ca   : > { %v2338_v14 = vpop.f32.mrb[12].mxu0  ;;  %v2379_v29 = vpop.f32.mrb[12].mxu1  ;;  %v5204_v6 = vcombine.high %v2589_v62, %v2593_v63 }
 0x2cb   : > { %v2339_v19 = vadd.f32 %v2338_v14, %v6269_v37  ;;  %v2340_v30 = vpop.f32.mrb[13].mxu0  ;;  %v2380_v33 = vadd.f32 %v2379_v29, %v6271_v58  ;;  %v2381_v36 = vpop.f32.mrb[13].mxu1  ;;  %v2581_v58 = vld [vmem:[#allocation14 + $0x210] sm:$0xff]  ;;  %v5203_v14 = vcombine.low %v2589_v62, %v2593_v63  ;;  %v6358_v29 = vunpack.i.l.bf16 %v6353_v40 }
 0x2cc   : > { %v2341_v24 = vadd.f32 %v2340_v30, %v6273_v43  ;;  %v2342_v13 = vpop.f32.mrb[14].mxu0  ;;  %4310 = vmatpush1.bf16.msra.mxu0 %v5171_v7  ;;  %v2382_v41 = vadd.f32 %v2381_v36, %v6275_v46  ;;  %v2383_v44 = vpop.f32.mrb[14].mxu1  ;;  %4351 = vmatpush1.bf16.msra.mxu1 %v5173_v8  ;;  %v2585_v43 = vld [vmem:[#allocation14 + $0x230] sm:$0xff]  ;;  %v5187_v46 = vcombine.low %v2573_v16, %v2577_v17  ;;  %v2598_v16 = vld [vmem:[#allocation14 + $0x298] sm:$0xff] }
 0x2cd   : > { %v2432_v38 = vadd.f32 %v2407_v10, %v2339_v19  ;;  %v2343_v37 = vpop.f32.mrb[15].mxu0  ;;  %4311 = vmatprep.subr.bf16.mxu0 %v5180_v12  ;;  %v2434_v26 = vadd.f32 %v2415_v11, %v2380_v33  ;;  %v2384_v48 = vpop.f32.mrb[15].mxu1  ;;  %4352 = vmatprep.subr.bf16.mxu1 %v5182_v23  ;;  %v5196_v57 = vcombine.high %v2581_v58, %v2585_v43  ;;  %v2601_v10 = vld [vmem:[#allocation14 + $0x2b0] sm:$0xff]  ;;  %v2602_v17 = vld [vmem:[#allocation14 + $0x2b8] sm:$0xff] }
 0x2ce   : > { %v2433_v47 = vadd.f32 %v2411_v18, %v2341_v24  ;;  %v2435_v49 = vadd.f32 %v2419_v15, %v2382_v41  ;;  %v5195_v3 = vcombine.low %v2581_v58, %v2585_v43  ;;  %v5417_v7 = vpop.eup %5416  ;;  %v5206_v8 = vcombine.high %v2590_v1, %v2594_v2  ;;  %v516_v12 = vld [vmem:[#allocation3] sm:$0xff]  ;;  %v517_v18 = vld [vmem:[#allocation3 + $0x8] sm:$0xff] }
 0x2cf   : > { %5422 = vtanh.f32 %v2432_v38  ;;  %v4997_v52 = vmul.f32 -1.442695, %v2434_v26  ;;  %v5419_v11 = vpop.eup %5418  ;;  %v5205_v23 = vcombine.low %v2590_v1, %v2594_v2  ;;  %v5212_v28 = vcombine.high %v2597_v9, %v2601_v10  ;;  %v2605_v33 = vld [vmem:[#allocation14 + $0x2d0] sm:$0xff]  ;;  %v2610_v38 = vld [vmem:[#allocation14 + $0x2f8] sm:$0xff] }
 0x2d0   : > { %5424 = vtanh.f32 %v2433_v47  ;;  %4312 = vmatpush1.bf16.msra.mxu0 %v5179_v21  ;;  %v4998_v53 = vmul.f32 -1.442695, %v2435_v49  ;;  %4353 = vmatpush1.bf16.msra.mxu1 %v5181_v32  ;;  %v5421_v42 = vpop.eup %5420  ;;  %v2474_v30 = vmul.f32 %v5417_v7, %v516_v12  ;;  %v5214_v32 = vcombine.high %v2598_v16, %v2602_v17  ;;  %v2609_v24 = vld [vmem:[#allocation14 + $0x2f0] sm:$0xff]  ;;  %v2626_v7 = vld [vmem:[#allocation14 + $0x378] sm:$0xff] }
 0x2d1   : > { %4313 = vmatprep.subr.bf16.mxu0 %v5188_v34  ;;  %5426 = vpow2.f32 %v4997_v52  ;;  %4354 = vmatprep.subr.bf16.mxu1 %v5190_v45  ;;  %v2475_v36 = vmul.f32 %v5421_v42, %v517_v18  ;;  %v2606_v34 = vld [vmem:[#allocation14 + $0x2d8] sm:$0xff]  ;;  %v2503_v37 = vmul.f32 %v6355_v27, %v516_v12  ;;  %v5211_v45 = vcombine.low %v2597_v9, %v2601_v10  ;;  %v2613_v52 = vld [vmem:[#allocation14 + $0x310] sm:$0xff] }
 0x2d2   : > { %5428 = vpow2.f32 %v4998_v53  ;;  %v5213_v26 = vcombine.low %v2598_v16, %v2602_v17  ;;  %v2504_v43 = vmul.f32 %v6355_v27, %v517_v18  ;;  %v5220_v25 = vcombine.high %v2605_v33, %v2609_v24  ;;  %v2629_v12 = vld [vmem:[#allocation14 + $0x390] sm:$0xff]  ;;  %v2630_v17 = vld [vmem:[#allocation14 + $0x398] sm:$0xff] }
 0x2d3   : > { %v5222_v20 = vcombine.high %v2606_v34, %v2610_v38  ;;  %v5219_v62 = vcombine.low %v2605_v33, %v2609_v24  ;;  %v5221_v1 = vcombine.low %v2606_v34, %v2610_v38  ;;  %v2633_v16 = vld [vmem:[#allocation14 + $0x3b0] sm:$0xff]  ;;  %v2634_v42 = vld [vmem:[#allocation14 + $0x3b8] sm:$0xff] }
 0x2d4   : > { %4314 = vmatpush1.bf16.msra.mxu0 %v5187_v46  ;;  %4355 = vmatpush1.bf16.msra.mxu1 %v5189_v54  ;;  %v2617_v46 = vld [vmem:[#allocation14 + $0x330] sm:$0xff]  ;;  %v2614_v54 = vld [vmem:[#allocation14 + $0x318] sm:$0xff]  ;;  %v5246_v33 = vcombine.high %v2630_v17, %v2634_v42 }
 0x2d5   : > { %4315 = vmatprep.subr.bf16.mxu0 %v5196_v57  ;;  %4356 = vmatprep.subr.bf16.mxu1 %v5198_v59  ;;  %v2618_v57 = vld [vmem:[#allocation14 + $0x338] sm:$0xff]  ;;  %v5228_v2 = vcombine.high %v2613_v52, %v2617_v46  ;;  %v2637_v24 = vld [vmem:[#allocation14 + $0x3d0] sm:$0xff] }
 0x2d6   : > { %v5229_v9 = vcombine.low %v2614_v54, %v2618_v57  ;;  %v2638_v34 = vld [vmem:[#allocation14 + $0x3d8] sm:$0xff] }
 0x2d7   : > { %v2642_v38 = vld [vmem:[#allocation14 + $0x3f8] sm:$0xff] }
 0x2d8   : > { %4316 = vmatpush1.bf16.msra.mxu0 %v5195_v3  ;;  %4357 = vmatpush1.bf16.msra.mxu1 %v5197_v5  ;;  %v5230_v3 = vcombine.high %v2614_v54, %v2618_v57  ;;  %v2625_v5 = vld [vmem:[#allocation14 + $0x370] sm:$0xff] }
 0x2d9   : > { %v5423_v15 = vpop.eup %5422  ;;  %4317 = vmatprep.subr.bf16.mxu0 %v5204_v6  ;;  %4358 = vmatprep.subr.bf16.mxu1 %v5206_v8  ;;  %v2622_v6 = vld [vmem:[#allocation14 + $0x358] sm:$0xff]  ;;  %v5227_v8 = vcombine.low %v2613_v52, %v2617_v46 }
 0x2da   : > { %v5425_v19 = vpop.eup %5424  ;;  %v2476_v21 = vmul.f32 %v5423_v15, %v5415_v4  ;;  %v2621_v4 = vld [vmem:[#allocation14 + $0x350] sm:$0xff] }
 0x2db   : > { %v2477_v13 = vmul.f32 %v5425_v19, %v5419_v11  ;;  %v5427_v41 = vpop.eup %5426  ;;  %v5236_v10 = vcombine.high %v2621_v4, %v2625_v5  ;;  %v5238_v11 = vcombine.high %v2622_v6, %v2626_v7  ;;  %v5235_v18 = vcombine.low %v2621_v4, %v2625_v5 }
 0x2dc   : > { %4318 = vmatpush1.bf16.msra.mxu0 %v5203_v14  ;;  %v2478_v44 = vadd.f32 %v2476_v21, %v2474_v30  ;;  %v5429_v47 = vpop.eup %5428  ;;  %v2468_v48 = vadd.f32 1.0, %v5427_v41  ;;  %4359 = vmatpush1.bf16.msra.mxu1 %v5205_v23  ;;  %v5237_v23 = vcombine.low %v2622_v6, %v2626_v7  ;;  %v5470_v21 = vld [vmem:[#allocation2] sm:$0xff] }
 0x2dd   : > { %v2479_v58 = vadd.f32 %v2477_v13, %v2475_v36  ;;  %4319 = vmatprep.subr.bf16.mxu0 %v5212_v28  ;;  %v2469_v49 = vadd.f32 1.0, %v5429_v47  ;;  %4360 = vmatprep.subr.bf16.mxu1 %v5214_v32  ;;  %v5244_v28 = vcombine.high %v2629_v12, %v2633_v16  ;;  %v2497_v32 = vmul.f32 %v5470_v21, %v6355_v27  ;;  %v2641_v36 = vld [vmem:[#allocation14 + $0x3f0] sm:$0xff] }
 0x2de   : > { %5430 = vtanh.f32 %v2478_v44  ;;  %v2501_v51 = vmul.f32 %v6358_v29, %v2478_v44  ;;  %v5245_v47 = vcombine.low %v2630_v17, %v2634_v42 }
 0x2df   : > { %5432 = vrcp.f32 %v2468_v48  ;;  %v2502_v53 = vmul.f32 %v6358_v29, %v2479_v58  ;;  %v5252_v48 = vcombine.high %v2637_v24, %v2641_v36 }
 0x2e0   : > { %5434 = vrcp.f32 %v2469_v49  ;;  %v2505_v59 = vadd.f32 %v2503_v37, %v2501_v51  ;;  %4320 = vmatpush1.bf16.msra.mxu0 %v5211_v45  ;;  %4361 = vmatpush1.bf16.msra.mxu1 %v5213_v26  ;;  %v5471_v37 = vld [vmem:[#allocation2 + $0x8] sm:$0xff]  ;;  %v5243_v26 = vcombine.low %v2629_v12, %v2633_v16  ;;  %v5251_v51 = vcombine.low %v2637_v24, %v2641_v36 }
 0x2e1   : > { %5436 = vtanh.f32 %v2479_v58  ;;  %v2506_v63 = vadd.f32 %v2504_v43, %v2502_v53  ;;  %4321 = vmatprep.subr.bf16.mxu0 %v5220_v25  ;;  %4362 = vmatprep.subr.bf16.mxu1 %v5222_v20  ;;  %v2498_v45 = vmul.f32 %v5471_v37, %v6355_v27  ;;  %v5254_v25 = vcombine.high %v2638_v34, %v2642_v38 }
 0x2e2   : > { %4504 = vst [vmem:[#allocation3] sm:$0xff] %v2505_v59  ;;  %v5253_v27 = vcombine.low %v2638_v34, %v2642_v38 }
 0x2e3   : > { %4505 = vst [vmem:[#allocation3 + $0x8] sm:$0xff] %v2506_v63 }
 0x2e4   : > { %4322 = vmatpush1.bf16.msra.mxu0 %v5219_v62  ;;  %4363 = vmatpush1.bf16.msra.mxu1 %v5221_v1 }
 0x2e5   : > { %4323 = vmatprep.subr.bf16.mxu0 %v5228_v2  ;;  %4364 = vmatprep.subr.bf16.mxu1 %v5230_v3 }
 0x2e8   : > { %v5431_v14 = vpop.eup %5430  ;;  %4324 = vmatpush1.bf16.msra.mxu0 %v5227_v8  ;;  %4365 = vmatpush1.bf16.msra.mxu1 %v5229_v9 }
 0x2e9   : > { %v5433_v15 = vpop.eup %5432  ;;  %4325 = vmatprep.subr.bf16.mxu0 %v5236_v10  ;;  %4366 = vmatprep.subr.bf16.mxu1 %v5238_v11 }
 0x2ea   : > { %v5435_v19 = vpop.eup %5434  ;;  %v2482_v30 = vmul.f32 %v5433_v15, %v5431_v14 }
 0x2eb   : > { %v5437_v13 = vpop.eup %5436 }
 0x2ec   : > { %v2483_v41 = vmul.f32 %v5437_v13, %v5435_v19  ;;  %v2489_v44 = vmul.f32 %v6358_v29, %v2482_v30  ;;  %4326 = vmatpush1.bf16.msra.mxu0 %v5235_v18  ;;  %4367 = vmatpush1.bf16.msra.mxu1 %v5237_v23 }
 0x2ed   : > { %4327 = vmatprep.subr.bf16.mxu0 %v5244_v28  ;;  %4368 = vmatprep.subr.bf16.mxu1 %v5246_v33 }
 0x2ee   : > { %v2490_v58 = vmul.f32 %v6358_v29, %v2483_v41  ;;  %v2499_v43 = vadd.f32 %v2497_v32, %v2489_v44  ;;  %4510 = vst [vmem:[%s6208_s9] sm:$0xff] %v2489_v44 }
 0x2f0   : > { %v2500_v49 = vadd.f32 %v2498_v45, %v2490_v58  ;;  %4502 = vst [vmem:[#allocation2] sm:$0xff] %v2499_v43  ;;  %4511 = vst [vmem:[%s6208_s9 + $0x8] sm:$0xff] %v2490_v58  ;;  %4328 = vmatpush1.bf16.msra.mxu0 %v5243_v26  ;;  %4369 = vmatpush1.bf16.msra.mxu1 %v5245_v47 }
 0x2f1   : > { %4329 = vmatprep.subr.bf16.mxu0 %v5252_v48  ;;  %4370 = vmatprep.subr.bf16.mxu1 %v5254_v25 }
 0x2f2   : > { %4503 = vst [vmem:[#allocation2 + $0x8] sm:$0xff] %v2500_v49 }
 0x2f4   : > { %4330 = vmatpush1.bf16.msra.mxu0 %v5251_v51  ;;  %4371 = vmatpush1.bf16.msra.mxu1 %v5253_v27 }
 0x2f7   : > { %4332 = vmatmul.mubr.bf16.vlgmr.msra.gmra.mrb[28].mxu0 %v6324_v0  ;;  %4373 = vmatmul.mubr.bf16.vlgmr.msra.gmra.mrb[28].mxu1 %v6324_v0 }
 0x30a   : > { %v3447_v29 = vpop.f32.mrb[16].mxu0  ;;  %v3488_v20 = vpop.f32.mrb[16].mxu1 }
 0x30b   : > { %v3449_v52 = vpop.f32.mrb[17].mxu0  ;;  %v3490_v46 = vpop.f32.mrb[17].mxu1 }
 0x30c   : > { %v3451_v53 = vpop.f32.mrb[18].mxu0  ;;  %v3492_v54 = vpop.f32.mrb[18].mxu1 }
 0x30d   : > { %v3452_v57 = vpop.f32.mrb[19].mxu0  ;;  %v3493_v59 = vpop.f32.mrb[19].mxu1 }
 0x34a   : > { %v6372_v62 = vpop.f32.mrb[20].mxu0  ;;  %v6374_v63 = vpop.f32.mrb[20].mxu1 }
 0x34b   : > { %v6376_v1 = vpop.f32.mrb[21].mxu0  ;;  %v6378_v2 = vpop.f32.mrb[21].mxu1 }
 0x34c   : > { %v3533_v0 = vpop.f32.mrb[22].mxu0  ;;  %v3574_v3 = vpop.f32.mrb[22].mxu1 }
 0x34d   : > { %v3534_v4 = vpop.f32.mrb[23].mxu0  ;;  %v3575_v5 = vpop.f32.mrb[23].mxu1 }
 0x34e   : > { %5659 = shalt.err (!%p5656_p0)
}
 0x34f   : > { %s5660_s28 = scalar_lea.hbm %s6385_s25, 256  ;;  %s5664_s21 = scalar_lea.hbm %s6557_s8, 2048 }
 0x350   : > { %p5661_p2 = scmp.ne.s32.totalorder %s6385_s25, %s5660_s28  ;;  %p5665_p11 = scmp.lt.u32.totalorder %s6385_s25, %s6557_s8 }
 0x351   : > { %p5666_p5 = scmp.lt.u32.totalorder %s5664_s21, %s5660_s28  ;;  %p5668_p13 = scmp.lt.u32.totalorder %s5660_s28, %s6385_s25 }
 0x352   : > { %p5662_p4 = pnand %p5661_p2, %p6558_p7 }
 0x353   : > { %p5667_p8 = por %p5666_p5, %p5665_p11 }
 0x354   : > { %p5663_p12 = pneg %p5662_p4 }
 0x355   : > { %p5669_p9 = por %p5668_p13, %p5667_p8 }
 0x357   : > { %p5670_p3 = pnand %p5669_p9, %p5663_p12 }
 0x359   : > { %5673 = shalt.err (!%p5670_p3)
}
 0x35a   : > { %5293 = dma.vmem_to_hbm [thread:$0]  (%p6558_p7), %s4535_s5, 256, %s6385_s25, %s4515_s11   ;;  %v2511_v0 = vld [vmem:[#allocation5] sm:$0xff]  ;;  %v2512_v4 = vld [vmem:[#allocation5 + $0x8] sm:$0xff]  ;;  %v4490_v5 = vpop.permute.xlu1 %4489 }
 0x35b   : > { %s6559_s3 = sld [smem:[#allocation33_spill]]  ;;  %s6560_s30 = ssub.s32 7, %s5890_s22 }
 0x35c   : > { %s5272_s5 = sshll.u32 %s6560_s30, 8  ;;  %s4549_s25 = sshll.u32 %s6211_s2, 4  ;;  %s6438_s25 = int_to_ptr.vmem [resolvable:$true] %s4549_s25 }
 0x35d   : > { %s6561_s9 = sld [smem:[#allocation35_spill]]  ;;  %s6562_s22 = sand.u32 1, %s5764_s14  }
 0x35e   : > { %s4520_s21 = scalar_lea.sflag [#allocation19], %s6562_s22  ;;  %s5674_s4 = scalar_lea.vmem %s6438_s25, 256 }
 0x35f   : > { %p5675_p7 = scmp.ne.s32.totalorder %s6438_s25, %s5674_s4  ;;  %p6563_p10 = scmp.ne.s32.totalorder %s6542_s20, 0 }
 0x360   : > { %s5798_s6 = smov [#allocation18]  }
 0x361   : > { %v4381_v15 = vld [vmem:[%s6559_s3] sm:$0xff]  ;;  %p5676_p6 = pnand %p5675_p7, %p6563_p10  ;;  %s5678_s0 = sshll.u32 %s5798_s6, 4  ;;  %s5679_s0 = int_to_ptr.vmem [resolvable:$false] %s5678_s0 }
 0x362   : > { %v4386_v23 = vrot.slane %v4381_v15, %v2390_v31  ;;  %v4394_v28 = vrot.slane %v4381_v15, %v2398_v35  ;;  %v4390_v19 = vrot.slane %v4381_v15, %v2394_v50  ;;  %v4398_v30 = vrot.slane %v4381_v15, %v2402_v39  ;;  %s5680_s29 = scalar_lea.vmem %s5679_s0, 512  ;;  %p5681_p0 = scmp.lt.s32.totalorder %s6438_s25, %s5679_s0 }
 0x363   : > { %v4402_v39 = vrot.slane %v4381_v15, %v2406_v55  ;;  %v4410_v48 = vrot.slane %v4381_v15, %v2414_v56  ;;  %v4406_v58 = vrot.slane %v4381_v15, %v2410_v60  ;;  %v4414_v51 = vrot.slane %v4381_v15, %v2418_v61  ;;  %s6436_s23 = scalar_lea.hbm %s6561_s9, %s5272_s5  ;;  %p5677_p1 = pneg %p5676_p6 }
 0x364   : > { %v4499_v15 = vmul.f32 %v4490_v5, %v2512_v4  ;;  %p5682_p2 = scmp.lt.s32.totalorder %s5680_s29, %s5674_s4 }
 0x366   : > { %p5683_p4 = por %p5682_p2, %p5681_p0 }
 0x368   : > { %p5684_p12 = pnand %p5683_p4, %p5677_p1 }
 0x38a   : > { %v4251_v6 = vpop.f32.mrb[24].mxu0  ;;  %v4292_v8 = vpop.f32.mrb[24].mxu1 }
 0x38b   : > { %v4252_v7 = vadd.f32 %v4251_v6, %v3447_v29  ;;  %v4253_v9 = vpop.f32.mrb[25].mxu0  ;;  %v4293_v10 = vadd.f32 %v4292_v8, %v3488_v20  ;;  %v4294_v12 = vpop.f32.mrb[25].mxu1 }
 0x38c   : > { %v4254_v11 = vadd.f32 %v4253_v9, %v3449_v52  ;;  %v4255_v16 = vpop.f32.mrb[26].mxu0  ;;  %v4295_v17 = vadd.f32 %v4294_v12, %v3490_v46  ;;  %v4296_v42 = vpop.f32.mrb[26].mxu1 }
 0x38d   : > { %v4256_v14 = vpop.f32.mrb[27].mxu0  ;;  %v4297_v18 = vpop.f32.mrb[27].mxu1  ;;  %v4423_v21 = vadd.f32 %v4386_v23, %v4252_v7  ;;  %v4425_v32 = vadd.f32 %v4394_v28, %v4293_v10  ;;  %v5404_v7 = vunpack.i.h.bf16 %v6353_v40 }
 0x38e   : > { %v4424_v33 = vadd.f32 %v4390_v19, %v4254_v11  ;;  %v4426_v24 = vadd.f32 %v4398_v30, %v4295_v17  ;;  %v4498_v17 = vmul.f32 %v4490_v5, %v2511_v0 }
 0x38f   : > { %v5255_v36 = vmul.f32 -1.442695, %v4423_v21  ;;  %v5257_v13 = vmul.f32 -1.442695, %v4425_v32 }
 0x390   : > { %v5256_v34 = vmul.f32 -1.442695, %v4424_v33  ;;  %v5258_v38 = vmul.f32 -1.442695, %v4426_v24 }
 0x391   : > { %5438 = vpow2.f32 %v5255_v36  ;;  %v5472_v36 = vld [vmem:[#allocation4] sm:$0xff] }
 0x392   : > { %5440 = vpow2.f32 %v5257_v13  ;;  %v4492_v13 = vmul.f32 %v5472_v36, %v4490_v5 }
 0x393   : > { %5442 = vpow2.f32 %v5256_v34 }
 0x394   : > { %5444 = vpow2.f32 %v5258_v38 }
 0x39b   : > { %v5439_v31 = vpop.eup %5438 }
 0x39c   : > { %v5441_v35 = vpop.eup %5440  ;;  %v4437_v50 = vadd.f32 1.0, %v5439_v31 }
 0x39d   : > { %v5443_v41 = vpop.eup %5442  ;;  %v4449_v37 = vadd.f32 1.0, %v5441_v35  ;;  %v5473_v35 = vld [vmem:[#allocation4 + $0x8] sm:$0xff] }
 0x39e   : > { %v5445_v44 = vpop.eup %5444  ;;  %v4438_v45 = vadd.f32 1.0, %v5443_v41  ;;  %5446 = vrcp.f32 %v4437_v50  ;;  %v4493_v41 = vmul.f32 %v5473_v35, %v4490_v5 }
 0x39f   : > { %v4450_v26 = vadd.f32 1.0, %v5445_v44  ;;  %5448 = vrcp.f32 %v4449_v37 }
 0x3a0   : > { %5450 = vrcp.f32 %v4438_v45 }
 0x3a1   : > { %5452 = vrcp.f32 %v4450_v26 }
 0x3ca   : > { %v4333_v47 = vpop.f32.mrb[28].mxu0  ;;  %v4374_v25 = vpop.f32.mrb[28].mxu1 }
 0x3cb   : > { %v4334_v43 = vadd.f32 %v4333_v47, %v6372_v62  ;;  %v4335_v49 = vpop.f32.mrb[29].mxu0  ;;  %v4375_v27 = vadd.f32 %v4374_v25, %v6374_v63  ;;  %v4376_v29 = vpop.f32.mrb[29].mxu1 }
 0x3cc   : > { %v4336_v55 = vadd.f32 %v4335_v49, %v6376_v1  ;;  %v4337_v20 = vpop.f32.mrb[30].mxu0  ;;  %v4377_v52 = vadd.f32 %v4376_v29, %v6378_v2  ;;  %v4378_v60 = vpop.f32.mrb[30].mxu1 }
 0x3cd   : > { %v4427_v56 = vadd.f32 %v4402_v39, %v4334_v43  ;;  %v4338_v46 = vpop.f32.mrb[31].mxu0  ;;  %v4429_v53 = vadd.f32 %v4410_v48, %v4375_v27  ;;  %v4379_v57 = vpop.f32.mrb[31].mxu1 }
 0x3ce   : > { %v4428_v54 = vadd.f32 %v4406_v58, %v4336_v55  ;;  %v4430_v22 = vadd.f32 %v4414_v51, %v4377_v52  ;;  %v5447_v62 = vpop.eup %5446 }
 0x3cf   : > { %5454 = vtanh.f32 %v4427_v56  ;;  %v5259_v61 = vmul.f32 -1.442695, %v4429_v53  ;;  %v5449_v63 = vpop.eup %5448 }
 0x3d0   : > { %5456 = vtanh.f32 %v4428_v54  ;;  %v5260_v59 = vmul.f32 -1.442695, %v4430_v22  ;;  %v5451_v1 = vpop.eup %5450  ;;  %v4469_v8 = vmul.f32 %v5449_v63, %v2511_v0 }
 0x3d1   : > { %5458 = vpow2.f32 %v5259_v61  ;;  %v5453_v3 = vpop.eup %5452 }
 0x3d2   : > { %5460 = vpow2.f32 %v5260_v59  ;;  %v4470_v10 = vmul.f32 %v5453_v3, %v2512_v4 }
 0x3d9   : > { %v5455_v2 = vpop.eup %5454 }
 0x3da   : > { %v5457_v6 = vpop.eup %5456  ;;  %v4471_v9 = vmul.f32 %v5455_v2, %v5447_v62 }
 0x3db   : > { %v4472_v11 = vmul.f32 %v5457_v6, %v5451_v1  ;;  %v5459_v12 = vpop.eup %5458 }
 0x3dc   : > { %v4473_v16 = vadd.f32 %v4471_v9, %v4469_v8  ;;  %v5461_v42 = vpop.eup %5460  ;;  %v4463_v14 = vadd.f32 1.0, %v5459_v12 }
 0x3dd   : > { %v4474_v18 = vadd.f32 %v4472_v11, %v4470_v10  ;;  %v4464_v23 = vadd.f32 1.0, %v5461_v42 }
 0x3de   : > { %5462 = vtanh.f32 %v4473_v16  ;;  %v4496_v28 = vmul.f32 %v5404_v7, %v4473_v16 }
 0x3df   : > { %5464 = vrcp.f32 %v4463_v14  ;;  %v4497_v19 = vmul.f32 %v5404_v7, %v4474_v18 }
 0x3e0   : > { %5466 = vrcp.f32 %v4464_v23  ;;  %v4500_v40 = vadd.f32 %v4498_v17, %v4496_v28 }
 0x3e1   : > { %5468 = vtanh.f32 %v4474_v18  ;;  %v4501_v30 = vadd.f32 %v4499_v15, %v4497_v19 }
 0x3e2   : > { %4508 = vst [vmem:[#allocation5] sm:$0xff] %v4500_v40 }
 0x3e3   : > { %4509 = vst [vmem:[#allocation5 + $0x8] sm:$0xff] %v4501_v30 }
 0x3e8   : > { %v5463_v21 = vpop.eup %5462 }
 0x3e9   : > { %v5465_v32 = vpop.eup %5464 }
 0x3ea   : > { %v5467_v33 = vpop.eup %5466  ;;  %v4477_v24 = vmul.f32 %v5465_v32, %v5463_v21 }
 0x3eb   : > { %v5469_v34 = vpop.eup %5468 }
 0x3ec   : > { %v4478_v38 = vmul.f32 %v5469_v34, %v5467_v33  ;;  %v4484_v31 = vmul.f32 %v5404_v7, %v4477_v24 }
 0x3ee   : > { %v4485_v44 = vmul.f32 %v5404_v7, %v4478_v38  ;;  %v4494_v50 = vadd.f32 %v4492_v13, %v4484_v31  ;;  %4512 = vst [vmem:[%s6211_s2] sm:$0xff] %v4484_v31 }
 0x3f0   : > { %v4495_v37 = vadd.f32 %v4493_v41, %v4485_v44  ;;  %4506 = vst [vmem:[#allocation4] sm:$0xff] %v4494_v50  ;;  %4513 = vst [vmem:[%s6211_s2 + $0x8] sm:$0xff] %v4485_v44 }
 0x3f1   : > { %5687 = shalt.err (!%p5684_p12)
}
 0x3f2   : > { %s5688_s2 = scalar_lea.hbm %s6436_s23, 256  ;;  %s5692_s5 = scalar_lea.hbm %s6561_s9, 2048 }
 0x3f3   : > { %p5689_p11 = scmp.ne.s32.totalorder %s6436_s23, %s5688_s2  ;;  %p5693_p13 = scmp.lt.u32.totalorder %s6436_s23, %s6561_s9 }
 0x3f4   : > { %p5694_p9 = scmp.lt.u32.totalorder %s5692_s5, %s5688_s2  ;;  %p5696_p7 = scmp.lt.u32.totalorder %s5688_s2, %s6436_s23 }
 0x3f5   : > { %p5690_p5 = pnand %p5689_p11, %p6563_p10 }
 0x3f6   : > { %p5695_p3 = por %p5694_p9, %p5693_p13 }
 0x3f7   : > { %p5691_p8 = pneg %p5690_p5 }
 0x3f8   : > { %p5697_p6 = por %p5696_p7, %p5695_p3 }
 0x3fa   : > { %p5698_p1 = pnand %p5697_p6, %p5691_p8 }
 0x3fc   : > { %5701 = shalt.err (!%p5698_p1)
}
 0x3fd   : > { %5294 = dma.vmem_to_hbm [thread:$0]  (%p6563_p10), %s6438_s25, 256, %s6436_s23, %s4520_s21   ;;  %4507 = vst [vmem:[#allocation4 + $0x8] sm:$0xff] %v4495_v37 }
 0x3fe PF: > { %p5333_p0 = scmp.ge.s32.totalorder %s5784_s19, 2  ;;  %s4561_s22 = sand.u32 1, %s5772_s16  }
 0x3ff   : > { %p6564_p2 = scmp.ne.s32.totalorder %s6535_s10, 0  ;;  %s4562_s4 = scalar_lea.sflag [#allocation8], %s4561_s22 }
 0x401   : > { %p5318_p4 = pnand %p5333_p0, %p6564_p2 }
 0x403   : > { %5751 = dma.done.wait (!%p5318_p4), %s4562_s4, 256  }
 0x404   : > { %5753 = vsyncadd (!%p5318_p4), %s4562_s4, 4294967040  ;;  %s4570_s6 = sand.u32 1, %s5760_s13   ;;  %p6565_p12 = scmp.ne.s32.totalorder %s6543_s24, 0 }
 0x405   : > { %s4571_s20 = scalar_lea.sflag [#allocation19], %s4570_s6 }
 0x406   : > { %p5321_p11 = pnand %p5333_p0, %p6565_p12 }
 0x408   : > { %5755 = dma.done.wait (!%p5321_p11), %s4571_s20, 256  }
 0x409   : > { %5757 = vsyncadd (!%p5321_p11), %s4571_s20, 4294967040  ;;  %p32_p10 = scmp.ge.s32.totalorder %s6093_s26, 10   ;;  %s6566_s13 = smov %s5764_s14 }
 0x40a   : > { %s6567_s14 = smov %s5768_s15  ;;  %s6568_s15 = smov %s6106_s27 }
 0x40b   : > { %s6569_s16 = smov %s5776_s17  ;;  %s6570_s17 = smov %s5780_s18 }
 0x40c   : > { %s6571_s18 = smov %s6103_s12  ;;  %s6572_s19 = smov %s6093_s26 }
 0x40d   :  { %34 = sbr.rel (!%p32_p10) target bundleno = 23 (0x17), region = 151 }
 0x414   :  { %4576 = vsyncpa [#allocation7], 1 }
 0x415   :  { %4578 = vsyncpa [#allocation7 + $0x1], 1 }
 0x416   :  { %4579 = vsyncpa [#allocation10], 1 }
 0x417   :  { %4581 = vsyncpa [#allocation10 + $0x1], 1 }
 0x418   :  { %4582 = vsyncpa [#allocation13], 1 }
 0x419   :  { %4583 = vsyncpa [#allocation16], 1 }
 0x41a   :  { %4584 = vsyncpa [#allocation8], 1 }
 0x41b   :  { %4586 = vsyncpa [#allocation8 + $0x1], 1 }
 0x41c   :  { %4587 = vsyncpa [#allocation19], 1 }
 0x41d   :  { %4589 = vsyncpa [#allocation19 + $0x1], 1 }

</bundles_post_ra>
